<compile_context>
chip_gen: v6e
topology: v6e:2x2x1
jax: 0.10.0
libtpu: 0.0.40
codegen_flags: <defaults>
</compile_context>

<pallas_src>
import math
import functools

import jax
import jax.numpy as jnp
from jax import lax
from jax.experimental import pallas as pl
from jax.experimental.pallas import tpu as pltpu

# ---------------- small HuBERT-like config ----------------
CONV_DIM = (32, 32)          # note: C0 == C1 == HIDDEN (lets the packed vec table share width)
CONV_KERNEL = (4, 4)
CONV_STRIDE = (2, 2)
HIDDEN = 32
NUM_LAYERS = 2
NUM_HEADS = 4
HEAD_DIM = HIDDEN // NUM_HEADS
INTERMEDIATE = 64
POS_CONV_KERNEL = 4
POS_CONV_GROUPS = 4
EPS = 1e-5


def _gelu(x):
    # TODO(synk): HF "gelu" is the exact erf GELU; tanh approximation used here for
    # Mosaic-safe lowering inside the kernel.
    c = math.sqrt(2.0 / math.pi)
    return 0.5 * x * (1.0 + jnp.tanh(c * (x + 0.044715 * x * x * x)))


def _ln(x, g, b, eps=EPS):
    """Row-wise layer norm over the last axis (stats in f32)."""
    mu = jnp.mean(x, axis=-1, keepdims=True)
    var = jnp.mean((x - mu) ** 2, axis=-1, keepdims=True)
    return (x - mu) * lax.rsqrt(var + eps) * g + b


# ---------------- single fused kernel ----------------
def _fused_hubert_kernel(wave_ref, w0_ref, w1_ref, fpw_ref, poswk_ref, vec0_ref,
                         wqkv_ref, woexp_ref, wff1_ref, wff2_ref, vecl_ref, o_ref,
                         *, B, L, T1, T):
    H = HIDDEN
    C0, C1 = CONV_DIM
    K0, K1 = CONV_KERNEL
    S0, S1 = CONV_STRIDE
    pad = POS_CONV_KERNEL // 2
    scale = 1.0 / math.sqrt(HEAD_DIM)

    wave = wave_ref[...]            # (L, B)  waveform, time on sublanes
    w0 = w0_ref[...]                # (K0, C0)
    w1 = w1_ref[...]                # (K1, C0, C1)
    fpw = fpw_ref[...]              # (C1, H)
    poswk = poswk_ref[...]          # (K, H, H)

    v0 = vec0_ref[...]              # (8, 32) packed stage vectors
    gn_g, gn_b = v0[0:1, :C0], v0[1:2, :C0]
    fp_ln_g, fp_ln_b = v0[2:3, :C1], v0[3:4, :C1]
    fp_b = v0[4:5, :H]
    pos_b = v0[5:6, :H]
    enc_ln_g, enc_ln_b = v0[6:7, :H], v0[7:8, :H]

    # ---- in-kernel im2col: iota-built 0/1 selection matmuls (no XLA gather/pad) ----
    r0 = lax.broadcasted_iota(jnp.int32, (T1, L), 0)
    c0 = lax.broadcasted_iota(jnp.int32, (T1, L), 1)
    # taps0[k][t, b] = wave[S0*t + k, b]   (shared by all batches)
    taps0 = [jnp.dot((c0 == S0 * r0 + k).astype(jnp.float32), wave,
                     preferred_element_type=jnp.float32) for k in range(K0)]
    r1 = lax.broadcasted_iota(jnp.int32, (T, T1), 0)
    c1 = lax.broadcasted_iota(jnp.int32, (T, T1), 1)
    sel1 = [(c1 == S1 * r1 + k).astype(jnp.float32) for k in range(K1)]   # (T, T1) per tap

    zpad = jnp.zeros((pad, H), jnp.float32)
    x_parts = []
    for b in range(B):                                     # static batch loop (B small)
        # conv0 (Cin=1, no bias) + per-channel GroupNorm over time + GELU
        y0 = taps0[0][:, b:b + 1] * w0[0:1, :]
        for k in range(1, K0):
            y0 = y0 + taps0[k][:, b:b + 1] * w0[k:k + 1, :]                # (T1, C0)
        mu = jnp.mean(y0, axis=0, keepdims=True)
        var = jnp.mean((y0 - mu) ** 2, axis=0, keepdims=True)
        y0 = _gelu((y0 - mu) * lax.rsqrt(var + EPS) * gn_g + gn_b)

        # conv1 (no bias) + GELU : per-tap selection matmul + weight matmul
        y1 = jnp.zeros((T, C1), jnp.float32)
        for k in range(K1):
            yk = jnp.dot(sel1[k], y0, preferred_element_type=jnp.float32)  # (T, C0)
            y1 = y1 + jnp.dot(yk, w1[k], preferred_element_type=jnp.float32)
        y1 = _gelu(y1)

        # feature projection: LayerNorm + Linear
        hid = jnp.dot(_ln(y1, fp_ln_g, fp_ln_b), fpw,
                      preferred_element_type=jnp.float32) + fp_b           # (T, H)

        # positional grouped conv (SamePad) + GELU + residual + encoder LayerNorm
        hp = jnp.concatenate([zpad, hid, zpad], axis=0)                    # (T + 2*pad, H)
        pos = jnp.zeros((T, H), jnp.float32) + pos_b
        for k in range(POS_CONV_KERNEL):
            pos = pos + jnp.dot(hp[k:k + T, :], poswk[k],
                                preferred_element_type=jnp.float32)
        x_parts.append(_ln(hid + _gelu(pos), enc_ln_g, enc_ln_b))

    x = jnp.concatenate(x_parts, axis=0)                                   # (B*T, H)

    # ---- transformer layers: in-kernel layer loop, x resident in vregs/VMEM ----
    for l in range(NUM_LAYERS):
        vl = vecl_ref[l]                                                   # (8, 3H) packed
        b_qkv = vl[0:1, :]
        b_ff1 = vl[1:2, :INTERMEDIATE]
        bo = vl[2:3, :H]
        ln1_g, ln1_b = vl[3:4, :H], vl[4:5, :H]
        b_ff2 = vl[5:6, :H]
        ln2_g, ln2_b = vl[6:7, :H], vl[7:8, :H]

        # fused QKV on the flattened (B*T, H) block
        qkv = jnp.dot(x, wqkv_ref[l], preferred_element_type=jnp.float32) + b_qkv
        woe = woexp_ref[l]                                                 # (H, NH*H) block-diag Wo
        attn_parts = []
        for b in range(B):
            qkv_b = qkv[b * T:(b + 1) * T, :]
            q = qkv_b[:, 0:H] * scale
            kk = qkv_b[:, H:2 * H]
            v = qkv_b[:, 2 * H:3 * H]
            # fold the output projection into V once per batch: V'_h = V_h @ Wo_h
            vexp = jnp.dot(v, woe, preferred_element_type=jnp.float32)     # (T, NH*H), lane-dense
            acc = jnp.zeros((T, H), jnp.float32)
            for h in range(NUM_HEADS):
                lo = h * HEAD_DIM
                s = lax.dot_general(q[:, lo:lo + HEAD_DIM], kk[:, lo:lo + HEAD_DIM],
                                    (((1,), (1,)), ((), ())),
                                    preferred_element_type=jnp.float32)    # (T, T)
                p_ = jnp.exp(s - jnp.max(s, axis=-1, keepdims=True))
                p_ = p_ / jnp.sum(p_, axis=-1, keepdims=True)              # exact divide
                acc = acc + jnp.dot(p_, vexp[:, h * H:(h + 1) * H],
                                    preferred_element_type=jnp.float32)
            attn_parts.append(acc)
        attn = jnp.concatenate(attn_parts, axis=0) + bo                    # (B*T, H)

        h1 = _ln(x + attn, ln1_g, ln1_b)
        ff = _gelu(jnp.dot(h1, wff1_ref[l], preferred_element_type=jnp.float32) + b_ff1)
        ff = jnp.dot(ff, wff2_ref[l], preferred_element_type=jnp.float32) + b_ff2
        x = _ln(h1 + ff, ln2_g, ln2_b)

    for b in range(B):
        o_ref[b] = x[b * T:(b + 1) * T, :].astype(o_ref.dtype)


# ---------------- pallas_call wrapper (one call for the whole forward) ----------------
def _full_spec(shape):
    nd = len(shape)
    return pl.BlockSpec(shape, lambda i, _nd=nd: (0,) * _nd)


def fused_forward_call(wave_t, p, *, B, L, T1, T):
    kernel = functools.partial(_fused_hubert_kernel, B=B, L=L, T1=T1, T=T)
    args = (wave_t, p["w0"], p["w1"], p["fp_w"], p["pos_wk"], p["vec0"],
            p["w_qkv"], p["wo_exp"], p["w_ff1"], p["w_ff2"], p["vecl"])
    return pl.pallas_call(
        kernel,
        out_shape=jax.ShapeDtypeStruct((B, T, HIDDEN), jnp.float32),
        grid=(1,),
        in_specs=[_full_spec(a.shape) for a in args],
        out_specs=pl.BlockSpec((B, T, HIDDEN), lambda i: (0, 0, 0)),
        compiler_params=pltpu.CompilerParams(dimension_semantics=("arbitrary",)),
    )(*args)


# ---------------- parameter construction (synthetic, packed for the fused kernel) ----------------
def grouped_conv_weight_to_kdense(w, groups):
    """PyTorch grouped Conv1d weight (Cout, Cin_per_group, K) -> per-tap dense
       block-diagonal (K, Cin, Cout) so that out[t] = sum_k x_padded[t + k] @ W[k]."""
    Cout, Cpg, K = w.shape
    opg = Cout // groups
    Wk = jnp.zeros((K, Cpg * groups, Cout), jnp.float32)
    for g in range(groups):
        for cl in range(Cpg):
            ci = g * Cpg + cl
            Wk = Wk.at[:, ci, g * opg:(g + 1) * opg].set(
                jnp.transpose(w[g * opg:(g + 1) * opg, cl, :]))   # (K, opg)
    return Wk


def init_params(key):
    keys = iter(jax.random.split(key, 64))

    def nrm(shape):
        return 0.02 * jax.random.normal(next(keys), shape, jnp.float32)

    C0, C1 = CONV_DIM
    K0, K1 = CONV_KERNEL
    H = HIDDEN

    p = {}
    # feature extractor (weights pre-reshaped for the in-kernel per-tap matmuls; no bias)
    conv0_w = nrm((C0, 1, K0))                                   # (Cout, Cin=1, K)
    p["w0"] = jnp.transpose(conv0_w[:, 0, :], (1, 0))            # (K0, C0)
    conv1_w = nrm((C1, C0, K1))                                  # (Cout, Cin, K)
    p["w1"] = jnp.transpose(conv1_w, (2, 1, 0))                  # (K1, C0, C1)
    # feature projection
    p["fp_w"] = nrm((C1, H))
    # positional conv embedding: grouped conv -> per-tap dense block-diagonal weights
    pos_w = nrm((H, H // POS_CONV_GROUPS, POS_CONV_KERNEL))
    p["pos_wk"] = grouped_conv_weight_to_kdense(pos_w, POS_CONV_GROUPS)   # (K, H, H)

    # packed per-stage vectors (C0 == C1 == H == 32 so one width fits all):
    # rows: gn_g, gn_b, fp_ln_g, fp_ln_b, fp_b, pos_b, enc_ln_g, enc_ln_b
    ones = jnp.ones((H,), jnp.float32)
    zeros = jnp.zeros((H,), jnp.float32)
    p["vec0"] = jnp.stack([ones, zeros, ones, zeros, zeros, zeros, ones, zeros], axis=0)

    # transformer layers, stacked on a leading layer axis
    VW = 3 * H                                                   # packed row width (96)

    def row(v):
        return jnp.pad(v, (0, VW - v.shape[0]))

    wqkv, woexp, wff1, wff2, vecl = [], [], [], [], []
    for _ in range(NUM_LAYERS):
        wq, wk, wv = nrm((H, H)), nrm((H, H)), nrm((H, H))
        wqkv.append(jnp.concatenate([wq, wk, wv], axis=1))       # (H, 3H)
        wo = nrm((H, H))
        # block-diagonal expansion of Wo so V' = V @ wo_exp gives [V_h @ Wo_h]_h
        we = jnp.zeros((H, NUM_HEADS * H), jnp.float32)
        for h in range(NUM_HEADS):
            we = we.at[h * HEAD_DIM:(h + 1) * HEAD_DIM, h * H:(h + 1) * H].set(
                wo[h * HEAD_DIM:(h + 1) * HEAD_DIM, :])
        woexp.append(we)
        wff1.append(nrm((H, INTERMEDIATE)))
        wff2.append(nrm((INTERMEDIATE, H)))
        vecl.append(jnp.stack([
            jnp.zeros((VW,), jnp.float32),                       # b_qkv
            row(jnp.zeros((INTERMEDIATE,), jnp.float32)),        # b_ff1
            row(jnp.zeros((H,), jnp.float32)),                   # bo
            row(jnp.ones((H,), jnp.float32)),                    # ln1_g
            row(jnp.zeros((H,), jnp.float32)),                   # ln1_b
            row(jnp.zeros((H,), jnp.float32)),                   # b_ff2
            row(jnp.ones((H,), jnp.float32)),                    # ln2_g
            row(jnp.zeros((H,), jnp.float32)),                   # ln2_b
        ], axis=0))                                              # (8, 3H)
    p["w_qkv"] = jnp.stack(wqkv)                                 # (L, H, 3H)
    p["wo_exp"] = jnp.stack(woexp)                               # (L, H, NH*H)
    p["w_ff1"] = jnp.stack(wff1)                                 # (L, H, I)
    p["w_ff2"] = jnp.stack(wff2)                                 # (L, I, H)
    p["vecl"] = jnp.stack(vecl)                                  # (L, 8, 3H)
    return p


# ---------------- forward ----------------
def pretrained_encoder_forward(params, inputs, wave_len):
    """inputs: (B, L) float32 waveform, wave_len: (B,) int32.
       Returns (last_hidden_state (B, T, HIDDEN), enc_len (B,) int32)."""
    B, L = inputs.shape
    K0, K1 = CONV_KERNEL
    S0, S1 = CONV_STRIDE
    T1 = (L - K0) // S0 + 1
    T = (T1 - K1) // S1 + 1

    wave_t = jnp.transpose(inputs, (1, 0))      # (L, B); only XLA op feeding the single fused call
    last_hidden_state = fused_forward_call(wave_t, params, B=B, L=L, T1=T1, T=T)

    # ---- enc_len = floor(wave_len * (T / max(wave_len))) ----
    ratio = jnp.float32(T) / jnp.max(wave_len).astype(jnp.float32)
    enc_len = jnp.floor(wave_len.astype(jnp.float32) * ratio).astype(jnp.int32)
    return last_hidden_state, enc_len


if __name__ == "__main__":
    key = jax.random.PRNGKey(0)
    pkey, xkey = jax.random.split(key)
    params = init_params(pkey)

    B, L = 2, 64
    inputs = jax.random.normal(xkey, (B, L), jnp.float32)
    wave_len = jnp.array([64, 48], dtype=jnp.int32)

    fwd = jax.jit(pretrained_encoder_forward)
    last_hidden_state, enc_len = fwd(params, inputs, wave_len)
    jax.block_until_ready((last_hidden_state, enc_len))

    # expected frame count: L=64 -> conv(K=4,s=2)=31 -> conv(K=4,s=2)=14
    assert last_hidden_state.shape == (B, 14, HIDDEN), last_hidden_state.shape
    assert enc_len.shape == (B,) and enc_len.dtype == jnp.int32
    assert bool(jnp.all(jnp.isfinite(last_hidden_state)))
    print("KERNEL_OK")
</pallas_src>

<mosaic_0001>
module attributes {stable_mosaic.version = 11 : i64} {
  func.func @_fused_hubert_kernel(%arg0: i32, %arg1: memref<64x2xf32, #tpu.memory_space<vmem>>, %arg2: memref<4x32xf32, #tpu.memory_space<vmem>>, %arg3: memref<4x32x32xf32, #tpu.memory_space<vmem>>, %arg4: memref<32x32xf32, #tpu.memory_space<vmem>>, %arg5: memref<4x32x32xf32, #tpu.memory_space<vmem>>, %arg6: memref<8x32xf32, #tpu.memory_space<vmem>>, %arg7: memref<2x32x96xf32, #tpu.memory_space<vmem>>, %arg8: memref<2x32x128xf32, #tpu.memory_space<vmem>>, %arg9: memref<2x32x64xf32, #tpu.memory_space<vmem>>, %arg10: memref<2x64x32xf32, #tpu.memory_space<vmem>>, %arg11: memref<2x8x96xf32, #tpu.memory_space<vmem>>, %arg12: memref<2x14x32xf32, #tpu.memory_space<vmem>>) attributes {dimension_semantics = [#tpu.dimension_semantics<arbitrary>], iteration_bounds = array<i64: 1>, scalar_prefetch = 0 : i64, scratch_operands = 0 : i64, tpu.core_type = #tpu.core_type<tc>, window_params = [{pipeline_mode = #tpu.pipeline_mode<synchronous>, transform_indices = @transform_0, window_bounds = array<i64: 64, 2>}, {pipeline_mode = #tpu.pipeline_mode<synchronous>, transform_indices = @transform_1, window_bounds = array<i64: 4, 32>}, {pipeline_mode = #tpu.pipeline_mode<synchronous>, transform_indices = @transform_2, window_bounds = array<i64: 4, 32, 32>}, {pipeline_mode = #tpu.pipeline_mode<synchronous>, transform_indices = @transform_3, window_bounds = array<i64: 32, 32>}, {pipeline_mode = #tpu.pipeline_mode<synchronous>, transform_indices = @transform_4, window_bounds = array<i64: 4, 32, 32>}, {pipeline_mode = #tpu.pipeline_mode<synchronous>, transform_indices = @transform_5, window_bounds = array<i64: 8, 32>}, {pipeline_mode = #tpu.pipeline_mode<synchronous>, transform_indices = @transform_6, window_bounds = array<i64: 2, 32, 96>}, {pipeline_mode = #tpu.pipeline_mode<synchronous>, transform_indices = @transform_7, window_bounds = array<i64: 2, 32, 128>}, {pipeline_mode = #tpu.pipeline_mode<synchronous>, transform_indices = @transform_8, window_bounds = array<i64: 2, 32, 64>}, {pipeline_mode = #tpu.pipeline_mode<synchronous>, transform_indices = @transform_9, window_bounds = array<i64: 2, 64, 32>}, {pipeline_mode = #tpu.pipeline_mode<synchronous>, transform_indices = @transform_10, window_bounds = array<i64: 2, 8, 96>}, {pipeline_mode = #tpu.pipeline_mode<synchronous>, transform_indices = @transform_11, window_bounds = array<i64: 2, 14, 32>}]} {
    %c0 = arith.constant 0 : index
    %c0_0 = arith.constant 0 : index
    %0 = vector.load %arg1[%c0, %c0_0] : memref<64x2xf32, #tpu.memory_space<vmem>>, vector<64x2xf32>
    %c0_1 = arith.constant 0 : index
    %c0_2 = arith.constant 0 : index
    %1 = vector.load %arg2[%c0_1, %c0_2] : memref<4x32xf32, #tpu.memory_space<vmem>>, vector<4x32xf32>
    %c0_3 = arith.constant 0 : index
    %c0_4 = arith.constant 0 : index
    %c0_5 = arith.constant 0 : index
    %2 = vector.load %arg3[%c0_3, %c0_4, %c0_5] : memref<4x32x32xf32, #tpu.memory_space<vmem>>, vector<4x32x32xf32>
    %c0_6 = arith.constant 0 : index
    %c0_7 = arith.constant 0 : index
    %3 = vector.load %arg4[%c0_6, %c0_7] : memref<32x32xf32, #tpu.memory_space<vmem>>, vector<32x32xf32>
    %c0_8 = arith.constant 0 : index
    %c0_9 = arith.constant 0 : index
    %c0_10 = arith.constant 0 : index
    %4 = vector.load %arg5[%c0_8, %c0_9, %c0_10] : memref<4x32x32xf32, #tpu.memory_space<vmem>>, vector<4x32x32xf32>
    %c0_11 = arith.constant 0 : index
    %c0_12 = arith.constant 0 : index
    %5 = vector.load %arg6[%c0_11, %c0_12] : memref<8x32xf32, #tpu.memory_space<vmem>>, vector<8x32xf32>
    %6 = vector.extract_strided_slice %5 {offsets = [0, 0], sizes = [1, 32], strides = [1, 1]} : vector<8x32xf32> to vector<1x32xf32>
    %7 = vector.extract_strided_slice %5 {offsets = [1, 0], sizes = [1, 32], strides = [1, 1]} : vector<8x32xf32> to vector<1x32xf32>
    %8 = vector.extract_strided_slice %5 {offsets = [2, 0], sizes = [1, 32], strides = [1, 1]} : vector<8x32xf32> to vector<1x32xf32>
    %9 = vector.extract_strided_slice %5 {offsets = [3, 0], sizes = [1, 32], strides = [1, 1]} : vector<8x32xf32> to vector<1x32xf32>
    %10 = vector.extract_strided_slice %5 {offsets = [4, 0], sizes = [1, 32], strides = [1, 1]} : vector<8x32xf32> to vector<1x32xf32>
    %11 = vector.extract_strided_slice %5 {offsets = [5, 0], sizes = [1, 32], strides = [1, 1]} : vector<8x32xf32> to vector<1x32xf32>
    %12 = vector.extract_strided_slice %5 {offsets = [6, 0], sizes = [1, 32], strides = [1, 1]} : vector<8x32xf32> to vector<1x32xf32>
    %13 = vector.extract_strided_slice %5 {offsets = [7, 0], sizes = [1, 32], strides = [1, 1]} : vector<8x32xf32> to vector<1x32xf32>
    %14 = tpu.iota {dimensions = array<i32: 0>} : vector<31x64xi32>
    %15 = tpu.iota {dimensions = array<i32: 1>} : vector<31x64xi32>
    %c2_i32 = arith.constant 2 : i32
    %16 = vector.broadcast %c2_i32 : i32 to vector<31x64xi32>
    %17 = arith.muli %16, %14 : vector<31x64xi32>
    %c0_i32 = arith.constant 0 : i32
    %18 = vector.broadcast %c0_i32 : i32 to vector<31x64xi32>
    %19 = arith.addi %17, %18 : vector<31x64xi32>
    %20 = arith.cmpi eq, %15, %19 : vector<31x64xi32>
    %21 = arith.extui %20 : vector<31x64xi1> to vector<31x64xi32>
    %22 = arith.sitofp %21 : vector<31x64xi32> to vector<31x64xf32>
    %cst = arith.constant dense<0.000000e+00> : vector<31x2xf32>
    %23 = tpu.matmul %22, %0, %cst {dimension_numbers = #tpu.dot_dimension_numbers<[1], [0], [0], [1], [0, 0, 1, 1], [], []>} : vector<31x64xf32>, vector<64x2xf32>, vector<31x2xf32> -> vector<31x2xf32>
    %c2_i32_13 = arith.constant 2 : i32
    %24 = vector.broadcast %c2_i32_13 : i32 to vector<31x64xi32>
    %25 = arith.muli %24, %14 : vector<31x64xi32>
    %c1_i32 = arith.constant 1 : i32
    %26 = vector.broadcast %c1_i32 : i32 to vector<31x64xi32>
    %27 = arith.addi %25, %26 : vector<31x64xi32>
    %28 = arith.cmpi eq, %15, %27 : vector<31x64xi32>
    %29 = arith.extui %28 : vector<31x64xi1> to vector<31x64xi32>
    %30 = arith.sitofp %29 : vector<31x64xi32> to vector<31x64xf32>
    %cst_14 = arith.constant dense<0.000000e+00> : vector<31x2xf32>
    %31 = tpu.matmul %30, %0, %cst_14 {dimension_numbers = #tpu.dot_dimension_numbers<[1], [0], [0], [1], [0, 0, 1, 1], [], []>} : vector<31x64xf32>, vector<64x2xf32>, vector<31x2xf32> -> vector<31x2xf32>
    %c2_i32_15 = arith.constant 2 : i32
    %32 = vector.broadcast %c2_i32_15 : i32 to vector<31x64xi32>
    %33 = arith.muli %32, %14 : vector<31x64xi32>
    %c2_i32_16 = arith.constant 2 : i32
    %34 = vector.broadcast %c2_i32_16 : i32 to vector<31x64xi32>
    %35 = arith.addi %33, %34 : vector<31x64xi32>
    %36 = arith.cmpi eq, %15, %35 : vector<31x64xi32>
    %37 = arith.extui %36 : vector<31x64xi1> to vector<31x64xi32>
    %38 = arith.sitofp %37 : vector<31x64xi32> to vector<31x64xf32>
    %cst_17 = arith.constant dense<0.000000e+00> : vector<31x2xf32>
    %39 = tpu.matmul %38, %0, %cst_17 {dimension_numbers = #tpu.dot_dimension_numbers<[1], [0], [0], [1], [0, 0, 1, 1], [], []>} : vector<31x64xf32>, vector<64x2xf32>, vector<31x2xf32> -> vector<31x2xf32>
    %c2_i32_18 = arith.constant 2 : i32
    %40 = vector.broadcast %c2_i32_18 : i32 to vector<31x64xi32>
    %41 = arith.muli %40, %14 : vector<31x64xi32>
    %c3_i32 = arith.constant 3 : i32
    %42 = vector.broadcast %c3_i32 : i32 to vector<31x64xi32>
    %43 = arith.addi %41, %42 : vector<31x64xi32>
    %44 = arith.cmpi eq, %15, %43 : vector<31x64xi32>
    %45 = arith.extui %44 : vector<31x64xi1> to vector<31x64xi32>
    %46 = arith.sitofp %45 : vector<31x64xi32> to vector<31x64xf32>
    %cst_19 = arith.constant dense<0.000000e+00> : vector<31x2xf32>
    %47 = tpu.matmul %46, %0, %cst_19 {dimension_numbers = #tpu.dot_dimension_numbers<[1], [0], [0], [1], [0, 0, 1, 1], [], []>} : vector<31x64xf32>, vector<64x2xf32>, vector<31x2xf32> -> vector<31x2xf32>
    %48 = tpu.iota {dimensions = array<i32: 0>} : vector<14x31xi32>
    %49 = tpu.iota {dimensions = array<i32: 1>} : vector<14x31xi32>
    %c2_i32_20 = arith.constant 2 : i32
    %50 = vector.broadcast %c2_i32_20 : i32 to vector<14x31xi32>
    %51 = arith.muli %50, %48 : vector<14x31xi32>
    %c0_i32_21 = arith.constant 0 : i32
    %52 = vector.broadcast %c0_i32_21 : i32 to vector<14x31xi32>
    %53 = arith.addi %51, %52 : vector<14x31xi32>
    %54 = arith.cmpi eq, %49, %53 : vector<14x31xi32>
    %55 = arith.extui %54 : vector<14x31xi1> to vector<14x31xi32>
    %56 = arith.sitofp %55 : vector<14x31xi32> to vector<14x31xf32>
    %c2_i32_22 = arith.constant 2 : i32
    %57 = vector.broadcast %c2_i32_22 : i32 to vector<14x31xi32>
    %58 = arith.muli %57, %48 : vector<14x31xi32>
    %c1_i32_23 = arith.constant 1 : i32
    %59 = vector.broadcast %c1_i32_23 : i32 to vector<14x31xi32>
    %60 = arith.addi %58, %59 : vector<14x31xi32>
    %61 = arith.cmpi eq, %49, %60 : vector<14x31xi32>
    %62 = arith.extui %61 : vector<14x31xi1> to vector<14x31xi32>
    %63 = arith.sitofp %62 : vector<14x31xi32> to vector<14x31xf32>
    %c2_i32_24 = arith.constant 2 : i32
    %64 = vector.broadcast %c2_i32_24 : i32 to vector<14x31xi32>
    %65 = arith.muli %64, %48 : vector<14x31xi32>
    %c2_i32_25 = arith.constant 2 : i32
    %66 = vector.broadcast %c2_i32_25 : i32 to vector<14x31xi32>
    %67 = arith.addi %65, %66 : vector<14x31xi32>
    %68 = arith.cmpi eq, %49, %67 : vector<14x31xi32>
    %69 = arith.extui %68 : vector<14x31xi1> to vector<14x31xi32>
    %70 = arith.sitofp %69 : vector<14x31xi32> to vector<14x31xf32>
    %c2_i32_26 = arith.constant 2 : i32
    %71 = vector.broadcast %c2_i32_26 : i32 to vector<14x31xi32>
    %72 = arith.muli %71, %48 : vector<14x31xi32>
    %c3_i32_27 = arith.constant 3 : i32
    %73 = vector.broadcast %c3_i32_27 : i32 to vector<14x31xi32>
    %74 = arith.addi %72, %73 : vector<14x31xi32>
    %75 = arith.cmpi eq, %49, %74 : vector<14x31xi32>
    %76 = arith.extui %75 : vector<14x31xi1> to vector<14x31xi32>
    %77 = arith.sitofp %76 : vector<14x31xi32> to vector<14x31xf32>
    %cst_28 = arith.constant 0.000000e+00 : f32
    %78 = vector.broadcast %cst_28 : f32 to vector<2x32xf32>
    %79 = vector.extract_strided_slice %23 {offsets = [0, 0], sizes = [31, 1], strides = [1, 1]} : vector<31x2xf32> to vector<31x1xf32>
    %80 = vector.extract_strided_slice %1 {offsets = [0, 0], sizes = [1, 32], strides = [1, 1]} : vector<4x32xf32> to vector<1x32xf32>
    %81 = vector.broadcast %79 : vector<31x1xf32> to vector<31x32xf32>
    %82 = vector.broadcast %80 : vector<1x32xf32> to vector<31x32xf32>
    %83 = arith.mulf %81, %82 : vector<31x32xf32>
    %84 = vector.extract_strided_slice %31 {offsets = [0, 0], sizes = [31, 1], strides = [1, 1]} : vector<31x2xf32> to vector<31x1xf32>
    %85 = vector.extract_strided_slice %1 {offsets = [1, 0], sizes = [1, 32], strides = [1, 1]} : vector<4x32xf32> to vector<1x32xf32>
    %86 = vector.broadcast %84 : vector<31x1xf32> to vector<31x32xf32>
    %87 = vector.broadcast %85 : vector<1x32xf32> to vector<31x32xf32>
    %88 = arith.mulf %86, %87 : vector<31x32xf32>
    %89 = arith.addf %83, %88 : vector<31x32xf32>
    %90 = vector.extract_strided_slice %39 {offsets = [0, 0], sizes = [31, 1], strides = [1, 1]} : vector<31x2xf32> to vector<31x1xf32>
    %91 = vector.extract_strided_slice %1 {offsets = [2, 0], sizes = [1, 32], strides = [1, 1]} : vector<4x32xf32> to vector<1x32xf32>
    %92 = vector.broadcast %90 : vector<31x1xf32> to vector<31x32xf32>
    %93 = vector.broadcast %91 : vector<1x32xf32> to vector<31x32xf32>
    %94 = arith.mulf %92, %93 : vector<31x32xf32>
    %95 = arith.addf %89, %94 : vector<31x32xf32>
    %96 = vector.extract_strided_slice %47 {offsets = [0, 0], sizes = [31, 1], strides = [1, 1]} : vector<31x2xf32> to vector<31x1xf32>
    %97 = vector.extract_strided_slice %1 {offsets = [3, 0], sizes = [1, 32], strides = [1, 1]} : vector<4x32xf32> to vector<1x32xf32>
    %98 = vector.broadcast %96 : vector<31x1xf32> to vector<31x32xf32>
    %99 = vector.broadcast %97 : vector<1x32xf32> to vector<31x32xf32>
    %100 = arith.mulf %98, %99 : vector<31x32xf32>
    %101 = arith.addf %95, %100 : vector<31x32xf32>
    %cst_29 = arith.constant dense<0.000000e+00> : vector<32xf32>
    %102 = vector.multi_reduction <add>, %101, %cst_29 [0] : vector<31x32xf32> to vector<32xf32>
    %103 = vector.shape_cast %102 : vector<32xf32> to vector<1x32xf32>
    %cst_30 = arith.constant 3.100000e+01 : f32
    %104 = vector.broadcast %cst_30 : f32 to vector<1x32xf32>
    %105 = arith.divf %103, %104 : vector<1x32xf32>
    %106 = vector.broadcast %105 : vector<1x32xf32> to vector<31x32xf32>
    %107 = arith.subf %101, %106 : vector<31x32xf32>
    %108 = arith.mulf %107, %107 : vector<31x32xf32>
    %cst_31 = arith.constant dense<0.000000e+00> : vector<32xf32>
    %109 = vector.multi_reduction <add>, %108, %cst_31 [0] : vector<31x32xf32> to vector<32xf32>
    %110 = vector.shape_cast %109 : vector<32xf32> to vector<1x32xf32>
    %cst_32 = arith.constant 3.100000e+01 : f32
    %111 = vector.broadcast %cst_32 : f32 to vector<1x32xf32>
    %112 = arith.divf %110, %111 : vector<1x32xf32>
    %113 = vector.broadcast %105 : vector<1x32xf32> to vector<31x32xf32>
    %114 = arith.subf %101, %113 : vector<31x32xf32>
    %cst_33 = arith.constant 9.99999974E-6 : f32
    %115 = vector.broadcast %cst_33 : f32 to vector<1x32xf32>
    %116 = arith.addf %112, %115 : vector<1x32xf32>
    %117 = math.rsqrt %116 : vector<1x32xf32>
    %118 = vector.broadcast %117 : vector<1x32xf32> to vector<31x32xf32>
    %119 = arith.mulf %114, %118 : vector<31x32xf32>
    %120 = vector.broadcast %6 : vector<1x32xf32> to vector<31x32xf32>
    %121 = arith.mulf %119, %120 : vector<31x32xf32>
    %122 = vector.broadcast %7 : vector<1x32xf32> to vector<31x32xf32>
    %123 = arith.addf %121, %122 : vector<31x32xf32>
    %cst_34 = arith.constant 5.000000e-01 : f32
    %124 = vector.broadcast %cst_34 : f32 to vector<31x32xf32>
    %125 = arith.mulf %124, %123 : vector<31x32xf32>
    %cst_35 = arith.constant 4.471500e-02 : f32
    %126 = vector.broadcast %cst_35 : f32 to vector<31x32xf32>
    %127 = arith.mulf %126, %123 : vector<31x32xf32>
    %128 = arith.mulf %127, %123 : vector<31x32xf32>
    %129 = arith.mulf %128, %123 : vector<31x32xf32>
    %130 = arith.addf %123, %129 : vector<31x32xf32>
    %cst_36 = arith.constant 0.797884583 : f32
    %131 = vector.broadcast %cst_36 : f32 to vector<31x32xf32>
    %132 = arith.mulf %131, %130 : vector<31x32xf32>
    %133 = math.tanh %132 : vector<31x32xf32>
    %cst_37 = arith.constant 1.000000e+00 : f32
    %134 = vector.broadcast %cst_37 : f32 to vector<31x32xf32>
    %135 = arith.addf %134, %133 : vector<31x32xf32>
    %136 = arith.mulf %125, %135 : vector<31x32xf32>
    %cst_38 = arith.constant 0.000000e+00 : f32
    %137 = vector.broadcast %cst_38 : f32 to vector<14x32xf32>
    %cst_39 = arith.constant dense<0.000000e+00> : vector<14x32xf32>
    %138 = tpu.matmul %56, %136, %cst_39 {dimension_numbers = #tpu.dot_dimension_numbers<[1], [0], [0], [1], [0, 0, 1, 1], [], []>} : vector<14x31xf32>, vector<31x32xf32>, vector<14x32xf32> -> vector<14x32xf32>
    %139 = vector.extract_strided_slice %2 {offsets = [0, 0, 0], sizes = [1, 32, 32], strides = [1, 1, 1]} : vector<4x32x32xf32> to vector<1x32x32xf32>
    %140 = vector.shape_cast %139 : vector<1x32x32xf32> to vector<32x32xf32>
    %cst_40 = arith.constant dense<0.000000e+00> : vector<14x32xf32>
    %141 = tpu.matmul %138, %140, %cst_40 {dimension_numbers = #tpu.dot_dimension_numbers<[1], [0], [0], [1], [0, 0, 1, 1], [], []>} : vector<14x32xf32>, vector<32x32xf32>, vector<14x32xf32> -> vector<14x32xf32>
    %142 = arith.addf %137, %141 : vector<14x32xf32>
    %cst_41 = arith.constant dense<0.000000e+00> : vector<14x32xf32>
    %143 = tpu.matmul %63, %136, %cst_41 {dimension_numbers = #tpu.dot_dimension_numbers<[1], [0], [0], [1], [0, 0, 1, 1], [], []>} : vector<14x31xf32>, vector<31x32xf32>, vector<14x32xf32> -> vector<14x32xf32>
    %144 = vector.extract_strided_slice %2 {offsets = [1, 0, 0], sizes = [1, 32, 32], strides = [1, 1, 1]} : vector<4x32x32xf32> to vector<1x32x32xf32>
    %145 = vector.shape_cast %144 : vector<1x32x32xf32> to vector<32x32xf32>
    %cst_42 = arith.constant dense<0.000000e+00> : vector<14x32xf32>
    %146 = tpu.matmul %143, %145, %cst_42 {dimension_numbers = #tpu.dot_dimension_numbers<[1], [0], [0], [1], [0, 0, 1, 1], [], []>} : vector<14x32xf32>, vector<32x32xf32>, vector<14x32xf32> -> vector<14x32xf32>
    %147 = arith.addf %142, %146 : vector<14x32xf32>
    %cst_43 = arith.constant dense<0.000000e+00> : vector<14x32xf32>
    %148 = tpu.matmul %70, %136, %cst_43 {dimension_numbers = #tpu.dot_dimension_numbers<[1], [0], [0], [1], [0, 0, 1, 1], [], []>} : vector<14x31xf32>, vector<31x32xf32>, vector<14x32xf32> -> vector<14x32xf32>
    %149 = vector.extract_strided_slice %2 {offsets = [2, 0, 0], sizes = [1, 32, 32], strides = [1, 1, 1]} : vector<4x32x32xf32> to vector<1x32x32xf32>
    %150 = vector.shape_cast %149 : vector<1x32x32xf32> to vector<32x32xf32>
    %cst_44 = arith.constant dense<0.000000e+00> : vector<14x32xf32>
    %151 = tpu.matmul %148, %150, %cst_44 {dimension_numbers = #tpu.dot_dimension_numbers<[1], [0], [0], [1], [0, 0, 1, 1], [], []>} : vector<14x32xf32>, vector<32x32xf32>, vector<14x32xf32> -> vector<14x32xf32>
    %152 = arith.addf %147, %151 : vector<14x32xf32>
    %cst_45 = arith.constant dense<0.000000e+00> : vector<14x32xf32>
    %153 = tpu.matmul %77, %136, %cst_45 {dimension_numbers = #tpu.dot_dimension_numbers<[1], [0], [0], [1], [0, 0, 1, 1], [], []>} : vector<14x31xf32>, vector<31x32xf32>, vector<14x32xf32> -> vector<14x32xf32>
    %154 = vector.extract_strided_slice %2 {offsets = [3, 0, 0], sizes = [1, 32, 32], strides = [1, 1, 1]} : vector<4x32x32xf32> to vector<1x32x32xf32>
    %155 = vector.shape_cast %154 : vector<1x32x32xf32> to vector<32x32xf32>
    %cst_46 = arith.constant dense<0.000000e+00> : vector<14x32xf32>
    %156 = tpu.matmul %153, %155, %cst_46 {dimension_numbers = #tpu.dot_dimension_numbers<[1], [0], [0], [1], [0, 0, 1, 1], [], []>} : vector<14x32xf32>, vector<32x32xf32>, vector<14x32xf32> -> vector<14x32xf32>
    %157 = arith.addf %152, %156 : vector<14x32xf32>
    %cst_47 = arith.constant 5.000000e-01 : f32
    %158 = vector.broadcast %cst_47 : f32 to vector<14x32xf32>
    %159 = arith.mulf %158, %157 : vector<14x32xf32>
    %cst_48 = arith.constant 4.471500e-02 : f32
    %160 = vector.broadcast %cst_48 : f32 to vector<14x32xf32>
    %161 = arith.mulf %160, %157 : vector<14x32xf32>
    %162 = arith.mulf %161, %157 : vector<14x32xf32>
    %163 = arith.mulf %162, %157 : vector<14x32xf32>
    %164 = arith.addf %157, %163 : vector<14x32xf32>
    %cst_49 = arith.constant 0.797884583 : f32
    %165 = vector.broadcast %cst_49 : f32 to vector<14x32xf32>
    %166 = arith.mulf %165, %164 : vector<14x32xf32>
    %167 = math.tanh %166 : vector<14x32xf32>
    %cst_50 = arith.constant 1.000000e+00 : f32
    %168 = vector.broadcast %cst_50 : f32 to vector<14x32xf32>
    %169 = arith.addf %168, %167 : vector<14x32xf32>
    %170 = arith.mulf %159, %169 : vector<14x32xf32>
    %cst_51 = arith.constant dense<0.000000e+00> : vector<14xf32>
    %171 = vector.multi_reduction <add>, %170, %cst_51 [1] : vector<14x32xf32> to vector<14xf32>
    %172 = vector.shape_cast %171 : vector<14xf32> to vector<14x1xf32>
    %cst_52 = arith.constant 3.200000e+01 : f32
    %173 = vector.broadcast %cst_52 : f32 to vector<14x1xf32>
    %174 = arith.divf %172, %173 : vector<14x1xf32>
    %175 = vector.broadcast %174 : vector<14x1xf32> to vector<14x32xf32>
    %176 = arith.subf %170, %175 : vector<14x32xf32>
    %177 = arith.mulf %176, %176 : vector<14x32xf32>
    %cst_53 = arith.constant dense<0.000000e+00> : vector<14xf32>
    %178 = vector.multi_reduction <add>, %177, %cst_53 [1] : vector<14x32xf32> to vector<14xf32>
    %179 = vector.shape_cast %178 : vector<14xf32> to vector<14x1xf32>
    %cst_54 = arith.constant 3.200000e+01 : f32
    %180 = vector.broadcast %cst_54 : f32 to vector<14x1xf32>
    %181 = arith.divf %179, %180 : vector<14x1xf32>
    %182 = vector.broadcast %174 : vector<14x1xf32> to vector<14x32xf32>
    %183 = arith.subf %170, %182 : vector<14x32xf32>
    %cst_55 = arith.constant 9.99999974E-6 : f32
    %184 = vector.broadcast %cst_55 : f32 to vector<14x1xf32>
    %185 = arith.addf %181, %184 : vector<14x1xf32>
    %186 = math.rsqrt %185 : vector<14x1xf32>
    %187 = vector.broadcast %186 : vector<14x1xf32> to vector<14x32xf32>
    %188 = arith.mulf %183, %187 : vector<14x32xf32>
    %189 = vector.broadcast %8 : vector<1x32xf32> to vector<14x32xf32>
    %190 = arith.mulf %188, %189 : vector<14x32xf32>
    %191 = vector.broadcast %9 : vector<1x32xf32> to vector<14x32xf32>
    %192 = arith.addf %190, %191 : vector<14x32xf32>
    %cst_56 = arith.constant dense<0.000000e+00> : vector<14x32xf32>
    %193 = tpu.matmul %192, %3, %cst_56 {dimension_numbers = #tpu.dot_dimension_numbers<[1], [0], [0], [1], [0, 0, 1, 1], [], []>} : vector<14x32xf32>, vector<32x32xf32>, vector<14x32xf32> -> vector<14x32xf32>
    %194 = vector.broadcast %10 : vector<1x32xf32> to vector<14x32xf32>
    %195 = arith.addf %193, %194 : vector<14x32xf32>
    %196 = tpu.concatenate %78, %195, %78 in 0 : vector<2x32xf32>, vector<14x32xf32>, vector<2x32xf32> -> vector<18x32xf32>
    %cst_57 = arith.constant 0.000000e+00 : f32
    %197 = vector.broadcast %cst_57 : f32 to vector<14x32xf32>
    %198 = vector.broadcast %11 : vector<1x32xf32> to vector<14x32xf32>
    %199 = arith.addf %197, %198 : vector<14x32xf32>
    %200 = vector.extract_strided_slice %196 {offsets = [0, 0], sizes = [14, 32], strides = [1, 1]} : vector<18x32xf32> to vector<14x32xf32>
    %201 = vector.extract_strided_slice %4 {offsets = [0, 0, 0], sizes = [1, 32, 32], strides = [1, 1, 1]} : vector<4x32x32xf32> to vector<1x32x32xf32>
    %202 = vector.shape_cast %201 : vector<1x32x32xf32> to vector<32x32xf32>
    %cst_58 = arith.constant dense<0.000000e+00> : vector<14x32xf32>
    %203 = tpu.matmul %200, %202, %cst_58 {dimension_numbers = #tpu.dot_dimension_numbers<[1], [0], [0], [1], [0, 0, 1, 1], [], []>} : vector<14x32xf32>, vector<32x32xf32>, vector<14x32xf32> -> vector<14x32xf32>
    %204 = arith.addf %199, %203 : vector<14x32xf32>
    %205 = vector.extract_strided_slice %196 {offsets = [1, 0], sizes = [14, 32], strides = [1, 1]} : vector<18x32xf32> to vector<14x32xf32>
    %206 = vector.extract_strided_slice %4 {offsets = [1, 0, 0], sizes = [1, 32, 32], strides = [1, 1, 1]} : vector<4x32x32xf32> to vector<1x32x32xf32>
    %207 = vector.shape_cast %206 : vector<1x32x32xf32> to vector<32x32xf32>
    %cst_59 = arith.constant dense<0.000000e+00> : vector<14x32xf32>
    %208 = tpu.matmul %205, %207, %cst_59 {dimension_numbers = #tpu.dot_dimension_numbers<[1], [0], [0], [1], [0, 0, 1, 1], [], []>} : vector<14x32xf32>, vector<32x32xf32>, vector<14x32xf32> -> vector<14x32xf32>
    %209 = arith.addf %204, %208 : vector<14x32xf32>
    %210 = vector.extract_strided_slice %196 {offsets = [2, 0], sizes = [14, 32], strides = [1, 1]} : vector<18x32xf32> to vector<14x32xf32>
    %211 = vector.extract_strided_slice %4 {offsets = [2, 0, 0], sizes = [1, 32, 32], strides = [1, 1, 1]} : vector<4x32x32xf32> to vector<1x32x32xf32>
    %212 = vector.shape_cast %211 : vector<1x32x32xf32> to vector<32x32xf32>
    %cst_60 = arith.constant dense<0.000000e+00> : vector<14x32xf32>
    %213 = tpu.matmul %210, %212, %cst_60 {dimension_numbers = #tpu.dot_dimension_numbers<[1], [0], [0], [1], [0, 0, 1, 1], [], []>} : vector<14x32xf32>, vector<32x32xf32>, vector<14x32xf32> -> vector<14x32xf32>
    %214 = arith.addf %209, %213 : vector<14x32xf32>
    %215 = vector.extract_strided_slice %196 {offsets = [3, 0], sizes = [14, 32], strides = [1, 1]} : vector<18x32xf32> to vector<14x32xf32>
    %216 = vector.extract_strided_slice %4 {offsets = [3, 0, 0], sizes = [1, 32, 32], strides = [1, 1, 1]} : vector<4x32x32xf32> to vector<1x32x32xf32>
    %217 = vector.shape_cast %216 : vector<1x32x32xf32> to vector<32x32xf32>
    %cst_61 = arith.constant dense<0.000000e+00> : vector<14x32xf32>
    %218 = tpu.matmul %215, %217, %cst_61 {dimension_numbers = #tpu.dot_dimension_numbers<[1], [0], [0], [1], [0, 0, 1, 1], [], []>} : vector<14x32xf32>, vector<32x32xf32>, vector<14x32xf32> -> vector<14x32xf32>
    %219 = arith.addf %214, %218 : vector<14x32xf32>
    %cst_62 = arith.constant 5.000000e-01 : f32
    %220 = vector.broadcast %cst_62 : f32 to vector<14x32xf32>
    %221 = arith.mulf %220, %219 : vector<14x32xf32>
    %cst_63 = arith.constant 4.471500e-02 : f32
    %222 = vector.broadcast %cst_63 : f32 to vector<14x32xf32>
    %223 = arith.mulf %222, %219 : vector<14x32xf32>
    %224 = arith.mulf %223, %219 : vector<14x32xf32>
    %225 = arith.mulf %224, %219 : vector<14x32xf32>
    %226 = arith.addf %219, %225 : vector<14x32xf32>
    %cst_64 = arith.constant 0.797884583 : f32
    %227 = vector.broadcast %cst_64 : f32 to vector<14x32xf32>
    %228 = arith.mulf %227, %226 : vector<14x32xf32>
    %229 = math.tanh %228 : vector<14x32xf32>
    %cst_65 = arith.constant 1.000000e+00 : f32
    %230 = vector.broadcast %cst_65 : f32 to vector<14x32xf32>
    %231 = arith.addf %230, %229 : vector<14x32xf32>
    %232 = arith.mulf %221, %231 : vector<14x32xf32>
    %233 = arith.addf %195, %232 : vector<14x32xf32>
    %cst_66 = arith.constant dense<0.000000e+00> : vector<14xf32>
    %234 = vector.multi_reduction <add>, %233, %cst_66 [1] : vector<14x32xf32> to vector<14xf32>
    %235 = vector.shape_cast %234 : vector<14xf32> to vector<14x1xf32>
    %cst_67 = arith.constant 3.200000e+01 : f32
    %236 = vector.broadcast %cst_67 : f32 to vector<14x1xf32>
    %237 = arith.divf %235, %236 : vector<14x1xf32>
    %238 = vector.broadcast %237 : vector<14x1xf32> to vector<14x32xf32>
    %239 = arith.subf %233, %238 : vector<14x32xf32>
    %240 = arith.mulf %239, %239 : vector<14x32xf32>
    %cst_68 = arith.constant dense<0.000000e+00> : vector<14xf32>
    %241 = vector.multi_reduction <add>, %240, %cst_68 [1] : vector<14x32xf32> to vector<14xf32>
    %242 = vector.shape_cast %241 : vector<14xf32> to vector<14x1xf32>
    %cst_69 = arith.constant 3.200000e+01 : f32
    %243 = vector.broadcast %cst_69 : f32 to vector<14x1xf32>
    %244 = arith.divf %242, %243 : vector<14x1xf32>
    %245 = vector.broadcast %237 : vector<14x1xf32> to vector<14x32xf32>
    %246 = arith.subf %233, %245 : vector<14x32xf32>
    %cst_70 = arith.constant 9.99999974E-6 : f32
    %247 = vector.broadcast %cst_70 : f32 to vector<14x1xf32>
    %248 = arith.addf %244, %247 : vector<14x1xf32>
    %249 = math.rsqrt %248 : vector<14x1xf32>
    %250 = vector.broadcast %249 : vector<14x1xf32> to vector<14x32xf32>
    %251 = arith.mulf %246, %250 : vector<14x32xf32>
    %252 = vector.broadcast %12 : vector<1x32xf32> to vector<14x32xf32>
    %253 = arith.mulf %251, %252 : vector<14x32xf32>
    %254 = vector.broadcast %13 : vector<1x32xf32> to vector<14x32xf32>
    %255 = arith.addf %253, %254 : vector<14x32xf32>
    %256 = vector.extract_strided_slice %23 {offsets = [0, 1], sizes = [31, 1], strides = [1, 1]} : vector<31x2xf32> to vector<31x1xf32>
    %257 = vector.extract_strided_slice %1 {offsets = [0, 0], sizes = [1, 32], strides = [1, 1]} : vector<4x32xf32> to vector<1x32xf32>
    %258 = vector.broadcast %256 : vector<31x1xf32> to vector<31x32xf32>
    %259 = vector.broadcast %257 : vector<1x32xf32> to vector<31x32xf32>
    %260 = arith.mulf %258, %259 : vector<31x32xf32>
    %261 = vector.extract_strided_slice %31 {offsets = [0, 1], sizes = [31, 1], strides = [1, 1]} : vector<31x2xf32> to vector<31x1xf32>
    %262 = vector.extract_strided_slice %1 {offsets = [1, 0], sizes = [1, 32], strides = [1, 1]} : vector<4x32xf32> to vector<1x32xf32>
    %263 = vector.broadcast %261 : vector<31x1xf32> to vector<31x32xf32>
    %264 = vector.broadcast %262 : vector<1x32xf32> to vector<31x32xf32>
    %265 = arith.mulf %263, %264 : vector<31x32xf32>
    %266 = arith.addf %260, %265 : vector<31x32xf32>
    %267 = vector.extract_strided_slice %39 {offsets = [0, 1], sizes = [31, 1], strides = [1, 1]} : vector<31x2xf32> to vector<31x1xf32>
    %268 = vector.extract_strided_slice %1 {offsets = [2, 0], sizes = [1, 32], strides = [1, 1]} : vector<4x32xf32> to vector<1x32xf32>
    %269 = vector.broadcast %267 : vector<31x1xf32> to vector<31x32xf32>
    %270 = vector.broadcast %268 : vector<1x32xf32> to vector<31x32xf32>
    %271 = arith.mulf %269, %270 : vector<31x32xf32>
    %272 = arith.addf %266, %271 : vector<31x32xf32>
    %273 = vector.extract_strided_slice %47 {offsets = [0, 1], sizes = [31, 1], strides = [1, 1]} : vector<31x2xf32> to vector<31x1xf32>
    %274 = vector.extract_strided_slice %1 {offsets = [3, 0], sizes = [1, 32], strides = [1, 1]} : vector<4x32xf32> to vector<1x32xf32>
    %275 = vector.broadcast %273 : vector<31x1xf32> to vector<31x32xf32>
    %276 = vector.broadcast %274 : vector<1x32xf32> to vector<31x32xf32>
    %277 = arith.mulf %275, %276 : vector<31x32xf32>
    %278 = arith.addf %272, %277 : vector<31x32xf32>
    %cst_71 = arith.constant dense<0.000000e+00> : vector<32xf32>
    %279 = vector.multi_reduction <add>, %278, %cst_71 [0] : vector<31x32xf32> to vector<32xf32>
    %280 = vector.shape_cast %279 : vector<32xf32> to vector<1x32xf32>
    %cst_72 = arith.constant 3.100000e+01 : f32
    %281 = vector.broadcast %cst_72 : f32 to vector<1x32xf32>
    %282 = arith.divf %280, %281 : vector<1x32xf32>
    %283 = vector.broadcast %282 : vector<1x32xf32> to vector<31x32xf32>
    %284 = arith.subf %278, %283 : vector<31x32xf32>
    %285 = arith.mulf %284, %284 : vector<31x32xf32>
    %cst_73 = arith.constant dense<0.000000e+00> : vector<32xf32>
    %286 = vector.multi_reduction <add>, %285, %cst_73 [0] : vector<31x32xf32> to vector<32xf32>
    %287 = vector.shape_cast %286 : vector<32xf32> to vector<1x32xf32>
    %cst_74 = arith.constant 3.100000e+01 : f32
    %288 = vector.broadcast %cst_74 : f32 to vector<1x32xf32>
    %289 = arith.divf %287, %288 : vector<1x32xf32>
    %290 = vector.broadcast %282 : vector<1x32xf32> to vector<31x32xf32>
    %291 = arith.subf %278, %290 : vector<31x32xf32>
    %cst_75 = arith.constant 9.99999974E-6 : f32
    %292 = vector.broadcast %cst_75 : f32 to vector<1x32xf32>
    %293 = arith.addf %289, %292 : vector<1x32xf32>
    %294 = math.rsqrt %293 : vector<1x32xf32>
    %295 = vector.broadcast %294 : vector<1x32xf32> to vector<31x32xf32>
    %296 = arith.mulf %291, %295 : vector<31x32xf32>
    %297 = vector.broadcast %6 : vector<1x32xf32> to vector<31x32xf32>
    %298 = arith.mulf %296, %297 : vector<31x32xf32>
    %299 = vector.broadcast %7 : vector<1x32xf32> to vector<31x32xf32>
    %300 = arith.addf %298, %299 : vector<31x32xf32>
    %cst_76 = arith.constant 5.000000e-01 : f32
    %301 = vector.broadcast %cst_76 : f32 to vector<31x32xf32>
    %302 = arith.mulf %301, %300 : vector<31x32xf32>
    %cst_77 = arith.constant 4.471500e-02 : f32
    %303 = vector.broadcast %cst_77 : f32 to vector<31x32xf32>
    %304 = arith.mulf %303, %300 : vector<31x32xf32>
    %305 = arith.mulf %304, %300 : vector<31x32xf32>
    %306 = arith.mulf %305, %300 : vector<31x32xf32>
    %307 = arith.addf %300, %306 : vector<31x32xf32>
    %cst_78 = arith.constant 0.797884583 : f32
    %308 = vector.broadcast %cst_78 : f32 to vector<31x32xf32>
    %309 = arith.mulf %308, %307 : vector<31x32xf32>
    %310 = math.tanh %309 : vector<31x32xf32>
    %cst_79 = arith.constant 1.000000e+00 : f32
    %311 = vector.broadcast %cst_79 : f32 to vector<31x32xf32>
    %312 = arith.addf %311, %310 : vector<31x32xf32>
    %313 = arith.mulf %302, %312 : vector<31x32xf32>
    %cst_80 = arith.constant 0.000000e+00 : f32
    %314 = vector.broadcast %cst_80 : f32 to vector<14x32xf32>
    %cst_81 = arith.constant dense<0.000000e+00> : vector<14x32xf32>
    %315 = tpu.matmul %56, %313, %cst_81 {dimension_numbers = #tpu.dot_dimension_numbers<[1], [0], [0], [1], [0, 0, 1, 1], [], []>} : vector<14x31xf32>, vector<31x32xf32>, vector<14x32xf32> -> vector<14x32xf32>
    %316 = vector.extract_strided_slice %2 {offsets = [0, 0, 0], sizes = [1, 32, 32], strides = [1, 1, 1]} : vector<4x32x32xf32> to vector<1x32x32xf32>
    %317 = vector.shape_cast %316 : vector<1x32x32xf32> to vector<32x32xf32>
    %cst_82 = arith.constant dense<0.000000e+00> : vector<14x32xf32>
    %318 = tpu.matmul %315, %317, %cst_82 {dimension_numbers = #tpu.dot_dimension_numbers<[1], [0], [0], [1], [0, 0, 1, 1], [], []>} : vector<14x32xf32>, vector<32x32xf32>, vector<14x32xf32> -> vector<14x32xf32>
    %319 = arith.addf %314, %318 : vector<14x32xf32>
    %cst_83 = arith.constant dense<0.000000e+00> : vector<14x32xf32>
    %320 = tpu.matmul %63, %313, %cst_83 {dimension_numbers = #tpu.dot_dimension_numbers<[1], [0], [0], [1], [0, 0, 1, 1], [], []>} : vector<14x31xf32>, vector<31x32xf32>, vector<14x32xf32> -> vector<14x32xf32>
    %321 = vector.extract_strided_slice %2 {offsets = [1, 0, 0], sizes = [1, 32, 32], strides = [1, 1, 1]} : vector<4x32x32xf32> to vector<1x32x32xf32>
    %322 = vector.shape_cast %321 : vector<1x32x32xf32> to vector<32x32xf32>
    %cst_84 = arith.constant dense<0.000000e+00> : vector<14x32xf32>
    %323 = tpu.matmul %320, %322, %cst_84 {dimension_numbers = #tpu.dot_dimension_numbers<[1], [0], [0], [1], [0, 0, 1, 1], [], []>} : vector<14x32xf32>, vector<32x32xf32>, vector<14x32xf32> -> vector<14x32xf32>
    %324 = arith.addf %319, %323 : vector<14x32xf32>
    %cst_85 = arith.constant dense<0.000000e+00> : vector<14x32xf32>
    %325 = tpu.matmul %70, %313, %cst_85 {dimension_numbers = #tpu.dot_dimension_numbers<[1], [0], [0], [1], [0, 0, 1, 1], [], []>} : vector<14x31xf32>, vector<31x32xf32>, vector<14x32xf32> -> vector<14x32xf32>
    %326 = vector.extract_strided_slice %2 {offsets = [2, 0, 0], sizes = [1, 32, 32], strides = [1, 1, 1]} : vector<4x32x32xf32> to vector<1x32x32xf32>
    %327 = vector.shape_cast %326 : vector<1x32x32xf32> to vector<32x32xf32>
    %cst_86 = arith.constant dense<0.000000e+00> : vector<14x32xf32>
    %328 = tpu.matmul %325, %327, %cst_86 {dimension_numbers = #tpu.dot_dimension_numbers<[1], [0], [0], [1], [0, 0, 1, 1], [], []>} : vector<14x32xf32>, vector<32x32xf32>, vector<14x32xf32> -> vector<14x32xf32>
    %329 = arith.addf %324, %328 : vector<14x32xf32>
    %cst_87 = arith.constant dense<0.000000e+00> : vector<14x32xf32>
    %330 = tpu.matmul %77, %313, %cst_87 {dimension_numbers = #tpu.dot_dimension_numbers<[1], [0], [0], [1], [0, 0, 1, 1], [], []>} : vector<14x31xf32>, vector<31x32xf32>, vector<14x32xf32> -> vector<14x32xf32>
    %331 = vector.extract_strided_slice %2 {offsets = [3, 0, 0], sizes = [1, 32, 32], strides = [1, 1, 1]} : vector<4x32x32xf32> to vector<1x32x32xf32>
    %332 = vector.shape_cast %331 : vector<1x32x32xf32> to vector<32x32xf32>
    %cst_88 = arith.constant dense<0.000000e+00> : vector<14x32xf32>
    %333 = tpu.matmul %330, %332, %cst_88 {dimension_numbers = #tpu.dot_dimension_numbers<[1], [0], [0], [1], [0, 0, 1, 1], [], []>} : vector<14x32xf32>, vector<32x32xf32>, vector<14x32xf32> -> vector<14x32xf32>
    %334 = arith.addf %329, %333 : vector<14x32xf32>
    %cst_89 = arith.constant 5.000000e-01 : f32
    %335 = vector.broadcast %cst_89 : f32 to vector<14x32xf32>
    %336 = arith.mulf %335, %334 : vector<14x32xf32>
    %cst_90 = arith.constant 4.471500e-02 : f32
    %337 = vector.broadcast %cst_90 : f32 to vector<14x32xf32>
    %338 = arith.mulf %337, %334 : vector<14x32xf32>
    %339 = arith.mulf %338, %334 : vector<14x32xf32>
    %340 = arith.mulf %339, %334 : vector<14x32xf32>
    %341 = arith.addf %334, %340 : vector<14x32xf32>
    %cst_91 = arith.constant 0.797884583 : f32
    %342 = vector.broadcast %cst_91 : f32 to vector<14x32xf32>
    %343 = arith.mulf %342, %341 : vector<14x32xf32>
    %344 = math.tanh %343 : vector<14x32xf32>
    %cst_92 = arith.constant 1.000000e+00 : f32
    %345 = vector.broadcast %cst_92 : f32 to vector<14x32xf32>
    %346 = arith.addf %345, %344 : vector<14x32xf32>
    %347 = arith.mulf %336, %346 : vector<14x32xf32>
    %cst_93 = arith.constant dense<0.000000e+00> : vector<14xf32>
    %348 = vector.multi_reduction <add>, %347, %cst_93 [1] : vector<14x32xf32> to vector<14xf32>
    %349 = vector.shape_cast %348 : vector<14xf32> to vector<14x1xf32>
    %cst_94 = arith.constant 3.200000e+01 : f32
    %350 = vector.broadcast %cst_94 : f32 to vector<14x1xf32>
    %351 = arith.divf %349, %350 : vector<14x1xf32>
    %352 = vector.broadcast %351 : vector<14x1xf32> to vector<14x32xf32>
    %353 = arith.subf %347, %352 : vector<14x32xf32>
    %354 = arith.mulf %353, %353 : vector<14x32xf32>
    %cst_95 = arith.constant dense<0.000000e+00> : vector<14xf32>
    %355 = vector.multi_reduction <add>, %354, %cst_95 [1] : vector<14x32xf32> to vector<14xf32>
    %356 = vector.shape_cast %355 : vector<14xf32> to vector<14x1xf32>
    %cst_96 = arith.constant 3.200000e+01 : f32
    %357 = vector.broadcast %cst_96 : f32 to vector<14x1xf32>
    %358 = arith.divf %356, %357 : vector<14x1xf32>
    %359 = vector.broadcast %351 : vector<14x1xf32> to vector<14x32xf32>
    %360 = arith.subf %347, %359 : vector<14x32xf32>
    %cst_97 = arith.constant 9.99999974E-6 : f32
    %361 = vector.broadcast %cst_97 : f32 to vector<14x1xf32>
    %362 = arith.addf %358, %361 : vector<14x1xf32>
    %363 = math.rsqrt %362 : vector<14x1xf32>
    %364 = vector.broadcast %363 : vector<14x1xf32> to vector<14x32xf32>
    %365 = arith.mulf %360, %364 : vector<14x32xf32>
    %366 = vector.broadcast %8 : vector<1x32xf32> to vector<14x32xf32>
    %367 = arith.mulf %365, %366 : vector<14x32xf32>
    %368 = vector.broadcast %9 : vector<1x32xf32> to vector<14x32xf32>
    %369 = arith.addf %367, %368 : vector<14x32xf32>
    %cst_98 = arith.constant dense<0.000000e+00> : vector<14x32xf32>
    %370 = tpu.matmul %369, %3, %cst_98 {dimension_numbers = #tpu.dot_dimension_numbers<[1], [0], [0], [1], [0, 0, 1, 1], [], []>} : vector<14x32xf32>, vector<32x32xf32>, vector<14x32xf32> -> vector<14x32xf32>
    %371 = vector.broadcast %10 : vector<1x32xf32> to vector<14x32xf32>
    %372 = arith.addf %370, %371 : vector<14x32xf32>
    %373 = tpu.concatenate %78, %372, %78 in 0 : vector<2x32xf32>, vector<14x32xf32>, vector<2x32xf32> -> vector<18x32xf32>
    %cst_99 = arith.constant 0.000000e+00 : f32
    %374 = vector.broadcast %cst_99 : f32 to vector<14x32xf32>
    %375 = vector.broadcast %11 : vector<1x32xf32> to vector<14x32xf32>
    %376 = arith.addf %374, %375 : vector<14x32xf32>
    %377 = vector.extract_strided_slice %373 {offsets = [0, 0], sizes = [14, 32], strides = [1, 1]} : vector<18x32xf32> to vector<14x32xf32>
    %378 = vector.extract_strided_slice %4 {offsets = [0, 0, 0], sizes = [1, 32, 32], strides = [1, 1, 1]} : vector<4x32x32xf32> to vector<1x32x32xf32>
    %379 = vector.shape_cast %378 : vector<1x32x32xf32> to vector<32x32xf32>
    %cst_100 = arith.constant dense<0.000000e+00> : vector<14x32xf32>
    %380 = tpu.matmul %377, %379, %cst_100 {dimension_numbers = #tpu.dot_dimension_numbers<[1], [0], [0], [1], [0, 0, 1, 1], [], []>} : vector<14x32xf32>, vector<32x32xf32>, vector<14x32xf32> -> vector<14x32xf32>
    %381 = arith.addf %376, %380 : vector<14x32xf32>
    %382 = vector.extract_strided_slice %373 {offsets = [1, 0], sizes = [14, 32], strides = [1, 1]} : vector<18x32xf32> to vector<14x32xf32>
    %383 = vector.extract_strided_slice %4 {offsets = [1, 0, 0], sizes = [1, 32, 32], strides = [1, 1, 1]} : vector<4x32x32xf32> to vector<1x32x32xf32>
    %384 = vector.shape_cast %383 : vector<1x32x32xf32> to vector<32x32xf32>
    %cst_101 = arith.constant dense<0.000000e+00> : vector<14x32xf32>
    %385 = tpu.matmul %382, %384, %cst_101 {dimension_numbers = #tpu.dot_dimension_numbers<[1], [0], [0], [1], [0, 0, 1, 1], [], []>} : vector<14x32xf32>, vector<32x32xf32>, vector<14x32xf32> -> vector<14x32xf32>
    %386 = arith.addf %381, %385 : vector<14x32xf32>
    %387 = vector.extract_strided_slice %373 {offsets = [2, 0], sizes = [14, 32], strides = [1, 1]} : vector<18x32xf32> to vector<14x32xf32>
    %388 = vector.extract_strided_slice %4 {offsets = [2, 0, 0], sizes = [1, 32, 32], strides = [1, 1, 1]} : vector<4x32x32xf32> to vector<1x32x32xf32>
    %389 = vector.shape_cast %388 : vector<1x32x32xf32> to vector<32x32xf32>
    %cst_102 = arith.constant dense<0.000000e+00> : vector<14x32xf32>
    %390 = tpu.matmul %387, %389, %cst_102 {dimension_numbers = #tpu.dot_dimension_numbers<[1], [0], [0], [1], [0, 0, 1, 1], [], []>} : vector<14x32xf32>, vector<32x32xf32>, vector<14x32xf32> -> vector<14x32xf32>
    %391 = arith.addf %386, %390 : vector<14x32xf32>
    %392 = vector.extract_strided_slice %373 {offsets = [3, 0], sizes = [14, 32], strides = [1, 1]} : vector<18x32xf32> to vector<14x32xf32>
    %393 = vector.extract_strided_slice %4 {offsets = [3, 0, 0], sizes = [1, 32, 32], strides = [1, 1, 1]} : vector<4x32x32xf32> to vector<1x32x32xf32>
    %394 = vector.shape_cast %393 : vector<1x32x32xf32> to vector<32x32xf32>
    %cst_103 = arith.constant dense<0.000000e+00> : vector<14x32xf32>
    %395 = tpu.matmul %392, %394, %cst_103 {dimension_numbers = #tpu.dot_dimension_numbers<[1], [0], [0], [1], [0, 0, 1, 1], [], []>} : vector<14x32xf32>, vector<32x32xf32>, vector<14x32xf32> -> vector<14x32xf32>
    %396 = arith.addf %391, %395 : vector<14x32xf32>
    %cst_104 = arith.constant 5.000000e-01 : f32
    %397 = vector.broadcast %cst_104 : f32 to vector<14x32xf32>
    %398 = arith.mulf %397, %396 : vector<14x32xf32>
    %cst_105 = arith.constant 4.471500e-02 : f32
    %399 = vector.broadcast %cst_105 : f32 to vector<14x32xf32>
    %400 = arith.mulf %399, %396 : vector<14x32xf32>
    %401 = arith.mulf %400, %396 : vector<14x32xf32>
    %402 = arith.mulf %401, %396 : vector<14x32xf32>
    %403 = arith.addf %396, %402 : vector<14x32xf32>
    %cst_106 = arith.constant 0.797884583 : f32
    %404 = vector.broadcast %cst_106 : f32 to vector<14x32xf32>
    %405 = arith.mulf %404, %403 : vector<14x32xf32>
    %406 = math.tanh %405 : vector<14x32xf32>
    %cst_107 = arith.constant 1.000000e+00 : f32
    %407 = vector.broadcast %cst_107 : f32 to vector<14x32xf32>
    %408 = arith.addf %407, %406 : vector<14x32xf32>
    %409 = arith.mulf %398, %408 : vector<14x32xf32>
    %410 = arith.addf %372, %409 : vector<14x32xf32>
    %cst_108 = arith.constant dense<0.000000e+00> : vector<14xf32>
    %411 = vector.multi_reduction <add>, %410, %cst_108 [1] : vector<14x32xf32> to vector<14xf32>
    %412 = vector.shape_cast %411 : vector<14xf32> to vector<14x1xf32>
    %cst_109 = arith.constant 3.200000e+01 : f32
    %413 = vector.broadcast %cst_109 : f32 to vector<14x1xf32>
    %414 = arith.divf %412, %413 : vector<14x1xf32>
    %415 = vector.broadcast %414 : vector<14x1xf32> to vector<14x32xf32>
    %416 = arith.subf %410, %415 : vector<14x32xf32>
    %417 = arith.mulf %416, %416 : vector<14x32xf32>
    %cst_110 = arith.constant dense<0.000000e+00> : vector<14xf32>
    %418 = vector.multi_reduction <add>, %417, %cst_110 [1] : vector<14x32xf32> to vector<14xf32>
    %419 = vector.shape_cast %418 : vector<14xf32> to vector<14x1xf32>
    %cst_111 = arith.constant 3.200000e+01 : f32
    %420 = vector.broadcast %cst_111 : f32 to vector<14x1xf32>
    %421 = arith.divf %419, %420 : vector<14x1xf32>
    %422 = vector.broadcast %414 : vector<14x1xf32> to vector<14x32xf32>
    %423 = arith.subf %410, %422 : vector<14x32xf32>
    %cst_112 = arith.constant 9.99999974E-6 : f32
    %424 = vector.broadcast %cst_112 : f32 to vector<14x1xf32>
    %425 = arith.addf %421, %424 : vector<14x1xf32>
    %426 = math.rsqrt %425 : vector<14x1xf32>
    %427 = vector.broadcast %426 : vector<14x1xf32> to vector<14x32xf32>
    %428 = arith.mulf %423, %427 : vector<14x32xf32>
    %429 = vector.broadcast %12 : vector<1x32xf32> to vector<14x32xf32>
    %430 = arith.mulf %428, %429 : vector<14x32xf32>
    %431 = vector.broadcast %13 : vector<1x32xf32> to vector<14x32xf32>
    %432 = arith.addf %430, %431 : vector<14x32xf32>
    %433 = tpu.concatenate %255, %432 in 0 : vector<14x32xf32>, vector<14x32xf32> -> vector<28x32xf32>
    %c0_113 = arith.constant 0 : index
    %c0_114 = arith.constant 0 : index
    %c0_115 = arith.constant 0 : index
    %434 = vector.load %arg11[%c0_113, %c0_114, %c0_115] : memref<2x8x96xf32, #tpu.memory_space<vmem>>, vector<1x8x96xf32>
    %435 = vector.shape_cast %434 : vector<1x8x96xf32> to vector<8x96xf32>
    %436 = vector.extract_strided_slice %435 {offsets = [0, 0], sizes = [1, 96], strides = [1, 1]} : vector<8x96xf32> to vector<1x96xf32>
    %437 = vector.extract_strided_slice %435 {offsets = [1, 0], sizes = [1, 64], strides = [1, 1]} : vector<8x96xf32> to vector<1x64xf32>
    %438 = vector.extract_strided_slice %435 {offsets = [2, 0], sizes = [1, 32], strides = [1, 1]} : vector<8x96xf32> to vector<1x32xf32>
    %439 = vector.extract_strided_slice %435 {offsets = [3, 0], sizes = [1, 32], strides = [1, 1]} : vector<8x96xf32> to vector<1x32xf32>
    %440 = vector.extract_strided_slice %435 {offsets = [4, 0], sizes = [1, 32], strides = [1, 1]} : vector<8x96xf32> to vector<1x32xf32>
    %441 = vector.extract_strided_slice %435 {offsets = [5, 0], sizes = [1, 32], strides = [1, 1]} : vector<8x96xf32> to vector<1x32xf32>
    %442 = vector.extract_strided_slice %435 {offsets = [6, 0], sizes = [1, 32], strides = [1, 1]} : vector<8x96xf32> to vector<1x32xf32>
    %443 = vector.extract_strided_slice %435 {offsets = [7, 0], sizes = [1, 32], strides = [1, 1]} : vector<8x96xf32> to vector<1x32xf32>
    %c0_116 = arith.constant 0 : index
    %c0_117 = arith.constant 0 : index
    %c0_118 = arith.constant 0 : index
    %444 = vector.load %arg7[%c0_116, %c0_117, %c0_118] : memref<2x32x96xf32, #tpu.memory_space<vmem>>, vector<1x32x96xf32>
    %445 = vector.shape_cast %444 : vector<1x32x96xf32> to vector<32x96xf32>
    %cst_119 = arith.constant dense<0.000000e+00> : vector<28x96xf32>
    %446 = tpu.matmul %433, %445, %cst_119 {dimension_numbers = #tpu.dot_dimension_numbers<[1], [0], [0], [1], [0, 0, 1, 1], [], []>} : vector<28x32xf32>, vector<32x96xf32>, vector<28x96xf32> -> vector<28x96xf32>
    %447 = vector.broadcast %436 : vector<1x96xf32> to vector<28x96xf32>
    %448 = arith.addf %446, %447 : vector<28x96xf32>
    %c0_120 = arith.constant 0 : index
    %c0_121 = arith.constant 0 : index
    %c0_122 = arith.constant 0 : index
    %449 = vector.load %arg8[%c0_120, %c0_121, %c0_122] : memref<2x32x128xf32, #tpu.memory_space<vmem>>, vector<1x32x128xf32>
    %450 = vector.shape_cast %449 : vector<1x32x128xf32> to vector<32x128xf32>
    %451 = vector.extract_strided_slice %448 {offsets = [0, 0], sizes = [14, 96], strides = [1, 1]} : vector<28x96xf32> to vector<14x96xf32>
    %452 = vector.extract_strided_slice %451 {offsets = [0, 0], sizes = [14, 32], strides = [1, 1]} : vector<14x96xf32> to vector<14x32xf32>
    %cst_123 = arith.constant 0.353553385 : f32
    %453 = vector.broadcast %cst_123 : f32 to vector<14x32xf32>
    %454 = arith.mulf %452, %453 : vector<14x32xf32>
    %455 = vector.extract_strided_slice %451 {offsets = [0, 32], sizes = [14, 32], strides = [1, 1]} : vector<14x96xf32> to vector<14x32xf32>
    %456 = vector.extract_strided_slice %451 {offsets = [0, 64], sizes = [14, 32], strides = [1, 1]} : vector<14x96xf32> to vector<14x32xf32>
    %cst_124 = arith.constant dense<0.000000e+00> : vector<14x128xf32>
    %457 = tpu.matmul %456, %450, %cst_124 {dimension_numbers = #tpu.dot_dimension_numbers<[1], [0], [0], [1], [0, 0, 1, 1], [], []>} : vector<14x32xf32>, vector<32x128xf32>, vector<14x128xf32> -> vector<14x128xf32>
    %cst_125 = arith.constant 0.000000e+00 : f32
    %458 = vector.broadcast %cst_125 : f32 to vector<14x32xf32>
    %459 = vector.extract_strided_slice %454 {offsets = [0, 0], sizes = [14, 8], strides = [1, 1]} : vector<14x32xf32> to vector<14x8xf32>
    %460 = vector.extract_strided_slice %455 {offsets = [0, 0], sizes = [14, 8], strides = [1, 1]} : vector<14x32xf32> to vector<14x8xf32>
    %cst_126 = arith.constant dense<0.000000e+00> : vector<14x14xf32>
    %461 = tpu.matmul %459, %460, %cst_126 {dimension_numbers = #tpu.dot_dimension_numbers<[1], [1], [0], [0], [0, 0, 1, 0], [], []>} : vector<14x8xf32>, vector<14x8xf32>, vector<14x14xf32> -> vector<14x14xf32>
    %cst_127 = arith.constant dense<0xFF800000> : vector<14xf32>
    %462 = vector.multi_reduction <maximumf>, %461, %cst_127 [1] : vector<14x14xf32> to vector<14xf32>
    %463 = vector.shape_cast %462 : vector<14xf32> to vector<14x1xf32>
    %464 = vector.broadcast %463 : vector<14x1xf32> to vector<14x14xf32>
    %465 = arith.subf %461, %464 : vector<14x14xf32>
    %466 = math.exp %465 : vector<14x14xf32>
    %cst_128 = arith.constant dense<0.000000e+00> : vector<14xf32>
    %467 = vector.multi_reduction <add>, %466, %cst_128 [1] : vector<14x14xf32> to vector<14xf32>
    %468 = vector.shape_cast %467 : vector<14xf32> to vector<14x1xf32>
    %469 = vector.broadcast %468 : vector<14x1xf32> to vector<14x14xf32>
    %470 = arith.divf %466, %469 : vector<14x14xf32>
    %471 = vector.extract_strided_slice %457 {offsets = [0, 0], sizes = [14, 32], strides = [1, 1]} : vector<14x128xf32> to vector<14x32xf32>
    %cst_129 = arith.constant dense<0.000000e+00> : vector<14x32xf32>
    %472 = tpu.matmul %470, %471, %cst_129 {dimension_numbers = #tpu.dot_dimension_numbers<[1], [0], [0], [1], [0, 0, 1, 1], [], []>} : vector<14x14xf32>, vector<14x32xf32>, vector<14x32xf32> -> vector<14x32xf32>
    %473 = arith.addf %458, %472 : vector<14x32xf32>
    %474 = vector.extract_strided_slice %454 {offsets = [0, 8], sizes = [14, 8], strides = [1, 1]} : vector<14x32xf32> to vector<14x8xf32>
    %475 = vector.extract_strided_slice %455 {offsets = [0, 8], sizes = [14, 8], strides = [1, 1]} : vector<14x32xf32> to vector<14x8xf32>
    %cst_130 = arith.constant dense<0.000000e+00> : vector<14x14xf32>
    %476 = tpu.matmul %474, %475, %cst_130 {dimension_numbers = #tpu.dot_dimension_numbers<[1], [1], [0], [0], [0, 0, 1, 0], [], []>} : vector<14x8xf32>, vector<14x8xf32>, vector<14x14xf32> -> vector<14x14xf32>
    %cst_131 = arith.constant dense<0xFF800000> : vector<14xf32>
    %477 = vector.multi_reduction <maximumf>, %476, %cst_131 [1] : vector<14x14xf32> to vector<14xf32>
    %478 = vector.shape_cast %477 : vector<14xf32> to vector<14x1xf32>
    %479 = vector.broadcast %478 : vector<14x1xf32> to vector<14x14xf32>
    %480 = arith.subf %476, %479 : vector<14x14xf32>
    %481 = math.exp %480 : vector<14x14xf32>
    %cst_132 = arith.constant dense<0.000000e+00> : vector<14xf32>
    %482 = vector.multi_reduction <add>, %481, %cst_132 [1] : vector<14x14xf32> to vector<14xf32>
    %483 = vector.shape_cast %482 : vector<14xf32> to vector<14x1xf32>
    %484 = vector.broadcast %483 : vector<14x1xf32> to vector<14x14xf32>
    %485 = arith.divf %481, %484 : vector<14x14xf32>
    %486 = vector.extract_strided_slice %457 {offsets = [0, 32], sizes = [14, 32], strides = [1, 1]} : vector<14x128xf32> to vector<14x32xf32>
    %cst_133 = arith.constant dense<0.000000e+00> : vector<14x32xf32>
    %487 = tpu.matmul %485, %486, %cst_133 {dimension_numbers = #tpu.dot_dimension_numbers<[1], [0], [0], [1], [0, 0, 1, 1], [], []>} : vector<14x14xf32>, vector<14x32xf32>, vector<14x32xf32> -> vector<14x32xf32>
    %488 = arith.addf %473, %487 : vector<14x32xf32>
    %489 = vector.extract_strided_slice %454 {offsets = [0, 16], sizes = [14, 8], strides = [1, 1]} : vector<14x32xf32> to vector<14x8xf32>
    %490 = vector.extract_strided_slice %455 {offsets = [0, 16], sizes = [14, 8], strides = [1, 1]} : vector<14x32xf32> to vector<14x8xf32>
    %cst_134 = arith.constant dense<0.000000e+00> : vector<14x14xf32>
    %491 = tpu.matmul %489, %490, %cst_134 {dimension_numbers = #tpu.dot_dimension_numbers<[1], [1], [0], [0], [0, 0, 1, 0], [], []>} : vector<14x8xf32>, vector<14x8xf32>, vector<14x14xf32> -> vector<14x14xf32>
    %cst_135 = arith.constant dense<0xFF800000> : vector<14xf32>
    %492 = vector.multi_reduction <maximumf>, %491, %cst_135 [1] : vector<14x14xf32> to vector<14xf32>
    %493 = vector.shape_cast %492 : vector<14xf32> to vector<14x1xf32>
    %494 = vector.broadcast %493 : vector<14x1xf32> to vector<14x14xf32>
    %495 = arith.subf %491, %494 : vector<14x14xf32>
    %496 = math.exp %495 : vector<14x14xf32>
    %cst_136 = arith.constant dense<0.000000e+00> : vector<14xf32>
    %497 = vector.multi_reduction <add>, %496, %cst_136 [1] : vector<14x14xf32> to vector<14xf32>
    %498 = vector.shape_cast %497 : vector<14xf32> to vector<14x1xf32>
    %499 = vector.broadcast %498 : vector<14x1xf32> to vector<14x14xf32>
    %500 = arith.divf %496, %499 : vector<14x14xf32>
    %501 = vector.extract_strided_slice %457 {offsets = [0, 64], sizes = [14, 32], strides = [1, 1]} : vector<14x128xf32> to vector<14x32xf32>
    %cst_137 = arith.constant dense<0.000000e+00> : vector<14x32xf32>
    %502 = tpu.matmul %500, %501, %cst_137 {dimension_numbers = #tpu.dot_dimension_numbers<[1], [0], [0], [1], [0, 0, 1, 1], [], []>} : vector<14x14xf32>, vector<14x32xf32>, vector<14x32xf32> -> vector<14x32xf32>
    %503 = arith.addf %488, %502 : vector<14x32xf32>
    %504 = vector.extract_strided_slice %454 {offsets = [0, 24], sizes = [14, 8], strides = [1, 1]} : vector<14x32xf32> to vector<14x8xf32>
    %505 = vector.extract_strided_slice %455 {offsets = [0, 24], sizes = [14, 8], strides = [1, 1]} : vector<14x32xf32> to vector<14x8xf32>
    %cst_138 = arith.constant dense<0.000000e+00> : vector<14x14xf32>
    %506 = tpu.matmul %504, %505, %cst_138 {dimension_numbers = #tpu.dot_dimension_numbers<[1], [1], [0], [0], [0, 0, 1, 0], [], []>} : vector<14x8xf32>, vector<14x8xf32>, vector<14x14xf32> -> vector<14x14xf32>
    %cst_139 = arith.constant dense<0xFF800000> : vector<14xf32>
    %507 = vector.multi_reduction <maximumf>, %506, %cst_139 [1] : vector<14x14xf32> to vector<14xf32>
    %508 = vector.shape_cast %507 : vector<14xf32> to vector<14x1xf32>
    %509 = vector.broadcast %508 : vector<14x1xf32> to vector<14x14xf32>
    %510 = arith.subf %506, %509 : vector<14x14xf32>
    %511 = math.exp %510 : vector<14x14xf32>
    %cst_140 = arith.constant dense<0.000000e+00> : vector<14xf32>
    %512 = vector.multi_reduction <add>, %511, %cst_140 [1] : vector<14x14xf32> to vector<14xf32>
    %513 = vector.shape_cast %512 : vector<14xf32> to vector<14x1xf32>
    %514 = vector.broadcast %513 : vector<14x1xf32> to vector<14x14xf32>
    %515 = arith.divf %511, %514 : vector<14x14xf32>
    %516 = vector.extract_strided_slice %457 {offsets = [0, 96], sizes = [14, 32], strides = [1, 1]} : vector<14x128xf32> to vector<14x32xf32>
    %cst_141 = arith.constant dense<0.000000e+00> : vector<14x32xf32>
    %517 = tpu.matmul %515, %516, %cst_141 {dimension_numbers = #tpu.dot_dimension_numbers<[1], [0], [0], [1], [0, 0, 1, 1], [], []>} : vector<14x14xf32>, vector<14x32xf32>, vector<14x32xf32> -> vector<14x32xf32>
    %518 = arith.addf %503, %517 : vector<14x32xf32>
    %519 = vector.extract_strided_slice %448 {offsets = [14, 0], sizes = [14, 96], strides = [1, 1]} : vector<28x96xf32> to vector<14x96xf32>
    %520 = vector.extract_strided_slice %519 {offsets = [0, 0], sizes = [14, 32], strides = [1, 1]} : vector<14x96xf32> to vector<14x32xf32>
    %cst_142 = arith.constant 0.353553385 : f32
    %521 = vector.broadcast %cst_142 : f32 to vector<14x32xf32>
    %522 = arith.mulf %520, %521 : vector<14x32xf32>
    %523 = vector.extract_strided_slice %519 {offsets = [0, 32], sizes = [14, 32], strides = [1, 1]} : vector<14x96xf32> to vector<14x32xf32>
    %524 = vector.extract_strided_slice %519 {offsets = [0, 64], sizes = [14, 32], strides = [1, 1]} : vector<14x96xf32> to vector<14x32xf32>
    %cst_143 = arith.constant dense<0.000000e+00> : vector<14x128xf32>
    %525 = tpu.matmul %524, %450, %cst_143 {dimension_numbers = #tpu.dot_dimension_numbers<[1], [0], [0], [1], [0, 0, 1, 1], [], []>} : vector<14x32xf32>, vector<32x128xf32>, vector<14x128xf32> -> vector<14x128xf32>
    %cst_144 = arith.constant 0.000000e+00 : f32
    %526 = vector.broadcast %cst_144 : f32 to vector<14x32xf32>
    %527 = vector.extract_strided_slice %522 {offsets = [0, 0], sizes = [14, 8], strides = [1, 1]} : vector<14x32xf32> to vector<14x8xf32>
    %528 = vector.extract_strided_slice %523 {offsets = [0, 0], sizes = [14, 8], strides = [1, 1]} : vector<14x32xf32> to vector<14x8xf32>
    %cst_145 = arith.constant dense<0.000000e+00> : vector<14x14xf32>
    %529 = tpu.matmul %527, %528, %cst_145 {dimension_numbers = #tpu.dot_dimension_numbers<[1], [1], [0], [0], [0, 0, 1, 0], [], []>} : vector<14x8xf32>, vector<14x8xf32>, vector<14x14xf32> -> vector<14x14xf32>
    %cst_146 = arith.constant dense<0xFF800000> : vector<14xf32>
    %530 = vector.multi_reduction <maximumf>, %529, %cst_146 [1] : vector<14x14xf32> to vector<14xf32>
    %531 = vector.shape_cast %530 : vector<14xf32> to vector<14x1xf32>
    %532 = vector.broadcast %531 : vector<14x1xf32> to vector<14x14xf32>
    %533 = arith.subf %529, %532 : vector<14x14xf32>
    %534 = math.exp %533 : vector<14x14xf32>
    %cst_147 = arith.constant dense<0.000000e+00> : vector<14xf32>
    %535 = vector.multi_reduction <add>, %534, %cst_147 [1] : vector<14x14xf32> to vector<14xf32>
    %536 = vector.shape_cast %535 : vector<14xf32> to vector<14x1xf32>
    %537 = vector.broadcast %536 : vector<14x1xf32> to vector<14x14xf32>
    %538 = arith.divf %534, %537 : vector<14x14xf32>
    %539 = vector.extract_strided_slice %525 {offsets = [0, 0], sizes = [14, 32], strides = [1, 1]} : vector<14x128xf32> to vector<14x32xf32>
    %cst_148 = arith.constant dense<0.000000e+00> : vector<14x32xf32>
    %540 = tpu.matmul %538, %539, %cst_148 {dimension_numbers = #tpu.dot_dimension_numbers<[1], [0], [0], [1], [0, 0, 1, 1], [], []>} : vector<14x14xf32>, vector<14x32xf32>, vector<14x32xf32> -> vector<14x32xf32>
    %541 = arith.addf %526, %540 : vector<14x32xf32>
    %542 = vector.extract_strided_slice %522 {offsets = [0, 8], sizes = [14, 8], strides = [1, 1]} : vector<14x32xf32> to vector<14x8xf32>
    %543 = vector.extract_strided_slice %523 {offsets = [0, 8], sizes = [14, 8], strides = [1, 1]} : vector<14x32xf32> to vector<14x8xf32>
    %cst_149 = arith.constant dense<0.000000e+00> : vector<14x14xf32>
    %544 = tpu.matmul %542, %543, %cst_149 {dimension_numbers = #tpu.dot_dimension_numbers<[1], [1], [0], [0], [0, 0, 1, 0], [], []>} : vector<14x8xf32>, vector<14x8xf32>, vector<14x14xf32> -> vector<14x14xf32>
    %cst_150 = arith.constant dense<0xFF800000> : vector<14xf32>
    %545 = vector.multi_reduction <maximumf>, %544, %cst_150 [1] : vector<14x14xf32> to vector<14xf32>
    %546 = vector.shape_cast %545 : vector<14xf32> to vector<14x1xf32>
    %547 = vector.broadcast %546 : vector<14x1xf32> to vector<14x14xf32>
    %548 = arith.subf %544, %547 : vector<14x14xf32>
    %549 = math.exp %548 : vector<14x14xf32>
    %cst_151 = arith.constant dense<0.000000e+00> : vector<14xf32>
    %550 = vector.multi_reduction <add>, %549, %cst_151 [1] : vector<14x14xf32> to vector<14xf32>
    %551 = vector.shape_cast %550 : vector<14xf32> to vector<14x1xf32>
    %552 = vector.broadcast %551 : vector<14x1xf32> to vector<14x14xf32>
    %553 = arith.divf %549, %552 : vector<14x14xf32>
    %554 = vector.extract_strided_slice %525 {offsets = [0, 32], sizes = [14, 32], strides = [1, 1]} : vector<14x128xf32> to vector<14x32xf32>
    %cst_152 = arith.constant dense<0.000000e+00> : vector<14x32xf32>
    %555 = tpu.matmul %553, %554, %cst_152 {dimension_numbers = #tpu.dot_dimension_numbers<[1], [0], [0], [1], [0, 0, 1, 1], [], []>} : vector<14x14xf32>, vector<14x32xf32>, vector<14x32xf32> -> vector<14x32xf32>
    %556 = arith.addf %541, %555 : vector<14x32xf32>
    %557 = vector.extract_strided_slice %522 {offsets = [0, 16], sizes = [14, 8], strides = [1, 1]} : vector<14x32xf32> to vector<14x8xf32>
    %558 = vector.extract_strided_slice %523 {offsets = [0, 16], sizes = [14, 8], strides = [1, 1]} : vector<14x32xf32> to vector<14x8xf32>
    %cst_153 = arith.constant dense<0.000000e+00> : vector<14x14xf32>
    %559 = tpu.matmul %557, %558, %cst_153 {dimension_numbers = #tpu.dot_dimension_numbers<[1], [1], [0], [0], [0, 0, 1, 0], [], []>} : vector<14x8xf32>, vector<14x8xf32>, vector<14x14xf32> -> vector<14x14xf32>
    %cst_154 = arith.constant dense<0xFF800000> : vector<14xf32>
    %560 = vector.multi_reduction <maximumf>, %559, %cst_154 [1] : vector<14x14xf32> to vector<14xf32>
    %561 = vector.shape_cast %560 : vector<14xf32> to vector<14x1xf32>
    %562 = vector.broadcast %561 : vector<14x1xf32> to vector<14x14xf32>
    %563 = arith.subf %559, %562 : vector<14x14xf32>
    %564 = math.exp %563 : vector<14x14xf32>
    %cst_155 = arith.constant dense<0.000000e+00> : vector<14xf32>
    %565 = vector.multi_reduction <add>, %564, %cst_155 [1] : vector<14x14xf32> to vector<14xf32>
    %566 = vector.shape_cast %565 : vector<14xf32> to vector<14x1xf32>
    %567 = vector.broadcast %566 : vector<14x1xf32> to vector<14x14xf32>
    %568 = arith.divf %564, %567 : vector<14x14xf32>
    %569 = vector.extract_strided_slice %525 {offsets = [0, 64], sizes = [14, 32], strides = [1, 1]} : vector<14x128xf32> to vector<14x32xf32>
    %cst_156 = arith.constant dense<0.000000e+00> : vector<14x32xf32>
    %570 = tpu.matmul %568, %569, %cst_156 {dimension_numbers = #tpu.dot_dimension_numbers<[1], [0], [0], [1], [0, 0, 1, 1], [], []>} : vector<14x14xf32>, vector<14x32xf32>, vector<14x32xf32> -> vector<14x32xf32>
    %571 = arith.addf %556, %570 : vector<14x32xf32>
    %572 = vector.extract_strided_slice %522 {offsets = [0, 24], sizes = [14, 8], strides = [1, 1]} : vector<14x32xf32> to vector<14x8xf32>
    %573 = vector.extract_strided_slice %523 {offsets = [0, 24], sizes = [14, 8], strides = [1, 1]} : vector<14x32xf32> to vector<14x8xf32>
    %cst_157 = arith.constant dense<0.000000e+00> : vector<14x14xf32>
    %574 = tpu.matmul %572, %573, %cst_157 {dimension_numbers = #tpu.dot_dimension_numbers<[1], [1], [0], [0], [0, 0, 1, 0], [], []>} : vector<14x8xf32>, vector<14x8xf32>, vector<14x14xf32> -> vector<14x14xf32>
    %cst_158 = arith.constant dense<0xFF800000> : vector<14xf32>
    %575 = vector.multi_reduction <maximumf>, %574, %cst_158 [1] : vector<14x14xf32> to vector<14xf32>
    %576 = vector.shape_cast %575 : vector<14xf32> to vector<14x1xf32>
    %577 = vector.broadcast %576 : vector<14x1xf32> to vector<14x14xf32>
    %578 = arith.subf %574, %577 : vector<14x14xf32>
    %579 = math.exp %578 : vector<14x14xf32>
    %cst_159 = arith.constant dense<0.000000e+00> : vector<14xf32>
    %580 = vector.multi_reduction <add>, %579, %cst_159 [1] : vector<14x14xf32> to vector<14xf32>
    %581 = vector.shape_cast %580 : vector<14xf32> to vector<14x1xf32>
    %582 = vector.broadcast %581 : vector<14x1xf32> to vector<14x14xf32>
    %583 = arith.divf %579, %582 : vector<14x14xf32>
    %584 = vector.extract_strided_slice %525 {offsets = [0, 96], sizes = [14, 32], strides = [1, 1]} : vector<14x128xf32> to vector<14x32xf32>
    %cst_160 = arith.constant dense<0.000000e+00> : vector<14x32xf32>
    %585 = tpu.matmul %583, %584, %cst_160 {dimension_numbers = #tpu.dot_dimension_numbers<[1], [0], [0], [1], [0, 0, 1, 1], [], []>} : vector<14x14xf32>, vector<14x32xf32>, vector<14x32xf32> -> vector<14x32xf32>
    %586 = arith.addf %571, %585 : vector<14x32xf32>
    %587 = tpu.concatenate %518, %586 in 0 : vector<14x32xf32>, vector<14x32xf32> -> vector<28x32xf32>
    %588 = vector.broadcast %438 : vector<1x32xf32> to vector<28x32xf32>
    %589 = arith.addf %587, %588 : vector<28x32xf32>
    %590 = arith.addf %433, %589 : vector<28x32xf32>
    %cst_161 = arith.constant dense<0.000000e+00> : vector<28xf32>
    %591 = vector.multi_reduction <add>, %590, %cst_161 [1] : vector<28x32xf32> to vector<28xf32>
    %592 = vector.shape_cast %591 : vector<28xf32> to vector<28x1xf32>
    %cst_162 = arith.constant 3.200000e+01 : f32
    %593 = vector.broadcast %cst_162 : f32 to vector<28x1xf32>
    %594 = arith.divf %592, %593 : vector<28x1xf32>
    %595 = vector.broadcast %594 : vector<28x1xf32> to vector<28x32xf32>
    %596 = arith.subf %590, %595 : vector<28x32xf32>
    %597 = arith.mulf %596, %596 : vector<28x32xf32>
    %cst_163 = arith.constant dense<0.000000e+00> : vector<28xf32>
    %598 = vector.multi_reduction <add>, %597, %cst_163 [1] : vector<28x32xf32> to vector<28xf32>
    %599 = vector.shape_cast %598 : vector<28xf32> to vector<28x1xf32>
    %cst_164 = arith.constant 3.200000e+01 : f32
    %600 = vector.broadcast %cst_164 : f32 to vector<28x1xf32>
    %601 = arith.divf %599, %600 : vector<28x1xf32>
    %602 = vector.broadcast %594 : vector<28x1xf32> to vector<28x32xf32>
    %603 = arith.subf %590, %602 : vector<28x32xf32>
    %cst_165 = arith.constant 9.99999974E-6 : f32
    %604 = vector.broadcast %cst_165 : f32 to vector<28x1xf32>
    %605 = arith.addf %601, %604 : vector<28x1xf32>
    %606 = math.rsqrt %605 : vector<28x1xf32>
    %607 = vector.broadcast %606 : vector<28x1xf32> to vector<28x32xf32>
    %608 = arith.mulf %603, %607 : vector<28x32xf32>
    %609 = vector.broadcast %439 : vector<1x32xf32> to vector<28x32xf32>
    %610 = arith.mulf %608, %609 : vector<28x32xf32>
    %611 = vector.broadcast %440 : vector<1x32xf32> to vector<28x32xf32>
    %612 = arith.addf %610, %611 : vector<28x32xf32>
    %c0_166 = arith.constant 0 : index
    %c0_167 = arith.constant 0 : index
    %c0_168 = arith.constant 0 : index
    %613 = vector.load %arg9[%c0_166, %c0_167, %c0_168] : memref<2x32x64xf32, #tpu.memory_space<vmem>>, vector<1x32x64xf32>
    %614 = vector.shape_cast %613 : vector<1x32x64xf32> to vector<32x64xf32>
    %cst_169 = arith.constant dense<0.000000e+00> : vector<28x64xf32>
    %615 = tpu.matmul %612, %614, %cst_169 {dimension_numbers = #tpu.dot_dimension_numbers<[1], [0], [0], [1], [0, 0, 1, 1], [], []>} : vector<28x32xf32>, vector<32x64xf32>, vector<28x64xf32> -> vector<28x64xf32>
    %616 = vector.broadcast %437 : vector<1x64xf32> to vector<28x64xf32>
    %617 = arith.addf %615, %616 : vector<28x64xf32>
    %cst_170 = arith.constant 5.000000e-01 : f32
    %618 = vector.broadcast %cst_170 : f32 to vector<28x64xf32>
    %619 = arith.mulf %618, %617 : vector<28x64xf32>
    %cst_171 = arith.constant 4.471500e-02 : f32
    %620 = vector.broadcast %cst_171 : f32 to vector<28x64xf32>
    %621 = arith.mulf %620, %617 : vector<28x64xf32>
    %622 = arith.mulf %621, %617 : vector<28x64xf32>
    %623 = arith.mulf %622, %617 : vector<28x64xf32>
    %624 = arith.addf %617, %623 : vector<28x64xf32>
    %cst_172 = arith.constant 0.797884583 : f32
    %625 = vector.broadcast %cst_172 : f32 to vector<28x64xf32>
    %626 = arith.mulf %625, %624 : vector<28x64xf32>
    %627 = math.tanh %626 : vector<28x64xf32>
    %cst_173 = arith.constant 1.000000e+00 : f32
    %628 = vector.broadcast %cst_173 : f32 to vector<28x64xf32>
    %629 = arith.addf %628, %627 : vector<28x64xf32>
    %630 = arith.mulf %619, %629 : vector<28x64xf32>
    %c0_174 = arith.constant 0 : index
    %c0_175 = arith.constant 0 : index
    %c0_176 = arith.constant 0 : index
    %631 = vector.load %arg10[%c0_174, %c0_175, %c0_176] : memref<2x64x32xf32, #tpu.memory_space<vmem>>, vector<1x64x32xf32>
    %632 = vector.shape_cast %631 : vector<1x64x32xf32> to vector<64x32xf32>
    %cst_177 = arith.constant dense<0.000000e+00> : vector<28x32xf32>
    %633 = tpu.matmul %630, %632, %cst_177 {dimension_numbers = #tpu.dot_dimension_numbers<[1], [0], [0], [1], [0, 0, 1, 1], [], []>} : vector<28x64xf32>, vector<64x32xf32>, vector<28x32xf32> -> vector<28x32xf32>
    %634 = vector.broadcast %441 : vector<1x32xf32> to vector<28x32xf32>
    %635 = arith.addf %633, %634 : vector<28x32xf32>
    %636 = arith.addf %612, %635 : vector<28x32xf32>
    %cst_178 = arith.constant dense<0.000000e+00> : vector<28xf32>
    %637 = vector.multi_reduction <add>, %636, %cst_178 [1] : vector<28x32xf32> to vector<28xf32>
    %638 = vector.shape_cast %637 : vector<28xf32> to vector<28x1xf32>
    %cst_179 = arith.constant 3.200000e+01 : f32
    %639 = vector.broadcast %cst_179 : f32 to vector<28x1xf32>
    %640 = arith.divf %638, %639 : vector<28x1xf32>
    %641 = vector.broadcast %640 : vector<28x1xf32> to vector<28x32xf32>
    %642 = arith.subf %636, %641 : vector<28x32xf32>
    %643 = arith.mulf %642, %642 : vector<28x32xf32>
    %cst_180 = arith.constant dense<0.000000e+00> : vector<28xf32>
    %644 = vector.multi_reduction <add>, %643, %cst_180 [1] : vector<28x32xf32> to vector<28xf32>
    %645 = vector.shape_cast %644 : vector<28xf32> to vector<28x1xf32>
    %cst_181 = arith.constant 3.200000e+01 : f32
    %646 = vector.broadcast %cst_181 : f32 to vector<28x1xf32>
    %647 = arith.divf %645, %646 : vector<28x1xf32>
    %648 = vector.broadcast %640 : vector<28x1xf32> to vector<28x32xf32>
    %649 = arith.subf %636, %648 : vector<28x32xf32>
    %cst_182 = arith.constant 9.99999974E-6 : f32
    %650 = vector.broadcast %cst_182 : f32 to vector<28x1xf32>
    %651 = arith.addf %647, %650 : vector<28x1xf32>
    %652 = math.rsqrt %651 : vector<28x1xf32>
    %653 = vector.broadcast %652 : vector<28x1xf32> to vector<28x32xf32>
    %654 = arith.mulf %649, %653 : vector<28x32xf32>
    %655 = vector.broadcast %442 : vector<1x32xf32> to vector<28x32xf32>
    %656 = arith.mulf %654, %655 : vector<28x32xf32>
    %657 = vector.broadcast %443 : vector<1x32xf32> to vector<28x32xf32>
    %658 = arith.addf %656, %657 : vector<28x32xf32>
    %c1 = arith.constant 1 : index
    %c0_183 = arith.constant 0 : index
    %c0_184 = arith.constant 0 : index
    %659 = vector.load %arg11[%c1, %c0_183, %c0_184] : memref<2x8x96xf32, #tpu.memory_space<vmem>>, vector<1x8x96xf32>
    %660 = vector.shape_cast %659 : vector<1x8x96xf32> to vector<8x96xf32>
    %661 = vector.extract_strided_slice %660 {offsets = [0, 0], sizes = [1, 96], strides = [1, 1]} : vector<8x96xf32> to vector<1x96xf32>
    %662 = vector.extract_strided_slice %660 {offsets = [1, 0], sizes = [1, 64], strides = [1, 1]} : vector<8x96xf32> to vector<1x64xf32>
    %663 = vector.extract_strided_slice %660 {offsets = [2, 0], sizes = [1, 32], strides = [1, 1]} : vector<8x96xf32> to vector<1x32xf32>
    %664 = vector.extract_strided_slice %660 {offsets = [3, 0], sizes = [1, 32], strides = [1, 1]} : vector<8x96xf32> to vector<1x32xf32>
    %665 = vector.extract_strided_slice %660 {offsets = [4, 0], sizes = [1, 32], strides = [1, 1]} : vector<8x96xf32> to vector<1x32xf32>
    %666 = vector.extract_strided_slice %660 {offsets = [5, 0], sizes = [1, 32], strides = [1, 1]} : vector<8x96xf32> to vector<1x32xf32>
    %667 = vector.extract_strided_slice %660 {offsets = [6, 0], sizes = [1, 32], strides = [1, 1]} : vector<8x96xf32> to vector<1x32xf32>
    %668 = vector.extract_strided_slice %660 {offsets = [7, 0], sizes = [1, 32], strides = [1, 1]} : vector<8x96xf32> to vector<1x32xf32>
    %c1_185 = arith.constant 1 : index
    %c0_186 = arith.constant 0 : index
    %c0_187 = arith.constant 0 : index
    %669 = vector.load %arg7[%c1_185, %c0_186, %c0_187] : memref<2x32x96xf32, #tpu.memory_space<vmem>>, vector<1x32x96xf32>
    %670 = vector.shape_cast %669 : vector<1x32x96xf32> to vector<32x96xf32>
    %cst_188 = arith.constant dense<0.000000e+00> : vector<28x96xf32>
    %671 = tpu.matmul %658, %670, %cst_188 {dimension_numbers = #tpu.dot_dimension_numbers<[1], [0], [0], [1], [0, 0, 1, 1], [], []>} : vector<28x32xf32>, vector<32x96xf32>, vector<28x96xf32> -> vector<28x96xf32>
    %672 = vector.broadcast %661 : vector<1x96xf32> to vector<28x96xf32>
    %673 = arith.addf %671, %672 : vector<28x96xf32>
    %c1_189 = arith.constant 1 : index
    %c0_190 = arith.constant 0 : index
    %c0_191 = arith.constant 0 : index
    %674 = vector.load %arg8[%c1_189, %c0_190, %c0_191] : memref<2x32x128xf32, #tpu.memory_space<vmem>>, vector<1x32x128xf32>
    %675 = vector.shape_cast %674 : vector<1x32x128xf32> to vector<32x128xf32>
    %676 = vector.extract_strided_slice %673 {offsets = [0, 0], sizes = [14, 96], strides = [1, 1]} : vector<28x96xf32> to vector<14x96xf32>
    %677 = vector.extract_strided_slice %676 {offsets = [0, 0], sizes = [14, 32], strides = [1, 1]} : vector<14x96xf32> to vector<14x32xf32>
    %cst_192 = arith.constant 0.353553385 : f32
    %678 = vector.broadcast %cst_192 : f32 to vector<14x32xf32>
    %679 = arith.mulf %677, %678 : vector<14x32xf32>
    %680 = vector.extract_strided_slice %676 {offsets = [0, 32], sizes = [14, 32], strides = [1, 1]} : vector<14x96xf32> to vector<14x32xf32>
    %681 = vector.extract_strided_slice %676 {offsets = [0, 64], sizes = [14, 32], strides = [1, 1]} : vector<14x96xf32> to vector<14x32xf32>
    %cst_193 = arith.constant dense<0.000000e+00> : vector<14x128xf32>
    %682 = tpu.matmul %681, %675, %cst_193 {dimension_numbers = #tpu.dot_dimension_numbers<[1], [0], [0], [1], [0, 0, 1, 1], [], []>} : vector<14x32xf32>, vector<32x128xf32>, vector<14x128xf32> -> vector<14x128xf32>
    %cst_194 = arith.constant 0.000000e+00 : f32
    %683 = vector.broadcast %cst_194 : f32 to vector<14x32xf32>
    %684 = vector.extract_strided_slice %679 {offsets = [0, 0], sizes = [14, 8], strides = [1, 1]} : vector<14x32xf32> to vector<14x8xf32>
    %685 = vector.extract_strided_slice %680 {offsets = [0, 0], sizes = [14, 8], strides = [1, 1]} : vector<14x32xf32> to vector<14x8xf32>
    %cst_195 = arith.constant dense<0.000000e+00> : vector<14x14xf32>
    %686 = tpu.matmul %684, %685, %cst_195 {dimension_numbers = #tpu.dot_dimension_numbers<[1], [1], [0], [0], [0, 0, 1, 0], [], []>} : vector<14x8xf32>, vector<14x8xf32>, vector<14x14xf32> -> vector<14x14xf32>
    %cst_196 = arith.constant dense<0xFF800000> : vector<14xf32>
    %687 = vector.multi_reduction <maximumf>, %686, %cst_196 [1] : vector<14x14xf32> to vector<14xf32>
    %688 = vector.shape_cast %687 : vector<14xf32> to vector<14x1xf32>
    %689 = vector.broadcast %688 : vector<14x1xf32> to vector<14x14xf32>
    %690 = arith.subf %686, %689 : vector<14x14xf32>
    %691 = math.exp %690 : vector<14x14xf32>
    %cst_197 = arith.constant dense<0.000000e+00> : vector<14xf32>
    %692 = vector.multi_reduction <add>, %691, %cst_197 [1] : vector<14x14xf32> to vector<14xf32>
    %693 = vector.shape_cast %692 : vector<14xf32> to vector<14x1xf32>
    %694 = vector.broadcast %693 : vector<14x1xf32> to vector<14x14xf32>
    %695 = arith.divf %691, %694 : vector<14x14xf32>
    %696 = vector.extract_strided_slice %682 {offsets = [0, 0], sizes = [14, 32], strides = [1, 1]} : vector<14x128xf32> to vector<14x32xf32>
    %cst_198 = arith.constant dense<0.000000e+00> : vector<14x32xf32>
    %697 = tpu.matmul %695, %696, %cst_198 {dimension_numbers = #tpu.dot_dimension_numbers<[1], [0], [0], [1], [0, 0, 1, 1], [], []>} : vector<14x14xf32>, vector<14x32xf32>, vector<14x32xf32> -> vector<14x32xf32>
    %698 = arith.addf %683, %697 : vector<14x32xf32>
    %699 = vector.extract_strided_slice %679 {offsets = [0, 8], sizes = [14, 8], strides = [1, 1]} : vector<14x32xf32> to vector<14x8xf32>
    %700 = vector.extract_strided_slice %680 {offsets = [0, 8], sizes = [14, 8], strides = [1, 1]} : vector<14x32xf32> to vector<14x8xf32>
    %cst_199 = arith.constant dense<0.000000e+00> : vector<14x14xf32>
    %701 = tpu.matmul %699, %700, %cst_199 {dimension_numbers = #tpu.dot_dimension_numbers<[1], [1], [0], [0], [0, 0, 1, 0], [], []>} : vector<14x8xf32>, vector<14x8xf32>, vector<14x14xf32> -> vector<14x14xf32>
    %cst_200 = arith.constant dense<0xFF800000> : vector<14xf32>
    %702 = vector.multi_reduction <maximumf>, %701, %cst_200 [1] : vector<14x14xf32> to vector<14xf32>
    %703 = vector.shape_cast %702 : vector<14xf32> to vector<14x1xf32>
    %704 = vector.broadcast %703 : vector<14x1xf32> to vector<14x14xf32>
    %705 = arith.subf %701, %704 : vector<14x14xf32>
    %706 = math.exp %705 : vector<14x14xf32>
    %cst_201 = arith.constant dense<0.000000e+00> : vector<14xf32>
    %707 = vector.multi_reduction <add>, %706, %cst_201 [1] : vector<14x14xf32> to vector<14xf32>
    %708 = vector.shape_cast %707 : vector<14xf32> to vector<14x1xf32>
    %709 = vector.broadcast %708 : vector<14x1xf32> to vector<14x14xf32>
    %710 = arith.divf %706, %709 : vector<14x14xf32>
    %711 = vector.extract_strided_slice %682 {offsets = [0, 32], sizes = [14, 32], strides = [1, 1]} : vector<14x128xf32> to vector<14x32xf32>
    %cst_202 = arith.constant dense<0.000000e+00> : vector<14x32xf32>
    %712 = tpu.matmul %710, %711, %cst_202 {dimension_numbers = #tpu.dot_dimension_numbers<[1], [0], [0], [1], [0, 0, 1, 1], [], []>} : vector<14x14xf32>, vector<14x32xf32>, vector<14x32xf32> -> vector<14x32xf32>
    %713 = arith.addf %698, %712 : vector<14x32xf32>
    %714 = vector.extract_strided_slice %679 {offsets = [0, 16], sizes = [14, 8], strides = [1, 1]} : vector<14x32xf32> to vector<14x8xf32>
    %715 = vector.extract_strided_slice %680 {offsets = [0, 16], sizes = [14, 8], strides = [1, 1]} : vector<14x32xf32> to vector<14x8xf32>
    %cst_203 = arith.constant dense<0.000000e+00> : vector<14x14xf32>
    %716 = tpu.matmul %714, %715, %cst_203 {dimension_numbers = #tpu.dot_dimension_numbers<[1], [1], [0], [0], [0, 0, 1, 0], [], []>} : vector<14x8xf32>, vector<14x8xf32>, vector<14x14xf32> -> vector<14x14xf32>
    %cst_204 = arith.constant dense<0xFF800000> : vector<14xf32>
    %717 = vector.multi_reduction <maximumf>, %716, %cst_204 [1] : vector<14x14xf32> to vector<14xf32>
    %718 = vector.shape_cast %717 : vector<14xf32> to vector<14x1xf32>
    %719 = vector.broadcast %718 : vector<14x1xf32> to vector<14x14xf32>
    %720 = arith.subf %716, %719 : vector<14x14xf32>
    %721 = math.exp %720 : vector<14x14xf32>
    %cst_205 = arith.constant dense<0.000000e+00> : vector<14xf32>
    %722 = vector.multi_reduction <add>, %721, %cst_205 [1] : vector<14x14xf32> to vector<14xf32>
    %723 = vector.shape_cast %722 : vector<14xf32> to vector<14x1xf32>
    %724 = vector.broadcast %723 : vector<14x1xf32> to vector<14x14xf32>
    %725 = arith.divf %721, %724 : vector<14x14xf32>
    %726 = vector.extract_strided_slice %682 {offsets = [0, 64], sizes = [14, 32], strides = [1, 1]} : vector<14x128xf32> to vector<14x32xf32>
    %cst_206 = arith.constant dense<0.000000e+00> : vector<14x32xf32>
    %727 = tpu.matmul %725, %726, %cst_206 {dimension_numbers = #tpu.dot_dimension_numbers<[1], [0], [0], [1], [0, 0, 1, 1], [], []>} : vector<14x14xf32>, vector<14x32xf32>, vector<14x32xf32> -> vector<14x32xf32>
    %728 = arith.addf %713, %727 : vector<14x32xf32>
    %729 = vector.extract_strided_slice %679 {offsets = [0, 24], sizes = [14, 8], strides = [1, 1]} : vector<14x32xf32> to vector<14x8xf32>
    %730 = vector.extract_strided_slice %680 {offsets = [0, 24], sizes = [14, 8], strides = [1, 1]} : vector<14x32xf32> to vector<14x8xf32>
    %cst_207 = arith.constant dense<0.000000e+00> : vector<14x14xf32>
    %731 = tpu.matmul %729, %730, %cst_207 {dimension_numbers = #tpu.dot_dimension_numbers<[1], [1], [0], [0], [0, 0, 1, 0], [], []>} : vector<14x8xf32>, vector<14x8xf32>, vector<14x14xf32> -> vector<14x14xf32>
    %cst_208 = arith.constant dense<0xFF800000> : vector<14xf32>
    %732 = vector.multi_reduction <maximumf>, %731, %cst_208 [1] : vector<14x14xf32> to vector<14xf32>
    %733 = vector.shape_cast %732 : vector<14xf32> to vector<14x1xf32>
    %734 = vector.broadcast %733 : vector<14x1xf32> to vector<14x14xf32>
    %735 = arith.subf %731, %734 : vector<14x14xf32>
    %736 = math.exp %735 : vector<14x14xf32>
    %cst_209 = arith.constant dense<0.000000e+00> : vector<14xf32>
    %737 = vector.multi_reduction <add>, %736, %cst_209 [1] : vector<14x14xf32> to vector<14xf32>
    %738 = vector.shape_cast %737 : vector<14xf32> to vector<14x1xf32>
    %739 = vector.broadcast %738 : vector<14x1xf32> to vector<14x14xf32>
    %740 = arith.divf %736, %739 : vector<14x14xf32>
    %741 = vector.extract_strided_slice %682 {offsets = [0, 96], sizes = [14, 32], strides = [1, 1]} : vector<14x128xf32> to vector<14x32xf32>
    %cst_210 = arith.constant dense<0.000000e+00> : vector<14x32xf32>
    %742 = tpu.matmul %740, %741, %cst_210 {dimension_numbers = #tpu.dot_dimension_numbers<[1], [0], [0], [1], [0, 0, 1, 1], [], []>} : vector<14x14xf32>, vector<14x32xf32>, vector<14x32xf32> -> vector<14x32xf32>
    %743 = arith.addf %728, %742 : vector<14x32xf32>
    %744 = vector.extract_strided_slice %673 {offsets = [14, 0], sizes = [14, 96], strides = [1, 1]} : vector<28x96xf32> to vector<14x96xf32>
    %745 = vector.extract_strided_slice %744 {offsets = [0, 0], sizes = [14, 32], strides = [1, 1]} : vector<14x96xf32> to vector<14x32xf32>
    %cst_211 = arith.constant 0.353553385 : f32
    %746 = vector.broadcast %cst_211 : f32 to vector<14x32xf32>
    %747 = arith.mulf %745, %746 : vector<14x32xf32>
    %748 = vector.extract_strided_slice %744 {offsets = [0, 32], sizes = [14, 32], strides = [1, 1]} : vector<14x96xf32> to vector<14x32xf32>
    %749 = vector.extract_strided_slice %744 {offsets = [0, 64], sizes = [14, 32], strides = [1, 1]} : vector<14x96xf32> to vector<14x32xf32>
    %cst_212 = arith.constant dense<0.000000e+00> : vector<14x128xf32>
    %750 = tpu.matmul %749, %675, %cst_212 {dimension_numbers = #tpu.dot_dimension_numbers<[1], [0], [0], [1], [0, 0, 1, 1], [], []>} : vector<14x32xf32>, vector<32x128xf32>, vector<14x128xf32> -> vector<14x128xf32>
    %cst_213 = arith.constant 0.000000e+00 : f32
    %751 = vector.broadcast %cst_213 : f32 to vector<14x32xf32>
    %752 = vector.extract_strided_slice %747 {offsets = [0, 0], sizes = [14, 8], strides = [1, 1]} : vector<14x32xf32> to vector<14x8xf32>
    %753 = vector.extract_strided_slice %748 {offsets = [0, 0], sizes = [14, 8], strides = [1, 1]} : vector<14x32xf32> to vector<14x8xf32>
    %cst_214 = arith.constant dense<0.000000e+00> : vector<14x14xf32>
    %754 = tpu.matmul %752, %753, %cst_214 {dimension_numbers = #tpu.dot_dimension_numbers<[1], [1], [0], [0], [0, 0, 1, 0], [], []>} : vector<14x8xf32>, vector<14x8xf32>, vector<14x14xf32> -> vector<14x14xf32>
    %cst_215 = arith.constant dense<0xFF800000> : vector<14xf32>
    %755 = vector.multi_reduction <maximumf>, %754, %cst_215 [1] : vector<14x14xf32> to vector<14xf32>
    %756 = vector.shape_cast %755 : vector<14xf32> to vector<14x1xf32>
    %757 = vector.broadcast %756 : vector<14x1xf32> to vector<14x14xf32>
    %758 = arith.subf %754, %757 : vector<14x14xf32>
    %759 = math.exp %758 : vector<14x14xf32>
    %cst_216 = arith.constant dense<0.000000e+00> : vector<14xf32>
    %760 = vector.multi_reduction <add>, %759, %cst_216 [1] : vector<14x14xf32> to vector<14xf32>
    %761 = vector.shape_cast %760 : vector<14xf32> to vector<14x1xf32>
    %762 = vector.broadcast %761 : vector<14x1xf32> to vector<14x14xf32>
    %763 = arith.divf %759, %762 : vector<14x14xf32>
    %764 = vector.extract_strided_slice %750 {offsets = [0, 0], sizes = [14, 32], strides = [1, 1]} : vector<14x128xf32> to vector<14x32xf32>
    %cst_217 = arith.constant dense<0.000000e+00> : vector<14x32xf32>
    %765 = tpu.matmul %763, %764, %cst_217 {dimension_numbers = #tpu.dot_dimension_numbers<[1], [0], [0], [1], [0, 0, 1, 1], [], []>} : vector<14x14xf32>, vector<14x32xf32>, vector<14x32xf32> -> vector<14x32xf32>
    %766 = arith.addf %751, %765 : vector<14x32xf32>
    %767 = vector.extract_strided_slice %747 {offsets = [0, 8], sizes = [14, 8], strides = [1, 1]} : vector<14x32xf32> to vector<14x8xf32>
    %768 = vector.extract_strided_slice %748 {offsets = [0, 8], sizes = [14, 8], strides = [1, 1]} : vector<14x32xf32> to vector<14x8xf32>
    %cst_218 = arith.constant dense<0.000000e+00> : vector<14x14xf32>
    %769 = tpu.matmul %767, %768, %cst_218 {dimension_numbers = #tpu.dot_dimension_numbers<[1], [1], [0], [0], [0, 0, 1, 0], [], []>} : vector<14x8xf32>, vector<14x8xf32>, vector<14x14xf32> -> vector<14x14xf32>
    %cst_219 = arith.constant dense<0xFF800000> : vector<14xf32>
    %770 = vector.multi_reduction <maximumf>, %769, %cst_219 [1] : vector<14x14xf32> to vector<14xf32>
    %771 = vector.shape_cast %770 : vector<14xf32> to vector<14x1xf32>
    %772 = vector.broadcast %771 : vector<14x1xf32> to vector<14x14xf32>
    %773 = arith.subf %769, %772 : vector<14x14xf32>
    %774 = math.exp %773 : vector<14x14xf32>
    %cst_220 = arith.constant dense<0.000000e+00> : vector<14xf32>
    %775 = vector.multi_reduction <add>, %774, %cst_220 [1] : vector<14x14xf32> to vector<14xf32>
    %776 = vector.shape_cast %775 : vector<14xf32> to vector<14x1xf32>
    %777 = vector.broadcast %776 : vector<14x1xf32> to vector<14x14xf32>
    %778 = arith.divf %774, %777 : vector<14x14xf32>
    %779 = vector.extract_strided_slice %750 {offsets = [0, 32], sizes = [14, 32], strides = [1, 1]} : vector<14x128xf32> to vector<14x32xf32>
    %cst_221 = arith.constant dense<0.000000e+00> : vector<14x32xf32>
    %780 = tpu.matmul %778, %779, %cst_221 {dimension_numbers = #tpu.dot_dimension_numbers<[1], [0], [0], [1], [0, 0, 1, 1], [], []>} : vector<14x14xf32>, vector<14x32xf32>, vector<14x32xf32> -> vector<14x32xf32>
    %781 = arith.addf %766, %780 : vector<14x32xf32>
    %782 = vector.extract_strided_slice %747 {offsets = [0, 16], sizes = [14, 8], strides = [1, 1]} : vector<14x32xf32> to vector<14x8xf32>
    %783 = vector.extract_strided_slice %748 {offsets = [0, 16], sizes = [14, 8], strides = [1, 1]} : vector<14x32xf32> to vector<14x8xf32>
    %cst_222 = arith.constant dense<0.000000e+00> : vector<14x14xf32>
    %784 = tpu.matmul %782, %783, %cst_222 {dimension_numbers = #tpu.dot_dimension_numbers<[1], [1], [0], [0], [0, 0, 1, 0], [], []>} : vector<14x8xf32>, vector<14x8xf32>, vector<14x14xf32> -> vector<14x14xf32>
    %cst_223 = arith.constant dense<0xFF800000> : vector<14xf32>
    %785 = vector.multi_reduction <maximumf>, %784, %cst_223 [1] : vector<14x14xf32> to vector<14xf32>
    %786 = vector.shape_cast %785 : vector<14xf32> to vector<14x1xf32>
    %787 = vector.broadcast %786 : vector<14x1xf32> to vector<14x14xf32>
    %788 = arith.subf %784, %787 : vector<14x14xf32>
    %789 = math.exp %788 : vector<14x14xf32>
    %cst_224 = arith.constant dense<0.000000e+00> : vector<14xf32>
    %790 = vector.multi_reduction <add>, %789, %cst_224 [1] : vector<14x14xf32> to vector<14xf32>
    %791 = vector.shape_cast %790 : vector<14xf32> to vector<14x1xf32>
    %792 = vector.broadcast %791 : vector<14x1xf32> to vector<14x14xf32>
    %793 = arith.divf %789, %792 : vector<14x14xf32>
    %794 = vector.extract_strided_slice %750 {offsets = [0, 64], sizes = [14, 32], strides = [1, 1]} : vector<14x128xf32> to vector<14x32xf32>
    %cst_225 = arith.constant dense<0.000000e+00> : vector<14x32xf32>
    %795 = tpu.matmul %793, %794, %cst_225 {dimension_numbers = #tpu.dot_dimension_numbers<[1], [0], [0], [1], [0, 0, 1, 1], [], []>} : vector<14x14xf32>, vector<14x32xf32>, vector<14x32xf32> -> vector<14x32xf32>
    %796 = arith.addf %781, %795 : vector<14x32xf32>
    %797 = vector.extract_strided_slice %747 {offsets = [0, 24], sizes = [14, 8], strides = [1, 1]} : vector<14x32xf32> to vector<14x8xf32>
    %798 = vector.extract_strided_slice %748 {offsets = [0, 24], sizes = [14, 8], strides = [1, 1]} : vector<14x32xf32> to vector<14x8xf32>
    %cst_226 = arith.constant dense<0.000000e+00> : vector<14x14xf32>
    %799 = tpu.matmul %797, %798, %cst_226 {dimension_numbers = #tpu.dot_dimension_numbers<[1], [1], [0], [0], [0, 0, 1, 0], [], []>} : vector<14x8xf32>, vector<14x8xf32>, vector<14x14xf32> -> vector<14x14xf32>
    %cst_227 = arith.constant dense<0xFF800000> : vector<14xf32>
    %800 = vector.multi_reduction <maximumf>, %799, %cst_227 [1] : vector<14x14xf32> to vector<14xf32>
    %801 = vector.shape_cast %800 : vector<14xf32> to vector<14x1xf32>
    %802 = vector.broadcast %801 : vector<14x1xf32> to vector<14x14xf32>
    %803 = arith.subf %799, %802 : vector<14x14xf32>
    %804 = math.exp %803 : vector<14x14xf32>
    %cst_228 = arith.constant dense<0.000000e+00> : vector<14xf32>
    %805 = vector.multi_reduction <add>, %804, %cst_228 [1] : vector<14x14xf32> to vector<14xf32>
    %806 = vector.shape_cast %805 : vector<14xf32> to vector<14x1xf32>
    %807 = vector.broadcast %806 : vector<14x1xf32> to vector<14x14xf32>
    %808 = arith.divf %804, %807 : vector<14x14xf32>
    %809 = vector.extract_strided_slice %750 {offsets = [0, 96], sizes = [14, 32], strides = [1, 1]} : vector<14x128xf32> to vector<14x32xf32>
    %cst_229 = arith.constant dense<0.000000e+00> : vector<14x32xf32>
    %810 = tpu.matmul %808, %809, %cst_229 {dimension_numbers = #tpu.dot_dimension_numbers<[1], [0], [0], [1], [0, 0, 1, 1], [], []>} : vector<14x14xf32>, vector<14x32xf32>, vector<14x32xf32> -> vector<14x32xf32>
    %811 = arith.addf %796, %810 : vector<14x32xf32>
    %812 = tpu.concatenate %743, %811 in 0 : vector<14x32xf32>, vector<14x32xf32> -> vector<28x32xf32>
    %813 = vector.broadcast %663 : vector<1x32xf32> to vector<28x32xf32>
    %814 = arith.addf %812, %813 : vector<28x32xf32>
    %815 = arith.addf %658, %814 : vector<28x32xf32>
    %cst_230 = arith.constant dense<0.000000e+00> : vector<28xf32>
    %816 = vector.multi_reduction <add>, %815, %cst_230 [1] : vector<28x32xf32> to vector<28xf32>
    %817 = vector.shape_cast %816 : vector<28xf32> to vector<28x1xf32>
    %cst_231 = arith.constant 3.200000e+01 : f32
    %818 = vector.broadcast %cst_231 : f32 to vector<28x1xf32>
    %819 = arith.divf %817, %818 : vector<28x1xf32>
    %820 = vector.broadcast %819 : vector<28x1xf32> to vector<28x32xf32>
    %821 = arith.subf %815, %820 : vector<28x32xf32>
    %822 = arith.mulf %821, %821 : vector<28x32xf32>
    %cst_232 = arith.constant dense<0.000000e+00> : vector<28xf32>
    %823 = vector.multi_reduction <add>, %822, %cst_232 [1] : vector<28x32xf32> to vector<28xf32>
    %824 = vector.shape_cast %823 : vector<28xf32> to vector<28x1xf32>
    %cst_233 = arith.constant 3.200000e+01 : f32
    %825 = vector.broadcast %cst_233 : f32 to vector<28x1xf32>
    %826 = arith.divf %824, %825 : vector<28x1xf32>
    %827 = vector.broadcast %819 : vector<28x1xf32> to vector<28x32xf32>
    %828 = arith.subf %815, %827 : vector<28x32xf32>
    %cst_234 = arith.constant 9.99999974E-6 : f32
    %829 = vector.broadcast %cst_234 : f32 to vector<28x1xf32>
    %830 = arith.addf %826, %829 : vector<28x1xf32>
    %831 = math.rsqrt %830 : vector<28x1xf32>
    %832 = vector.broadcast %831 : vector<28x1xf32> to vector<28x32xf32>
    %833 = arith.mulf %828, %832 : vector<28x32xf32>
    %834 = vector.broadcast %664 : vector<1x32xf32> to vector<28x32xf32>
    %835 = arith.mulf %833, %834 : vector<28x32xf32>
    %836 = vector.broadcast %665 : vector<1x32xf32> to vector<28x32xf32>
    %837 = arith.addf %835, %836 : vector<28x32xf32>
    %c1_235 = arith.constant 1 : index
    %c0_236 = arith.constant 0 : index
    %c0_237 = arith.constant 0 : index
    %838 = vector.load %arg9[%c1_235, %c0_236, %c0_237] : memref<2x32x64xf32, #tpu.memory_space<vmem>>, vector<1x32x64xf32>
    %839 = vector.shape_cast %838 : vector<1x32x64xf32> to vector<32x64xf32>
    %cst_238 = arith.constant dense<0.000000e+00> : vector<28x64xf32>
    %840 = tpu.matmul %837, %839, %cst_238 {dimension_numbers = #tpu.dot_dimension_numbers<[1], [0], [0], [1], [0, 0, 1, 1], [], []>} : vector<28x32xf32>, vector<32x64xf32>, vector<28x64xf32> -> vector<28x64xf32>
    %841 = vector.broadcast %662 : vector<1x64xf32> to vector<28x64xf32>
    %842 = arith.addf %840, %841 : vector<28x64xf32>
    %cst_239 = arith.constant 5.000000e-01 : f32
    %843 = vector.broadcast %cst_239 : f32 to vector<28x64xf32>
    %844 = arith.mulf %843, %842 : vector<28x64xf32>
    %cst_240 = arith.constant 4.471500e-02 : f32
    %845 = vector.broadcast %cst_240 : f32 to vector<28x64xf32>
    %846 = arith.mulf %845, %842 : vector<28x64xf32>
    %847 = arith.mulf %846, %842 : vector<28x64xf32>
    %848 = arith.mulf %847, %842 : vector<28x64xf32>
    %849 = arith.addf %842, %848 : vector<28x64xf32>
    %cst_241 = arith.constant 0.797884583 : f32
    %850 = vector.broadcast %cst_241 : f32 to vector<28x64xf32>
    %851 = arith.mulf %850, %849 : vector<28x64xf32>
    %852 = math.tanh %851 : vector<28x64xf32>
    %cst_242 = arith.constant 1.000000e+00 : f32
    %853 = vector.broadcast %cst_242 : f32 to vector<28x64xf32>
    %854 = arith.addf %853, %852 : vector<28x64xf32>
    %855 = arith.mulf %844, %854 : vector<28x64xf32>
    %c1_243 = arith.constant 1 : index
    %c0_244 = arith.constant 0 : index
    %c0_245 = arith.constant 0 : index
    %856 = vector.load %arg10[%c1_243, %c0_244, %c0_245] : memref<2x64x32xf32, #tpu.memory_space<vmem>>, vector<1x64x32xf32>
    %857 = vector.shape_cast %856 : vector<1x64x32xf32> to vector<64x32xf32>
    %cst_246 = arith.constant dense<0.000000e+00> : vector<28x32xf32>
    %858 = tpu.matmul %855, %857, %cst_246 {dimension_numbers = #tpu.dot_dimension_numbers<[1], [0], [0], [1], [0, 0, 1, 1], [], []>} : vector<28x64xf32>, vector<64x32xf32>, vector<28x32xf32> -> vector<28x32xf32>
    %859 = vector.broadcast %666 : vector<1x32xf32> to vector<28x32xf32>
    %860 = arith.addf %858, %859 : vector<28x32xf32>
    %861 = arith.addf %837, %860 : vector<28x32xf32>
    %cst_247 = arith.constant dense<0.000000e+00> : vector<28xf32>
    %862 = vector.multi_reduction <add>, %861, %cst_247 [1] : vector<28x32xf32> to vector<28xf32>
    %863 = vector.shape_cast %862 : vector<28xf32> to vector<28x1xf32>
    %cst_248 = arith.constant 3.200000e+01 : f32
    %864 = vector.broadcast %cst_248 : f32 to vector<28x1xf32>
    %865 = arith.divf %863, %864 : vector<28x1xf32>
    %866 = vector.broadcast %865 : vector<28x1xf32> to vector<28x32xf32>
    %867 = arith.subf %861, %866 : vector<28x32xf32>
    %868 = arith.mulf %867, %867 : vector<28x32xf32>
    %cst_249 = arith.constant dense<0.000000e+00> : vector<28xf32>
    %869 = vector.multi_reduction <add>, %868, %cst_249 [1] : vector<28x32xf32> to vector<28xf32>
    %870 = vector.shape_cast %869 : vector<28xf32> to vector<28x1xf32>
    %cst_250 = arith.constant 3.200000e+01 : f32
    %871 = vector.broadcast %cst_250 : f32 to vector<28x1xf32>
    %872 = arith.divf %870, %871 : vector<28x1xf32>
    %873 = vector.broadcast %865 : vector<28x1xf32> to vector<28x32xf32>
    %874 = arith.subf %861, %873 : vector<28x32xf32>
    %cst_251 = arith.constant 9.99999974E-6 : f32
    %875 = vector.broadcast %cst_251 : f32 to vector<28x1xf32>
    %876 = arith.addf %872, %875 : vector<28x1xf32>
    %877 = math.rsqrt %876 : vector<28x1xf32>
    %878 = vector.broadcast %877 : vector<28x1xf32> to vector<28x32xf32>
    %879 = arith.mulf %874, %878 : vector<28x32xf32>
    %880 = vector.broadcast %667 : vector<1x32xf32> to vector<28x32xf32>
    %881 = arith.mulf %879, %880 : vector<28x32xf32>
    %882 = vector.broadcast %668 : vector<1x32xf32> to vector<28x32xf32>
    %883 = arith.addf %881, %882 : vector<28x32xf32>
    %884 = vector.extract_strided_slice %883 {offsets = [0, 0], sizes = [14, 32], strides = [1, 1]} : vector<28x32xf32> to vector<14x32xf32>
    %c0_252 = arith.constant 0 : index
    %c0_253 = arith.constant 0 : index
    %c0_254 = arith.constant 0 : index
    %885 = vector.load %arg12[%c0_252, %c0_253, %c0_254] : memref<2x14x32xf32, #tpu.memory_space<vmem>>, vector<1x14x32xf32>
    %886 = vector.shape_cast %885 : vector<1x14x32xf32> to vector<14x32xf32>
    %887 = vector.shape_cast %884 : vector<14x32xf32> to vector<1x14x32xf32>
    tpu.vector_store %arg12[%c0_252, %c0_253, %c0_254], %887 {strides = array<i32>} : memref<2x14x32xf32, #tpu.memory_space<vmem>>, vector<1x14x32xf32>,
    %888 = vector.extract_strided_slice %883 {offsets = [14, 0], sizes = [14, 32], strides = [1, 1]} : vector<28x32xf32> to vector<14x32xf32>
    %c1_255 = arith.constant 1 : index
    %c0_256 = arith.constant 0 : index
    %c0_257 = arith.constant 0 : index
    %889 = vector.load %arg12[%c1_255, %c0_256, %c0_257] : memref<2x14x32xf32, #tpu.memory_space<vmem>>, vector<1x14x32xf32>
    %890 = vector.shape_cast %889 : vector<1x14x32xf32> to vector<14x32xf32>
    %891 = vector.shape_cast %888 : vector<14x32xf32> to vector<1x14x32xf32>
    tpu.vector_store %arg12[%c1_255, %c0_256, %c0_257], %891 {strides = array<i32>} : memref<2x14x32xf32, #tpu.memory_space<vmem>>, vector<1x14x32xf32>,
    return
  }
  func.func @transform_0(%arg0: i32) -> (i32, i32) {
    %c0_i32 = arith.constant 0 : i32
    %c0_i32_0 = arith.constant 0 : i32
    %c0_i32_1 = arith.constant 0 : i32
    return %c0_i32, %c0_i32_0 : i32, i32
  }
  func.func @transform_1(%arg0: i32) -> (i32, i32) {
    %c0_i32 = arith.constant 0 : i32
    %c0_i32_0 = arith.constant 0 : i32
    %c0_i32_1 = arith.constant 0 : i32
    return %c0_i32, %c0_i32_0 : i32, i32
  }
  func.func @transform_2(%arg0: i32) -> (i32, i32, i32) {
    %c0_i32 = arith.constant 0 : i32
    %c0_i32_0 = arith.constant 0 : i32
    %c0_i32_1 = arith.constant 0 : i32
    %c0_i32_2 = arith.constant 0 : i32
    return %c0_i32, %c0_i32_0, %c0_i32_1 : i32, i32, i32
  }
  func.func @transform_3(%arg0: i32) -> (i32, i32) {
    %c0_i32 = arith.constant 0 : i32
    %c0_i32_0 = arith.constant 0 : i32
    %c0_i32_1 = arith.constant 0 : i32
    return %c0_i32, %c0_i32_0 : i32, i32
  }
  func.func @transform_4(%arg0: i32) -> (i32, i32, i32) {
    %c0_i32 = arith.constant 0 : i32
    %c0_i32_0 = arith.constant 0 : i32
    %c0_i32_1 = arith.constant 0 : i32
    %c0_i32_2 = arith.constant 0 : i32
    return %c0_i32, %c0_i32_0, %c0_i32_1 : i32, i32, i32
  }
  func.func @transform_5(%arg0: i32) -> (i32, i32) {
    %c0_i32 = arith.constant 0 : i32
    %c0_i32_0 = arith.constant 0 : i32
    %c0_i32_1 = arith.constant 0 : i32
    return %c0_i32, %c0_i32_0 : i32, i32
  }
  func.func @transform_6(%arg0: i32) -> (i32, i32, i32) {
    %c0_i32 = arith.constant 0 : i32
    %c0_i32_0 = arith.constant 0 : i32
    %c0_i32_1 = arith.constant 0 : i32
    %c0_i32_2 = arith.constant 0 : i32
    return %c0_i32, %c0_i32_0, %c0_i32_1 : i32, i32, i32
  }
  func.func @transform_7(%arg0: i32) -> (i32, i32, i32) {
    %c0_i32 = arith.constant 0 : i32
    %c0_i32_0 = arith.constant 0 : i32
    %c0_i32_1 = arith.constant 0 : i32
    %c0_i32_2 = arith.constant 0 : i32
    return %c0_i32, %c0_i32_0, %c0_i32_1 : i32, i32, i32
  }
  func.func @transform_8(%arg0: i32) -> (i32, i32, i32) {
    %c0_i32 = arith.constant 0 : i32
    %c0_i32_0 = arith.constant 0 : i32
    %c0_i32_1 = arith.constant 0 : i32
    %c0_i32_2 = arith.constant 0 : i32
    return %c0_i32, %c0_i32_0, %c0_i32_1 : i32, i32, i32
  }
  func.func @transform_9(%arg0: i32) -> (i32, i32, i32) {
    %c0_i32 = arith.constant 0 : i32
    %c0_i32_0 = arith.constant 0 : i32
    %c0_i32_1 = arith.constant 0 : i32
    %c0_i32_2 = arith.constant 0 : i32
    return %c0_i32, %c0_i32_0, %c0_i32_1 : i32, i32, i32
  }
  func.func @transform_10(%arg0: i32) -> (i32, i32, i32) {
    %c0_i32 = arith.constant 0 : i32
    %c0_i32_0 = arith.constant 0 : i32
    %c0_i32_1 = arith.constant 0 : i32
    %c0_i32_2 = arith.constant 0 : i32
    return %c0_i32, %c0_i32_0, %c0_i32_1 : i32, i32, i32
  }
  func.func @transform_11(%arg0: i32) -> (i32, i32, i32) {
    %c0_i32 = arith.constant 0 : i32
    %c0_i32_0 = arith.constant 0 : i32
    %c0_i32_1 = arith.constant 0 : i32
    %c0_i32_2 = arith.constant 0 : i32
    return %c0_i32, %c0_i32_0, %c0_i32_1 : i32, i32, i32
  }
}

</mosaic_0001>

<bundles_post_ra>
// kernel: pretrained_encoder_forward.1
= control target key start
LH: loop header
LB: loop body
LE: loop exit
PB: predicated region body
PF: predicated region fallthrough
CT: control target
= control target key end

     0   :  { %16 = vsyncpa [#allocation3], 0  ;;  %s11772_s0 = inlined_call_operand.vmem [shape: f32[64,2], index: 0, kind: input, shape index: {}]   ;;  %s11773_s1 = inlined_call_operand.hbm [shape: f32[4,32], index: 1, kind: input, shape index: {}]   ;;  %s11774_s2 = inlined_call_operand.vmem [shape: f32[4,32,32], index: 2, kind: input, shape index: {}]   ;;  %s11775_s3 = inlined_call_operand.hbm [shape: f32[32,32], index: 3, kind: input, shape index: {}]   ;;  %s11776_s4 = inlined_call_operand.vmem [shape: f32[4,32,32], index: 4, kind: input, shape index: {}]   ;;  %s11777_s5 = inlined_call_operand.vmem [shape: f32[8,32], index: 5, kind: input, shape index: {}]   ;;  %s11778_s6 = inlined_call_operand.hbm [shape: f32[2,32,96], index: 6, kind: input, shape index: {}]   ;;  %s11779_s7 = inlined_call_operand.hbm [shape: f32[2,32,128], index: 7, kind: input, shape index: {}]   ;;  %s11780_s8 = inlined_call_operand.hbm [shape: f32[2,32,64], index: 8, kind: input, shape index: {}]   ;;  %s11781_s9 = inlined_call_operand.vmem [shape: f32[2,64,32], index: 9, kind: input, shape index: {}]   ;;  %s11782_s10 = inlined_call_operand.hbm [shape: f32[2,8,96], index: 10, kind: input, shape index: {}]   ;;  %s11783_s11 = inlined_call_operand.vmem [shape: f32[2,14,32], index: 11, kind: output, shape index: {}]  }
   0x1   :  { %17 = vsyncpa [#allocation5], 0 }
   0x2   :  { %18 = vsyncpa [#allocation8], 0 }
   0x3   :  { %19 = vsyncpa [#allocation11], 0  ;;  %s9814_s17 = smov [#allocation4]  }
   0x4   :  { %s39_s18 = sshll.u32 %s9814_s17, 4  ;;  %s40_s18 = int_to_ptr.vmem [resolvable:$true] %s39_s18 }
   0x5   :  { %s9694_s19 = scalar_lea.vmem %s40_s18, 512  ;;  %p9699_p1 = scmp.lt.s32.totalorder %s40_s18, %s40_s18 }
   0x6   :  { %p9695_p0 = scmp.ne.s32.totalorder %s40_s18, %s9694_s19  ;;  %p9700_p2 = scmp.lt.s32.totalorder %s9694_s19, %s9694_s19 }
   0x8   :  { %p9701_p3 = por %p9700_p2, %p9699_p1 }
   0xa   :  { %p9702_p4 = pnand %p9701_p3, %p9695_p0 }
   0xc   :  { %9705 = shalt.err (!%p9702_p4)
}
   0xd   :  { %s9815_s20 = smov 128   ;;  %s9816_s21 = smov 8  }
   0xe   :  { %45 = dma.hbm_to_vmem [thread:$0]  %s11775_s3, 512, %s40_s18, [#allocation5], %s9815_s20, %s9815_s20, %s9816_s21  }
   0xf   :  { %s9817_s24 = smov [#allocation7]   ;;  %s9818_s26 = smov [#allocation2]  }
  0x10   :  { %s67_s25 = sshll.u32 %s9817_s24, 4  ;;  %s28_s27 = sshll.u32 %s9818_s26, 4  ;;  %s68_s25 = int_to_ptr.vmem [resolvable:$true] %s67_s25  ;;  %s29_s27 = int_to_ptr.vmem [resolvable:$true] %s28_s27 }
  0x11   :  { %s9714_s28 = scalar_lea.vmem %s68_s25, 1024  ;;  %p9719_p6 = scmp.lt.s32.totalorder %s68_s25, %s68_s25 }
  0x12   :  { %p9715_p5 = scmp.ne.s32.totalorder %s68_s25, %s9714_s28  ;;  %p9720_p7 = scmp.lt.s32.totalorder %s9714_s28, %s9714_s28 }
  0x14   :  { %p9721_p8 = por %p9720_p7, %p9719_p6 }
  0x16   :  { %p9722_p9 = pnand %p9721_p8, %p9715_p5 }
  0x18   :  { %9725 = shalt.err (!%p9722_p9)
}
  0x19   :  { %73 = dma.hbm_to_vmem [thread:$0]  %s11779_s7, 1024, %s68_s25, [#allocation8], %s9815_s20, %s9815_s20, %s9816_s21  }
  0x1a   :  { %s9734_s3 = scalar_lea.vmem %s29_s27, 64  ;;  %p9739_p11 = scmp.lt.s32.totalorder %s29_s27, %s29_s27 }
  0x1b   :  { %p9735_p10 = scmp.ne.s32.totalorder %s29_s27, %s9734_s3  ;;  %p9740_p12 = scmp.lt.s32.totalorder %s9734_s3, %s9734_s3 }
  0x1d   :  { %p9741_p13 = por %p9740_p12, %p9739_p11 }
  0x1f   :  { %p9742_p0 = pnand %p9741_p13, %p9735_p10 }
  0x21   :  { %9745 = shalt.err (!%p9742_p0)
}
  0x22   :  { %31 = dma.hbm_to_vmem [thread:$0]  %s11773_s1, 64, %s29_s27, [#allocation3]  }
  0x23   :  { %s9819_s14 = smov [#allocation6]   ;;  %s9820_s16 = smov [#allocation9]  }
  0x24   :  { %s55_s15 = sshll.u32 %s9819_s14, 4  ;;  %s79_s17 = sshll.u32 %s9820_s16, 4  ;;  %s56_s15 = int_to_ptr.vmem [resolvable:$true] %s55_s15  ;;  %s80_s17 = int_to_ptr.vmem [resolvable:$true] %s79_s17 }
  0x25   :  { %s9754_s18 = scalar_lea.vmem %s56_s15, 1024  ;;  %p9759_p2 = scmp.lt.s32.totalorder %s56_s15, %s56_s15 }
  0x26   :  { %p9755_p1 = scmp.ne.s32.totalorder %s56_s15, %s9754_s18  ;;  %p9760_p3 = scmp.lt.s32.totalorder %s9754_s18, %s9754_s18 }
  0x28   :  { %p9761_p4 = por %p9760_p3, %p9759_p2 }
  0x2a   :  { %p9762_p5 = pnand %p9761_p4, %p9755_p1 }
  0x2c   :  { %9765 = shalt.err (!%p9762_p5)
}
  0x2d   :  { %61 = dma.hbm_to_vmem [thread:$0]  %s11778_s6, 1024, %s56_s15, [#allocation5], %s9815_s20, %s9815_s20, %s9816_s21  }
  0x2e   :  { %s9774_s1 = scalar_lea.vmem %s80_s17, 1024  ;;  %p9779_p7 = scmp.lt.s32.totalorder %s80_s17, %s80_s17 }
  0x2f   :  { %p9775_p6 = scmp.ne.s32.totalorder %s80_s17, %s9774_s1  ;;  %p9780_p8 = scmp.lt.s32.totalorder %s9774_s1, %s9774_s1 }
  0x31   :  { %p9781_p9 = por %p9780_p8, %p9779_p7 }
  0x33   :  { %p9782_p10 = pnand %p9781_p9, %p9775_p6 }
  0x35   :  { %9785 = shalt.err (!%p9782_p10)
}
  0x36   :  { %85 = dma.hbm_to_vmem [thread:$0]  %s11780_s8, 1024, %s80_s17, [#allocation8], %s9815_s20, %s9815_s20, %s9816_s21  }
  0x37   :  { %s9821_s24 = smov [#allocation10]  }
  0x38   :  { %s93_s25 = sshll.u32 %s9821_s24, 4  ;;  %s94_s25 = int_to_ptr.vmem [resolvable:$true] %s93_s25 }
  0x39   :  { %s9794_s26 = scalar_lea.vmem %s94_s25, 256  ;;  %p9799_p12 = scmp.lt.s32.totalorder %s94_s25, %s94_s25 }
  0x3a   :  { %p9795_p11 = scmp.ne.s32.totalorder %s94_s25, %s9794_s26  ;;  %p9800_p13 = scmp.lt.s32.totalorder %s9794_s26, %s9794_s26 }
  0x3c   :  { %p9801_p0 = por %p9800_p13, %p9799_p12 }
  0x3e   :  { %p9802_p1 = pnand %p9801_p0, %p9795_p11 }
  0x40   :  { %9805 = shalt.err (!%p9802_p1)
}
  0x41   :  { %99 = dma.hbm_to_vmem [thread:$0]  %s11782_s10, 256, %s94_s25, [#allocation11], %s9815_s20, %s9815_s20, %s9816_s21  }
  0x42   :  { %9806 = dma.done.wait [#allocation3], 64  }
  0x43   :  { %9807 = vsyncadd [#allocation3], 4294967232 }
  0x44   :  { %9808 = dma.done.wait [#allocation5], 1536  }
  0x45   :  { %9809 = vsyncadd [#allocation5], 4294965760 }
  0x46   :  { %9810 = dma.done.wait [#allocation8], 2048  }
  0x47   :  { %9811 = vsyncadd [#allocation8], 4294965248 }
  0x48   :  { %9812 = dma.done.wait [#allocation11], 256  }
  0x49   :  { %9813 = vsyncadd [#allocation11], 4294967040  ;;  %v164_v0 = vlaneseq  ;;  %v9822_v1 = vmov 0   ;;  %v9932_v3 = vld [vmem:[%s11772_s0 + $0x38] sm:$0xff]  ;;  %v9937_v4 = vld [vmem:[%s11772_s0 + $0x30] sm:$0xff]  ;;  %v11784_v19 = vmov 0.0  }
  0x4a   :  { %9452 = vset.pattern.permute.xlu1 %v9822_v1  ;;  %9451 = vset.pattern.permute.xlu0 %v9822_v1  ;;  %v9947_v6 = vld [vmem:[%s11772_s0 + $0x28] sm:$0xff]  ;;  %v9959_v8 = vld [vmem:[%s11772_s0 + $0x20] sm:$0xff]  ;;  %v9970_v10 = vld [vmem:[%s11772_s0 + $0x18] sm:$0xff]  ;;  %vm187_vm4 = vcmask 523264   ;;  %s9826_s20 = smov 88   ;;  %s9827_s21 = smov 96  }
  0x4b   :  { %v9927_v2 = vshrl.u32 %v164_v0, 7  ;;  %8689 = vmatprep.subr.mxu0 %v9932_v3  ;;  %8711 = vmatprep.subr.mxu1 %v9932_v3  ;;  %v9972_v11 = vand.u32 127, %v164_v0  ;;  %v9982_v13 = vld [vmem:[%s11772_s0 + $0x10] sm:$0xff]  ;;  %v9993_v16 = vld [vmem:[%s11772_s0 + $0x8] sm:$0xff]  ;;  %v10006_v18 = vld [vmem:[%s11772_s0] sm:$0xff]  ;;  %s9828_s29 = smov 120  }
  0x4c   :  { %8690 = vmatpush3.msra.mxu0 %v9932_v3  ;;  %8712 = vmatpush3.msra.mxu1 %v9932_v3  ;;  %s9829_s30 = smov 80   ;;  %s9830_s3 = smov 112  }
  0x4d   :  { %v166_v5 = vadd.s32 8, %v9927_v2  ;;  %8691 = vmatprep.subr.mxu0 %v9937_v4  ;;  %8713 = vmatprep.subr.mxu1 %v9937_v4  ;;  %v9952_v7 = vmul.u32 2, %v9927_v2  ;;  %v167_v15 = vadd.s32 16, %v9927_v2  ;;  %v168_v17 = vadd.s32 24, %v9927_v2  ;;  %s9831_s12 = smov 72   ;;  %s9832_s13 = smov 104  }
  0x4e   :  { %8692 = vmatpush3.msra.mxu0 %v9937_v4  ;;  %8714 = vmatpush3.msra.mxu1 %v9937_v4  ;;  %s9833_s14 = smov 32  }
  0x4f   :  { %v9961_v9 = vmul.u32 2, %v166_v5  ;;  %8693 = vmatprep.subr.mxu0 %v9947_v6  ;;  %8715 = vmatprep.subr.mxu1 %v9947_v6  ;;  %v285_v12 = vadd.s32 1, %v9952_v7  ;;  %vm175_vm0 = vcmp.eq.s32.totalorder %v9972_v11, %v9952_v7  ;;  %v173_v21 = vmul.u32 2, %v167_v15 }
  0x50   :  { %8694 = vmatpush3.msra.mxu0 %v9947_v6  ;;  %8716 = vmatpush3.msra.mxu1 %v9947_v6  ;;  %v10014_v20 = vsel %vm175_vm0, 1.0, %v11784_v19  ;;  %v174_v25 = vmul.u32 2, %v168_v17  ;;  %v398_v32 = vadd.s32 2, %v9952_v7  ;;  %v511_v33 = vadd.s32 3, %v9952_v7 }
  0x51   :  { %8695 = vmatprep.subr.mxu0 %v9959_v8  ;;  %8717 = vmatprep.subr.mxu1 %v9959_v8  ;;  %v286_v14 = vadd.s32 1, %v9961_v9  ;;  %vm289_vm1 = vcmp.eq.s32.totalorder %v9972_v11, %v285_v12  ;;  %vm176_vm2 = vcmp.eq.s32.totalorder %v9972_v11, %v9961_v9  ;;  %v287_v26 = vadd.s32 1, %v173_v21 }
  0x52   :  { %8696 = vmatpush3.msra.mxu0 %v9959_v8  ;;  %8718 = vmatpush3.msra.mxu1 %v9959_v8  ;;  %v10019_v22 = vsel %vm289_vm1, 1.0, %v11784_v19  ;;  %v10024_v23 = vsel %vm176_vm2, 1.0, %v11784_v19  ;;  %vm177_vm5 = vcmp.eq.s32.totalorder %v9972_v11, %v173_v21  ;;  %vm178_vm6 = vcmp.eq.s32.totalorder %v9972_v11, %v174_v25 }
  0x53   :  { %8697 = vmatprep.subr.mxu0 %v9970_v10  ;;  %8719 = vmatprep.subr.mxu1 %v9970_v10  ;;  %vm290_vm3 = vcmp.eq.s32.totalorder %v9972_v11, %v286_v14  ;;  %v288_v27 = vadd.s32 1, %v174_v25  ;;  %v8032_v28 = vsel %vm177_vm5, 1.0, %v11784_v19  ;;  %vm291_vm7 = vcmp.eq.s32.totalorder %v9972_v11, %v287_v26 }
  0x54   :  { %8698 = vmatpush3.msra.mxu0 %v9970_v10  ;;  %8720 = vmatpush3.msra.mxu1 %v9970_v10  ;;  %v10027_v24 = vsel %vm290_vm3, 1.0, %v11784_v19  ;;  %v8033_v29 = vsel %vm178_vm6, 1.0, %v11784_v19  ;;  %v8040_v30 = vsel %vm291_vm7, 1.0, %v11784_v19  ;;  %v399_v34 = vadd.s32 2, %v9961_v9 }
  0x55   :  { %8699 = vmatprep.subr.mxu0 %v9982_v13  ;;  %8721 = vmatprep.subr.mxu1 %v9982_v13  ;;  %vm292_vm8 = vcmp.eq.s32.totalorder %v9972_v11, %v288_v27  ;;  %v512_v35 = vadd.s32 3, %v9961_v9  ;;  %v400_v36 = vadd.s32 2, %v173_v21  ;;  %v513_v37 = vadd.s32 3, %v173_v21  ;;  %v126_v9 = vld [vmem:[#allocation2] sm:$0xf] }
  0x56   :  { %8700 = vmatpush3.msra.mxu0 %v9982_v13  ;;  %8722 = vmatpush3.msra.mxu1 %v9982_v13  ;;  %v8041_v31 = vsel %vm292_vm8, 1.0, %v11784_v19  ;;  %vm402_vm9 = vcmp.eq.s32.totalorder %v9972_v11, %v398_v32  ;;  %vm515_vm10 = vcmp.eq.s32.totalorder %v9972_v11, %v511_v33  ;;  %vm403_vm11 = vcmp.eq.s32.totalorder %v9972_v11, %v399_v34 }
  0x57   :  { %8701 = vmatprep.subr.mxu0 %v9993_v16  ;;  %8723 = vmatprep.subr.mxu1 %v9993_v16  ;;  %vm516_vm12 = vcmp.eq.s32.totalorder %v9972_v11, %v512_v35  ;;  %v401_v38 = vadd.s32 2, %v174_v25  ;;  %v514_v39 = vadd.s32 3, %v174_v25  ;;  %v10086_v40 = vsel %vm402_vm9, 1.0, %v11784_v19 }
  0x58   :  { %8702 = vmatpush3.msra.mxu0 %v9993_v16  ;;  %8724 = vmatpush3.msra.mxu1 %v9993_v16  ;;  %11805 = vst [vmem:[#allocation16_spill] sm:$0xff] %v10086_v40  ;;  %vm404_vm13 = vcmp.eq.s32.totalorder %v9972_v11, %v400_v36  ;;  %vm517_vm14 = vcmp.eq.s32.totalorder %v9972_v11, %v513_v37  ;;  %v10093_v41 = vsel %vm515_vm10, 1.0, %v11784_v19  ;;  %v10098_v42 = vsel %vm403_vm11, 1.0, %v11784_v19 }
  0x59   :  { %8703 = vmatprep.subr.mxu0 %v10006_v18  ;;  %8725 = vmatprep.subr.mxu1 %v10006_v18  ;;  %11806 = vst [vmem:[#allocation17_spill] sm:$0xff] %v10093_v41  ;;  %11807 = vst [vmem:[#allocation18_spill] sm:$0xff] %v10098_v42  ;;  %v10101_v43 = vsel %vm516_vm12, 1.0, %v11784_v19  ;;  %v8048_v44 = vsel %vm404_vm13, 1.0, %v11784_v19  ;;  %vm405_vm15 = vcmp.eq.s32.totalorder %v9972_v11, %v401_v38  ;;  %v8056_v45 = vsel %vm517_vm14, 1.0, %v11784_v19 }
  0x5a   :  { %8704 = vmatpush3.msra.mxu0 %v10006_v18  ;;  %8705 = vmatprep.mubr.msk.f32.mxu0 %vm187_vm4, %v10014_v20  ;;  %11808 = vst [vmem:[#allocation19_spill] sm:$0xff] %v10101_v43  ;;  %vm518_vm0 = vcmp.eq.s32.totalorder %v9972_v11, %v514_v39  ;;  %v8049_v46 = vsel %vm405_vm15, 1.0, %v11784_v19  ;;  %vm845_vm1 = vcmask 252928   ;;  %v10172_v7 = vsub.s32 1, %v9927_v2 }
  0x5b   :  { %8726 = vmatpush3.msra.mxu1 %v10006_v18  ;;  %8727 = vmatprep.mubr.msk.f32.mxu1 %vm187_vm4, %v10019_v22  ;;  %v8057_v47 = vsel %vm518_vm0, 1.0, %v11784_v19  ;;  %v10182_v12 = vsub.s32 2, %v9927_v2  ;;  %vm748_vm2 = vcmask 261120   ;;  %vm754_vm3 = vcmask 260096  }
  0x5c   :  { %8706 = vmatmul.mubr.msk.f32.vlgmr.msra.gmra.mxu0 %vm187_vm4, %v10024_v23  ;;  %8728 = vmatmul.mubr.msk.f32.vlgmr.msra.gmra.mxu1 %vm187_vm4, %v10027_v24  ;;  %11809 = vst [vmem:[#allocation20_spill] sm:$0xff] %v10172_v7  ;;  %vm850_vm5 = vcmask 1046528   ;;  %vm1515_vm6 = vcmask 259072   ;;  %vm1639_vm7 = vcmask 1041408   ;;  %vm1816_vm8 = vcmask 1045504  }
  0x5d   :  { %8733 = vmatprep.subr.mxu0 %v9932_v3  ;;  %8755 = vmatprep.subr.mxu1 %v9932_v3  ;;  %v10191_v15 = vrot.slane %v126_v9, %v10182_v12  ;;  %vm1902_vm9 = vcmask 1044480   ;;  %vm3585_vm10 = vcmask 64512   ;;  %vm3675_vm11 = vcmask 111616  }
  0x5e   :  { %8734 = vmatpush3.msra.mxu0 %v9932_v3  ;;  %8756 = vmatpush3.msra.mxu1 %v9932_v3  ;;  %vm3671_vm12 = vcmask 113664   ;;  %vm5317_vm13 = vcmask 257024  }
  0x5f   :  { %8735 = vmatprep.subr.mxu0 %v9937_v4  ;;  %8757 = vmatprep.subr.mxu1 %v9937_v4 }
  0x60   :  { %8736 = vmatpush3.msra.mxu0 %v9937_v4  ;;  %8758 = vmatpush3.msra.mxu1 %v9937_v4 }
  0x61   :  { %8737 = vmatprep.subr.mxu0 %v9947_v6  ;;  %8759 = vmatprep.subr.mxu1 %v9947_v6 }
  0x62   :  { %8708 = vmatprep.mubr.msk.f32.mxu0 %vm187_vm4, %v8032_v28  ;;  %8738 = vmatpush3.msra.mxu0 %v9947_v6 }
  0x63   :  { %8760 = vmatpush3.msra.mxu1 %v9947_v6  ;;  %8709 = vmatmul.mubr.msk.f32.gmra.mxu0 %vm187_vm4, %v8033_v29 }
  0x64   :  { %8739 = vmatprep.subr.mxu0 %v9959_v8  ;;  %8761 = vmatprep.subr.mxu1 %v9959_v8 }
  0x65   :  { %8730 = vmatprep.mubr.msk.f32.mxu1 %vm187_vm4, %v8040_v30  ;;  %8740 = vmatpush3.msra.mxu0 %v9959_v8 }
  0x66   :  { %8762 = vmatpush3.msra.mxu1 %v9959_v8  ;;  %8741 = vmatprep.subr.mxu0 %v9970_v10  ;;  %v10175_v8 = vsub.s32 0, %v9927_v2 }
  0x67   :  { %8731 = vmatmul.mubr.msk.f32.gmra.mxu1 %vm187_vm4, %v8041_v31  ;;  %8763 = vmatprep.subr.mxu1 %v9970_v10 }
  0x68   :  { %8742 = vmatpush3.msra.mxu0 %v9970_v10  ;;  %8764 = vmatpush3.msra.mxu1 %v9970_v10  ;;  %11810 = vst [vmem:[#allocation21_spill] sm:$0xff] %v10175_v8  ;;  %v10188_v14 = vrot.slane %v126_v9, %v10175_v8 }
  0x69   :  { %8743 = vmatprep.subr.mxu0 %v9982_v13  ;;  %8765 = vmatprep.subr.mxu1 %v9982_v13 }
  0x6a   :  { %8744 = vmatpush3.msra.mxu0 %v9982_v13  ;;  %8766 = vmatpush3.msra.mxu1 %v9982_v13  ;;  %v10185_v13 = vrot.slane %v126_v9, %v10172_v7 }
  0x6b   :  { %8745 = vmatprep.subr.mxu0 %v9993_v16  ;;  %8767 = vmatprep.subr.mxu1 %v9993_v16 }
  0x6c   :  { %8746 = vmatpush3.msra.mxu0 %v9993_v16  ;;  %8768 = vmatpush3.msra.mxu1 %v9993_v16  ;;  %v10194_v16 = vsub.s32 3, %v9927_v2 }
  0x6d   :  { %8747 = vmatprep.subr.mxu0 %v10006_v18  ;;  %8769 = vmatprep.subr.mxu1 %v10006_v18 }
  0x6e   :  { %8748 = vmatpush3.msra.mxu0 %v10006_v18  ;;  %8749 = vmatprep.mubr.msk.f32.mxu0 %vm187_vm4, %v10086_v40  ;;  %v10202_v33 = vrot.slane %v126_v9, %v10194_v16 }
  0x6f   :  { %8770 = vmatpush3.msra.mxu1 %v10006_v18  ;;  %8771 = vmatprep.mubr.msk.f32.mxu1 %vm187_vm4, %v10093_v41 }
  0x70   :  { %8750 = vmatmul.mubr.msk.f32.vlgmr.msra.gmra.mxu0 %vm187_vm4, %v10098_v42  ;;  %8772 = vmatmul.mubr.msk.f32.vlgmr.msra.gmra.mxu1 %vm187_vm4, %v10101_v43 }
  0x71   :  { %8752 = vmatprep.mubr.msk.f32.mxu0 %vm187_vm4, %v8048_v44  ;;  %8774 = vmatprep.mubr.msk.f32.mxu1 %vm187_vm4, %v8056_v45 }
  0x74   :  { %8753 = vmatmul.mubr.msk.f32.gmra.mxu0 %vm187_vm4, %v8049_v46  ;;  %8775 = vmatmul.mubr.msk.f32.gmra.mxu1 %vm187_vm4, %v8057_v47 }
  0x75   :  { %8785 = vmatprep.mubr.msk.f32.mxu0 %vm845_vm1, %v10014_v20  ;;  %8796 = vmatprep.mubr.msk.f32.mxu1 %vm845_vm1, %v10019_v22 }
 0x11c   :  { %v10123_v48 = vpop.f32.mrf.mxu0  ;;  %v10125_v49 = vpop.f32.mrf.mxu1 }
 0x11d   :  { %659 = vperm.xlu1 %9452, %v10125_v49   ;;  %631 = vperm.xlu0 %9451, %v10123_v48  }
 0x11e   :  { %v10129_v50 = vpop.f32.mrf.mxu0  ;;  %v10131_v51 = vpop.f32.mrf.mxu1 }
 0x121   :  { %654 = vperm.xlu1 %9452, %v10131_v51   ;;  %626 = vperm.xlu0 %9451, %v10129_v50  }
 0x123   :  { %v10135_v52 = vpop.f32.mrf.mxu0 }
 0x125   :  { %641 = vperm.xlu0 %9451, %v10135_v52   ;;  %v10140_v54 = vpop.f32.mrf.mxu0 }
 0x127   :  { %v10138_v53 = vpop.f32.mrf.mxu1 }
 0x128   :  { %669 = vperm.xlu1 %9452, %v10138_v53  }
 0x129   :  { %636 = vperm.xlu0 %9451, %v10140_v54   ;;  %v10144_v55 = vpop.f32.mrf.mxu1 }
 0x12c   :  { %664 = vperm.xlu1 %9452, %v10144_v55  }
 0x130   :  { %v10147_v56 = vpop.f32.mrf.mxu0  ;;  %v10149_v57 = vpop.f32.mrf.mxu1 }
 0x131   :  { %723 = vperm.xlu0 %9451, %v10149_v57   ;;  %691 = vperm.xlu1 %9452, %v10147_v56  }
 0x132   :  { %v10153_v58 = vpop.f32.mrf.mxu0  ;;  %v10155_v59 = vpop.f32.mrf.mxu1 }
 0x134   :  { %v10157_v60 = vpop.f32.mrf.mxu0  ;;  %v10163_v62 = vpop.f32.mrf.mxu1 }
 0x135   :  { %718 = vperm.xlu1 %9452, %v10155_v59   ;;  %686 = vperm.xlu0 %9451, %v10153_v58  }
 0x136   :  { %v10161_v61 = vpop.f32.mrf.mxu0  ;;  %v10167_v63 = vpop.f32.mrf.mxu1 }
 0x139   :  { %701 = vperm.xlu1 %9452, %v10157_v60   ;;  %696 = vperm.xlu0 %9451, %v10161_v61  }
 0x13d   :  { %733 = vperm.xlu1 %9452, %v10163_v62   ;;  %728 = vperm.xlu0 %9451, %v10167_v63  }
 0x198   :  { %v660_v0 = vpop.permute.xlu1 %659  ;;  %v632_v1 = vpop.permute.xlu0 %631 }
 0x199   :  { %v677_v21 = vmul.f32 %v10185_v13, %v660_v0  ;;  %v649_v25 = vmul.f32 %v10188_v14, %v632_v1 }
 0x19b   :  { %v681_v31 = vadd.f32 %v677_v21, %v649_v25 }
 0x19c   :  { %v627_v3 = vpop.permute.xlu0 %626  ;;  %v655_v4 = vpop.permute.xlu1 %654 }
 0x19d   :  { %v676_v26 = vmul.f32 %v10185_v13, %v655_v4  ;;  %v648_v27 = vmul.f32 %v10188_v14, %v627_v3 }
 0x19f   :  { %v680_v32 = vadd.f32 %v676_v26, %v648_v27 }
 0x1a0   :  { %v642_v5 = vpop.permute.xlu0 %641 }
 0x1a1   :  { %v651_v36 = vmul.f32 %v10188_v14, %v642_v5 }
 0x1a3   :  { %v670_v6 = vpop.permute.xlu1 %669 }
 0x1a4   :  { %v637_v10 = vpop.permute.xlu0 %636  ;;  %v679_v35 = vmul.f32 %v10185_v13, %v670_v6 }
 0x1a5   :  { %v650_v37 = vmul.f32 %v10188_v14, %v637_v10 }
 0x1a6   :  { %v683_v6 = vadd.f32 %v679_v35, %v651_v36 }
 0x1a7   :  { %v665_v11 = vpop.permute.xlu1 %664 }
 0x1a8   :  { %v678_v38 = vmul.f32 %v10185_v13, %v665_v11 }
 0x1aa   :  { %v682_v9 = vadd.f32 %v678_v38, %v650_v37 }
 0x1ac   :  { %v724_v17 = vpop.permute.xlu0 %723  ;;  %v692_v18 = vpop.permute.xlu1 %691 }
 0x1ad   :  { %v709_v28 = vmul.f32 %v10191_v15, %v692_v18  ;;  %v741_v0 = vmul.f32 %v10202_v33, %v724_v17 }
 0x1af   :  { %v713_v39 = vadd.f32 %v709_v28, %v681_v31 }
 0x1b0   :  { %v719_v29 = vpop.permute.xlu1 %718  ;;  %v687_v30 = vpop.permute.xlu0 %686 }
 0x1b1   :  { %v708_v34 = vmul.f32 %v10191_v15, %v687_v30  ;;  %v740_v44 = vmul.f32 %v10202_v33, %v719_v29  ;;  %v745_v5 = vadd.f32 %v741_v0, %v713_v39 }
 0x1b3   :  { %v712_v45 = vadd.f32 %v708_v34, %v680_v32  ;;  %v750_v17 = vsel %vm748_vm2, %v745_v5, 0.0 }
 0x1b4   :  { %v702_v46 = vpop.permute.xlu1 %701  ;;  %v697_v47 = vpop.permute.xlu0 %696 }
 0x1b5   :  { %v744_v1 = vadd.f32 %v740_v44, %v712_v45  ;;  %v711_v3 = vmul.f32 %v10191_v15, %v702_v46  ;;  %v710_v4 = vmul.f32 %v10191_v15, %v697_v47 }
 0x1b7   :  { %v749_v10 = vsel %vm748_vm2, %v744_v1, 0.0  ;;  %v715_v21 = vadd.f32 %v711_v3, %v683_v6  ;;  %v714_v25 = vadd.f32 %v710_v4, %v682_v9 }
 0x1b8   :  { %v734_v11 = vpop.permute.xlu1 %733  ;;  %v729_v18 = vpop.permute.xlu0 %728  ;;  %v751_v30 = vadd.f32 %v750_v17, %v749_v10 }
 0x1b9   :  { %v743_v26 = vmul.f32 %v10202_v33, %v734_v11  ;;  %v742_v27 = vmul.f32 %v10202_v33, %v729_v18 }
 0x1bb   :  { %v747_v28 = vadd.f32 %v743_v26, %v715_v21  ;;  %v746_v29 = vadd.f32 %v742_v27, %v714_v25 }
 0x1bd   :  { %v752_v31 = vsel %vm748_vm2, %v746_v29, 0.0  ;;  %v755_v34 = vsel %vm754_vm3, %v747_v28, 0.0 }
 0x1be   :  { %v753_v32 = vadd.f32 %v752_v31, %v751_v30 }
 0x1c0   :  { %v756_v35 = vadd.f32 %v755_v34, %v753_v32 }
 0x1c2   :  { %v757_v36 = vrot.slane %v756_v35, 4 }
 0x1c4   :  { %v758_v37 = vadd.f32 %v757_v36, %v756_v35  ;;  %v10226_v36 = vld [vmem:[%s11777_s5] sm:$0xff] }
 0x1c6   :  { %v759_v38 = vrot.slane %v758_v37, 2 }
 0x1c8   :  { %v760_v39 = vadd.f32 %v759_v38, %v758_v37  ;;  %v10230_v37 = vrot.slane %v10226_v36, %v10175_v8 }
 0x1ca   :  { %v761_v44 = vrot.slane %v760_v39, 1 }
 0x1cc   :  { %v762_v45 = vadd.f32 %v761_v44, %v760_v39  ;;  %v10234_v39 = vrot.slane %v10226_v36, %v10172_v7 }
 0x1ce   :  { %v764_v46 = vmul.f32 0.032258064, %v762_v45 }
 0x1d0   :  { %v765_v47 = vsub.f32 %v744_v1, %v764_v46  ;;  %v766_v0 = vsub.f32 %v745_v5, %v764_v46  ;;  %v767_v3 = vsub.f32 %v746_v29, %v764_v46  ;;  %v768_v4 = vsub.f32 %v747_v28, %v764_v46 }
 0x1d2   :  { %v769_v6 = vmul.f32 %v765_v47, %v765_v47  ;;  %v770_v9 = vmul.f32 %v766_v0, %v766_v0  ;;  %v771_v10 = vmul.f32 %v767_v3, %v767_v3  ;;  %v772_v11 = vmul.f32 %v768_v4, %v768_v4 }
 0x1d4   :  { %v773_v18 = vsel %vm748_vm2, %v769_v6, 0.0  ;;  %v774_v21 = vsel %vm748_vm2, %v770_v9, 0.0  ;;  %v776_v26 = vsel %vm748_vm2, %v771_v10, 0.0  ;;  %v778_v17 = vsel %vm754_vm3, %v772_v11, 0.0 }
 0x1d5   :  { %v775_v25 = vadd.f32 %v774_v21, %v773_v18 }
 0x1d7   :  { %v777_v27 = vadd.f32 %v776_v26, %v775_v25 }
 0x1d9   :  { %v779_v30 = vadd.f32 %v778_v17, %v777_v27 }
 0x1db   :  { %v780_v31 = vrot.slane %v779_v30, 4 }
 0x1dd   :  { %v781_v1 = vadd.f32 %v780_v31, %v779_v30 }
 0x1df   :  { %v782_v5 = vrot.slane %v781_v1, 2 }
 0x1e1   :  { %v783_v29 = vadd.f32 %v782_v5, %v781_v1 }
 0x1e3   :  { %v784_v28 = vrot.slane %v783_v29, 1 }
 0x1e5   :  { %v785_v32 = vadd.f32 %v784_v28, %v783_v29 }
 0x1e7   :  { %v786_v34 = vmul.f32 0.032258064, %v785_v32 }
 0x1e9   :  { %v787_v35 = vadd.f32 1e-05, %v786_v34 }
 0x1eb   :  { %9455 = vrsqrt.f32 %v787_v35 }
 0x1f8   :  { %v9456_v38 = vpop.eup %9455 }
 0x1f9   :  { %v789_v44 = vmul.f32 %v9456_v38, %v765_v47  ;;  %v790_v45 = vmul.f32 %v9456_v38, %v766_v0  ;;  %v791_v46 = vmul.f32 %v9456_v38, %v767_v3  ;;  %v792_v6 = vmul.f32 %v9456_v38, %v768_v4 }
 0x1fb   :  { %v797_v9 = vmul.f32 %v10230_v37, %v789_v44  ;;  %v798_v10 = vmul.f32 %v10230_v37, %v790_v45  ;;  %v799_v11 = vmul.f32 %v10230_v37, %v791_v46  ;;  %v800_v18 = vmul.f32 %v10230_v37, %v792_v6 }
 0x1fd   :  { %v805_v21 = vadd.f32 %v10234_v39, %v797_v9  ;;  %v806_v25 = vadd.f32 %v10234_v39, %v798_v10  ;;  %v807_v26 = vadd.f32 %v10234_v39, %v799_v11  ;;  %v808_v27 = vadd.f32 %v10234_v39, %v800_v18 }
 0x1ff   :  { %v813_v47 = vmul.f32 0.044715, %v805_v21  ;;  %v814_v0 = vmul.f32 0.044715, %v806_v25  ;;  %v815_v3 = vmul.f32 0.044715, %v807_v26 }
 0x200   :  { %v816_v4 = vmul.f32 0.044715, %v808_v27 }
 0x201   :  { %v817_v17 = vmul.f32 %v813_v47, %v805_v21  ;;  %v818_v30 = vmul.f32 %v814_v0, %v806_v25  ;;  %v819_v31 = vmul.f32 %v815_v3, %v807_v26  ;;  %v812_v0 = vmul.f32 0.5, %v808_v27 }
 0x202   :  { %v820_v1 = vmul.f32 %v816_v4, %v808_v27 }
 0x203   :  { %v821_v5 = vmul.f32 %v817_v17, %v805_v21  ;;  %v822_v29 = vmul.f32 %v818_v30, %v806_v25  ;;  %v823_v28 = vmul.f32 %v819_v31, %v807_v26  ;;  %v811_v17 = vmul.f32 0.5, %v807_v26 }
 0x204   :  { %v824_v32 = vmul.f32 %v820_v1, %v808_v27 }
 0x205   :  { %v825_v34 = vadd.f32 %v821_v5, %v805_v21  ;;  %v826_v35 = vadd.f32 %v822_v29, %v806_v25  ;;  %v827_v38 = vadd.f32 %v823_v28, %v807_v26  ;;  %v810_v5 = vmul.f32 0.5, %v806_v25  ;;  %v10263_v28 = vld [vmem:[%s11774_s2 + $0x38] sm:$0xff] }
 0x206   :  { %v828_v44 = vadd.f32 %v824_v32, %v808_v27  ;;  %v809_v27 = vmul.f32 0.5, %v805_v21  ;;  %v10268_v21 = vld [vmem:[%s11774_s2 + $0x18] sm:$0xff]  ;;  %v10277_v32 = vld [vmem:[%s11774_s2 + $0x30] sm:$0xff] }
 0x207   :  { %v830_v45 = vmul.f32 0.7978846, %v826_v35  ;;  %v831_v46 = vmul.f32 0.7978846, %v827_v38  ;;  %v829_v9 = vmul.f32 0.7978846, %v825_v34 }
 0x208   :  { %v832_v6 = vmul.f32 0.7978846, %v828_v44  ;;  %v10282_v34 = vld [vmem:[%s11774_s2 + $0x10] sm:$0xff]  ;;  %v10290_v35 = vld [vmem:[%s11774_s2 + $0x28] sm:$0xff]  ;;  %v10299_v38 = vld [vmem:[%s11774_s2 + $0x20] sm:$0xff] }
 0x209   :  { %9457 = vtanh.f32 %v830_v45  ;;  %v10311_v44 = vld [vmem:[%s11774_s2 + $0x8] sm:$0xff]  ;;  %v10318_v45 = vld [vmem:[%s11774_s2] sm:$0xff] }
 0x20a   :  { %9459 = vtanh.f32 %v831_v46 }
 0x20b   :  { %9461 = vtanh.f32 %v832_v6 }
 0x20c   :  { %9463 = vtanh.f32 %v829_v9 }
 0x216   :  { %v9458_v10 = vpop.eup %9457 }
 0x217   :  { %v9460_v11 = vpop.eup %9459  ;;  %v838_v31 = vadd.f32 1.0, %v9458_v10 }
 0x218   :  { %v9462_v18 = vpop.eup %9461  ;;  %v839_v47 = vadd.f32 1.0, %v9460_v11  ;;  %v10347_v11 = vld [vmem:[%s11774_s2 + $0x58] sm:$0xff] }
 0x219   :  { %v840_v3 = vadd.f32 1.0, %v9462_v18  ;;  %v9464_v4 = vpop.eup %9463  ;;  %v842_v26 = vmul.f32 %v838_v31, %v810_v5  ;;  %v10352_v18 = vld [vmem:[%s11774_s2 + $0x50] sm:$0xff]  ;;  %v10389_v5 = vld [vmem:[%s11774_s2 + $0x68] sm:$0xff] }
 0x21a   :  { %v10246_v1 = vmul.f32 %v839_v47, %v811_v17  ;;  %v837_v29 = vadd.f32 1.0, %v9464_v4  ;;  %v10361_v47 = vld [vmem:[%s11774_s2 + $0x48] sm:$0xff]  ;;  %11815 = vst [vmem:[#allocation26_spill] sm:$0xff] %v10389_v5 }
 0x21b   :  { %v10244_v30 = vmul.f32 %v840_v3, %v812_v0  ;;  %11811 = vst [vmem:[#allocation22_spill] sm:$0xff] %v10361_v47  ;;  %v10368_v0 = vld [vmem:[%s11774_s2 + $0x40] sm:$0xff]  ;;  %v10375_v3 = vld [vmem:[%s11774_s2 + $0x78] sm:$0xff] }
 0x21c   :  { %v841_v25 = vmul.f32 %v837_v29, %v809_v27  ;;  %11812 = vst [vmem:[#allocation23_spill] sm:$0xff] %v10368_v0  ;;  %11813 = vst [vmem:[#allocation24_spill] sm:$0xff] %v10375_v3  ;;  %v10396_v29 = vld [vmem:[%s11774_s2 + $0x60] sm:$0xff] }
 0x21d   :  { %8777 = vmatprep.subr.msk.mxu0 %vm850_vm5, %v10244_v30  ;;  %8788 = vmatprep.subr.msk.mxu1 %vm850_vm5, %v10244_v30  ;;  %11816 = vst [vmem:[#allocation27_spill] sm:$0xff] %v10396_v29 }
 0x21e   :  { %8778 = vmatpush3.msk.msra.mxu0 %vm850_vm5, %v10244_v30  ;;  %8789 = vmatpush3.msk.msra.mxu1 %vm850_vm5, %v10244_v30 }
 0x21f   :  { %8779 = vmatprep.subr.mxu0 %v10246_v1  ;;  %8790 = vmatprep.subr.mxu1 %v10246_v1 }
 0x220   :  { %8780 = vmatpush3.msra.mxu0 %v10246_v1  ;;  %8791 = vmatpush3.msra.mxu1 %v10246_v1 }
 0x221   :  { %8781 = vmatprep.subr.mxu0 %v842_v26  ;;  %8792 = vmatprep.subr.mxu1 %v842_v26 }
 0x222   :  { %8782 = vmatpush3.msra.mxu0 %v842_v26  ;;  %8793 = vmatpush3.msra.mxu1 %v842_v26 }
 0x223   :  { %8783 = vmatprep.subr.mxu0 %v841_v25  ;;  %8794 = vmatprep.subr.mxu1 %v841_v25 }
 0x224   :  { %8784 = vmatpush3.msra.mxu0 %v841_v25  ;;  %8795 = vmatpush3.msra.mxu1 %v841_v25 }
 0x225   :  { %8786 = vmatmul.mubr.msk.f32.vlgmr.msra.gmra.mxu0 %vm845_vm1, %v10024_v23  ;;  %8797 = vmatmul.mubr.msk.f32.vlgmr.msra.gmra.mxu1 %vm845_vm1, %v10027_v24 }
 0x226   :  { %8799 = vmatprep.subr.mxu0 %v10263_v28  ;;  %8810 = vmatprep.subr.mxu1 %v10268_v21 }
 0x227   :  { %8800 = vmatpush3.msra.mxu0 %v10263_v28  ;;  %8811 = vmatpush3.msra.mxu1 %v10268_v21 }
 0x228   :  { %8801 = vmatprep.subr.mxu0 %v10277_v32  ;;  %8812 = vmatprep.subr.mxu1 %v10282_v34 }
 0x229   :  { %8802 = vmatpush3.msra.mxu0 %v10277_v32  ;;  %8813 = vmatpush3.msra.mxu1 %v10282_v34 }
 0x22a   :  { %8803 = vmatprep.subr.mxu0 %v10290_v35  ;;  %8814 = vmatprep.subr.mxu1 %v10311_v44 }
 0x22b   :  { %8804 = vmatpush3.msra.mxu0 %v10290_v35  ;;  %8815 = vmatpush3.msra.mxu1 %v10311_v44 }
 0x22c   :  { %8805 = vmatprep.subr.mxu0 %v10299_v38  ;;  %8816 = vmatprep.subr.mxu1 %v10318_v45 }
 0x22d   :  { %8806 = vmatpush3.msra.mxu0 %v10299_v38  ;;  %8817 = vmatpush3.msra.mxu1 %v10318_v45 }
 0x22e   :  { %8821 = vmatprep.subr.msk.mxu0 %vm850_vm5, %v10244_v30  ;;  %8832 = vmatprep.subr.mxu1 %v10347_v11 }
 0x2e5   :  { %v8787_v46 = vpop.f32.mrf.mxu0  ;;  %v8798_v6 = vpop.f32.mrf.mxu1 }
 0x2e7   :  { %v920_v9 = vpop.f32.mrf.mxu0  ;;  %v999_v10 = vpop.f32.mrf.mxu1 }
 0x2e8   :  { %8807 = vmatprep.mubr.msk.f32.mxu0 %vm748_vm2, %v999_v10  ;;  %8818 = vmatprep.mubr.msk.f32.mxu1 %vm748_vm2, %v920_v9 }
 0x2e9   :  { %8808 = vmatmul.mubr.msk.f32.vlgmr.msra.gmra.mxu0 %vm748_vm2, %v8798_v6  ;;  %8819 = vmatmul.mubr.msk.f32.vlgmr.msra.gmra.mxu1 %vm748_vm2, %v8787_v46 }
 0x2ea   :  { %8822 = vmatpush3.msk.msra.mxu0 %vm850_vm5, %v10244_v30  ;;  %8829 = vmatprep.mubr.msk.f32.mxu0 %vm845_vm1, %v10086_v40 }
 0x2eb   :  { %8823 = vmatprep.subr.mxu0 %v10246_v1  ;;  %8833 = vmatpush3.msra.mxu1 %v10347_v11 }
 0x2ec   :  { %8824 = vmatpush3.msra.mxu0 %v10246_v1  ;;  %8834 = vmatprep.subr.mxu1 %v10352_v18 }
 0x2ed   :  { %8825 = vmatprep.subr.mxu0 %v842_v26  ;;  %8835 = vmatpush3.msra.mxu1 %v10352_v18 }
 0x2ee   :  { %8826 = vmatpush3.msra.mxu0 %v842_v26  ;;  %8836 = vmatprep.subr.mxu1 %v10361_v47 }
 0x2ef   :  { %8827 = vmatprep.subr.mxu0 %v841_v25  ;;  %8837 = vmatpush3.msra.mxu1 %v10361_v47 }
 0x2f0   :  { %8828 = vmatpush3.msra.mxu0 %v841_v25  ;;  %8838 = vmatprep.subr.mxu1 %v10368_v0 }
 0x2f1   :  { %8830 = vmatmul.mubr.msk.f32.vlgmr.msra.gmra.mxu0 %vm845_vm1, %v10098_v42  ;;  %8843 = vmatprep.subr.msk.mxu0 %vm850_vm5, %v10244_v30 }
 0x2f2   :  { %8844 = vmatpush3.msk.msra.mxu0 %vm850_vm5, %v10244_v30  ;;  %8851 = vmatprep.mubr.msk.f32.mxu0 %vm845_vm1, %v10093_v41 }
 0x2f3   :  { %8845 = vmatprep.subr.mxu0 %v10246_v1  ;;  %8839 = vmatpush3.msra.mxu1 %v10368_v0 }
 0x2f4   :  { %8846 = vmatpush3.msra.mxu0 %v10246_v1  ;;  %8854 = vmatprep.subr.mxu1 %v10375_v3  ;;  %v10382_v1 = vld [vmem:[%s11774_s2 + $0x70] sm:$0xff] }
 0x2f5   :  { %8847 = vmatprep.subr.mxu0 %v842_v26  ;;  %11814 = vst [vmem:[#allocation25_spill] sm:$0xff] %v10382_v1 }
 0x2f6   :  { %8848 = vmatpush3.msra.mxu0 %v842_v26 }
 0x2f7   :  { %8849 = vmatprep.subr.mxu0 %v841_v25 }
 0x2f8   :  { %8850 = vmatpush3.msra.mxu0 %v841_v25  ;;  %v9824_v25 = vmov 1  }
 0x2f9   :  { %8852 = vmatmul.mubr.msk.f32.vlgmr.msra.gmra.mxu0 %vm845_vm1, %v10101_v43  ;;  %9453 = vset.pattern.permute.xlu1 %v9824_v25 }
 0x2fa   :  { %9454 = vset.pattern.permute.xlu0 %v9824_v25 }
 0x3a9   :  { %v8809_v4 = vpop.f32.mrf.mxu0  ;;  %v8820_v46 = vpop.f32.mrf.mxu1 }
 0x3aa   :  { %v1167_v10 = vadd.f32 %v8820_v46, %v8809_v4 }
 0x3ab   :  { %v1080_v17 = vpop.f32.mrf.mxu0  ;;  %v1161_v6 = vpop.f32.mrf.mxu1 }
 0x3b1   :  { %v8831_v30 = vpop.f32.mrf.mxu0 }
 0x3b3   :  { %v1240_v31 = vpop.f32.mrf.mxu0 }
 0x3b4   :  { %8840 = vmatprep.mubr.msk.f32.mxu1 %vm748_vm2, %v1240_v31  ;;  %v1162_v31 = vadd.f32 %v1161_v6, %v1080_v17 }
 0x3b5   :  { %8841 = vmatmul.mubr.msk.f32.vlgmr.msra.gmra.mxu1 %vm748_vm2, %v8831_v30 }
 0x3b6   :  { %8855 = vmatpush3.msra.mxu1 %v10375_v3 }
 0x3b7   :  { %8856 = vmatprep.subr.mxu1 %v10382_v1 }
 0x3b8   :  { %8857 = vmatpush3.msra.mxu1 %v10382_v1 }
 0x3b9   :  { %v8853_v26 = vpop.f32.mrf.mxu0  ;;  %8858 = vmatprep.subr.mxu1 %v10389_v5 }
 0x3ba   :  { %8859 = vmatpush3.msra.mxu1 %v10389_v5 }
 0x3bb   :  { %v1402_v27 = vpop.f32.mrf.mxu0  ;;  %8860 = vmatprep.subr.mxu1 %v10396_v29 }
 0x3bc   :  { %8861 = vmatpush3.msra.mxu1 %v10396_v29  ;;  %8862 = vmatprep.mubr.msk.f32.mxu1 %vm748_vm2, %v1402_v27 }
 0x3bd   :  { %8863 = vmatmul.mubr.msk.f32.vlgmr.msra.gmra.mxu1 %vm748_vm2, %v8853_v26 }
 0x475   :  { %v8842_v9 = vpop.f32.mrf.mxu1 }
 0x476   :  { %v1331_v19 = vadd.f32 %v8842_v9, %v1167_v10  ;;  %v10442_v10 = vrot.slane %v10226_v36, %v10182_v12 }
 0x477   :  { %v1321_v30 = vpop.f32.mrf.mxu1 }
 0x478   :  { %v1330_v8 = vadd.f32 %v1321_v30, %v1162_v31 }
 0x47d   :  { %v8864_v7 = vpop.f32.mrf.mxu1 }
 0x47e   :  { %v1493_v5 = vadd.f32 %v8864_v7, %v1331_v19 }
 0x47f   :  { %v1483_v1 = vpop.f32.mrf.mxu1 }
 0x480   :  { %v1497_v43 = vmul.f32 0.044715, %v1493_v5  ;;  %v1492_v29 = vadd.f32 %v1483_v1, %v1330_v8  ;;  %v1495_v17 = vmul.f32 0.5, %v1493_v5 }
 0x482   :  { %v1496_v41 = vmul.f32 0.044715, %v1492_v29  ;;  %v1499_v27 = vmul.f32 %v1497_v43, %v1493_v5  ;;  %v1494_v7 = vmul.f32 0.5, %v1492_v29 }
 0x484   :  { %v1501_v42 = vmul.f32 %v1499_v27, %v1493_v5  ;;  %v1498_v26 = vmul.f32 %v1496_v41, %v1492_v29 }
 0x486   :  { %v1503_v3 = vadd.f32 %v1501_v42, %v1493_v5  ;;  %v1500_v0 = vmul.f32 %v1498_v26, %v1492_v29 }
 0x488   :  { %v1505_v25 = vmul.f32 0.7978846, %v1503_v3  ;;  %v1502_v47 = vadd.f32 %v1500_v0, %v1492_v29 }
 0x48a   :  { %9465 = vtanh.f32 %v1505_v25  ;;  %v1504_v40 = vmul.f32 0.7978846, %v1502_v47 }
 0x48c   :  { %9467 = vtanh.f32 %v1504_v40 }
 0x497   :  { %v9466_v4 = vpop.eup %9465 }
 0x498   :  { %v1509_v46 = vadd.f32 1.0, %v9466_v4 }
 0x499   :  { %v9468_v6 = vpop.eup %9467 }
 0x49a   :  { %v1511_v19 = vmul.f32 %v1509_v46, %v1495_v17  ;;  %v1508_v9 = vadd.f32 1.0, %v9468_v6 }
 0x49c   :  { %v1516_v8 = vsel %vm1515_vm6, %v1511_v19, 0.0  ;;  %v1510_v43 = vmul.f32 %v1508_v9, %v1494_v7 }
 0x49d   :  { %1517 = vadd.xlane.f32.xlu1 %v1516_v8 }
 0x49e   :  { %v1512_v41 = vsel %vm748_vm2, %v1510_v43, 0.0 }
 0x49f   :  { %1513 = vadd.xlane.f32.xlu0 %v1512_v41 }
 0x4ae   :  { %2048 = vperm.xlu1 %9453, %v10129_v50  }
 0x4b2   :  { %2068 = vperm.xlu1 %9453, %v10131_v51  }
 0x4b6   :  { %2072 = vperm.xlu1 %9453, %v10125_v49  }
 0x4ba   :  { %2056 = vperm.xlu1 %9453, %v10140_v54  }
 0x4be   :  { %2076 = vperm.xlu1 %9453, %v10144_v55  }
 0x4c2   :  { %2092 = vperm.xlu1 %9453, %v10153_v58  }
 0x4c6   :  { %2096 = vperm.xlu1 %9453, %v10147_v56  }
 0x4ca   :  { %2060 = vperm.xlu1 %9453, %v10135_v52  }
 0x4ce   :  { %2080 = vperm.xlu1 %9453, %v10138_v53   ;;  %v10421_v53 = vld [vmem:[#allocation4 + $0x18] sm:$0xff] }
 0x4cf   :  { %8865 = vmatprep.subr.mxu0 %v10421_v53 }
 0x4d0   :  { %8866 = vmatpush3.msra.mxu0 %v10421_v53 }
 0x4d2   :  { %2116 = vperm.xlu1 %9453, %v10155_v59   ;;  %v10426_v59 = vld [vmem:[#allocation4 + $0x10] sm:$0xff] }
 0x4d3   :  { %8867 = vmatprep.subr.mxu0 %v10426_v59 }
 0x4d4   :  { %8868 = vmatpush3.msra.mxu0 %v10426_v59 }
 0x4d6   :  { %2104 = vperm.xlu1 %9453, %v10157_v60   ;;  %v10431_v60 = vld [vmem:[#allocation4 + $0x8] sm:$0xff] }
 0x4d7   :  { %8869 = vmatprep.subr.mxu0 %v10431_v60 }
 0x4d8   :  { %8870 = vmatpush3.msra.mxu0 %v10431_v60 }
 0x4da   :  { %2128 = vperm.xlu1 %9453, %v10163_v62  }
 0x526   :  { %v1518_v40 = vpop.xlane.xlu1 %1517 }
 0x527   :  { %v1521_v42 = vmul.f32 0.03125, %v1518_v40 }
 0x528   :  { %v1514_v49 = vpop.xlane.xlu0 %1513 }
 0x529   :  { %v1520_v50 = vmul.f32 0.03125, %v1514_v49  ;;  %v1523_v51 = vsub.f32 %v1511_v19, %v1521_v42 }
 0x52a   :  { %v2049_v3 = vpop.permute.xlu1 %2048 }
 0x52b   :  { %v1522_v54 = vsub.f32 %v1510_v43, %v1520_v50  ;;  %v1525_v56 = vmul.f32 %v1523_v51, %v1523_v51 }
 0x52d   :  { %v1524_v55 = vmul.f32 %v1522_v54, %v1522_v54  ;;  %v1529_v52 = vsel %vm1515_vm6, %v1525_v56, 0.0  ;;  %v2063_v56 = vmul.f32 %v2049_v3, %v10188_v14 }
 0x52e   :  { %v2069_v5 = vpop.permute.xlu1 %2068 }
 0x52f   :  { %v1526_v58 = vsel %vm748_vm2, %v1524_v55, 0.0 }
 0x530   :  { %1527 = vadd.xlane.f32.xlu0 %v1526_v58 }
 0x532   :  { %v2073_v29 = vpop.permute.xlu1 %2072 }
 0x534   :  { %1530 = vadd.xlane.f32.xlu0 %v1529_v52 }
 0x536   :  { %v2057_v25 = vpop.permute.xlu1 %2056 }
 0x537   :  { %v2065_v52 = vmul.f32 %v2057_v25, %v10188_v14 }
 0x53a   :  { %v2077_v19 = vpop.permute.xlu1 %2076 }
 0x53b   :  { %v2085_v55 = vmul.f32 %v2077_v19, %v10185_v13 }
 0x53e   :  { %v2093_v7 = vpop.permute.xlu1 %2092 }
 0x542   :  { %v2097_v9 = vpop.permute.xlu1 %2096 }
 0x546   :  { %v2061_v8 = vpop.permute.xlu1 %2060 }
 0x54a   :  { %2052 = vperm.xlu0 %9454, %v10123_v48   ;;  %v10435_v48 = vld [vmem:[#allocation4] sm:$0xff]  ;;  %v2081_v41 = vpop.permute.xlu1 %2080 }
 0x54b   :  { %8871 = vmatprep.subr.mxu0 %v10435_v48 }
 0x54c   :  { %8872 = vmatpush3.msra.mxu0 %v10435_v48 }
 0x54e   :  { %2100 = vperm.xlu0 %9454, %v10161_v61   ;;  %v2117_v42 = vpop.permute.xlu1 %2116 }
 0x552   :  { %2120 = vperm.xlu0 %9454, %v10149_v57  }
 0x556   :  { %2124 = vperm.xlu0 %9454, %v10167_v63   ;;  %v10446_v63 = vrot.slane %v10226_v36, %v10194_v16 }
 0x5b9   :  { %v1528_v61 = vpop.xlane.xlu0 %1527 }
 0x5ba   :  { %v1532_v62 = vmul.f32 0.03125, %v1528_v61  ;;  %v2105_v61 = vpop.permute.xlu1 %2104 }
 0x5bb   :  { %v2110_v19 = vmul.f32 %v2105_v61, %v10191_v15  ;;  %v10504_v61 = vld [vmem:[%s11776_s4 + $0x30] sm:$0xff] }
 0x5bc   :  { %v1534_v47 = vadd.f32 1e-05, %v1532_v62 }
 0x5bd   :  { %v1531_v0 = vpop.xlane.xlu0 %1530 }
 0x5be   :  { %9469 = vrsqrt.f32 %v1534_v47  ;;  %v1533_v57 = vmul.f32 0.03125, %v1531_v0  ;;  %v2107_v47 = vmul.f32 %v2093_v7, %v10191_v15  ;;  %v2108_v0 = vmul.f32 %v2097_v9, %v10191_v15 }
 0x5c0   :  { %v1535_v1 = vadd.f32 1e-05, %v1533_v57 }
 0x5c2   :  { %9471 = vrsqrt.f32 %v1535_v1 }
 0x5c5   :  { %v2053_v43 = vpop.permute.xlu0 %2052 }
 0x5c6   :  { %v2064_v50 = vmul.f32 %v2053_v43, %v10188_v14 }
 0x5c9   :  { %v2101_v40 = vpop.permute.xlu0 %2100 }
 0x5ca   :  { %v2109_v57 = vmul.f32 %v2101_v40, %v10191_v15  ;;  %v10477_v15 = vld [vmem:[%s11776_s4 + $0x18] sm:$0xff] }
 0x5cb   :  { %v9470_v30 = vpop.eup %9469  ;;  %8876 = vmatprep.subr.mxu1 %v10477_v15 }
 0x5cc   :  { %v1538_v31 = vmul.f32 %v9470_v30, %v1522_v54  ;;  %v2083_v54 = vmul.f32 %v2069_v5, %v10185_v13  ;;  %v2089_v30 = vadd.f32 %v2085_v55, %v2065_v52  ;;  %v2131_v5 = vmul.f32 %v2117_v42, %v10202_v33  ;;  %8877 = vmatpush3.msra.mxu1 %v10477_v15  ;;  %v10497_v52 = vld [vmem:[%s11776_s4 + $0x8] sm:$0xff] }
 0x5cd   :  { %v2121_v49 = vpop.permute.xlu0 %2120 }
 0x5ce   :  { %v1544_v27 = vmul.f32 %v10442_v10, %v1538_v31  ;;  %v2132_v1 = vmul.f32 %v2121_v49, %v10202_v33  ;;  %v2113_v25 = vadd.f32 %v2109_v57, %v2089_v30  ;;  %v10525_v57 = vld [vmem:[%s11776_s4 + $0x58] sm:$0xff] }
 0x5cf   :  { %v9472_v26 = vpop.eup %9471  ;;  %v10539_v30 = vld [vmem:[%s11776_s4 + $0x78] sm:$0xff] }
 0x5d0   :  { %v1550_v4 = vadd.f32 %v10446_v63, %v1544_v27  ;;  %v1539_v17 = vmul.f32 %v9472_v26, %v1523_v51  ;;  %v2084_v51 = vmul.f32 %v2073_v29, %v10185_v13  ;;  %v2087_v29 = vadd.f32 %v2083_v54, %v2063_v56  ;;  %v10490_v56 = vld [vmem:[%s11776_s4 + $0x38] sm:$0xff] }
 0x5d1   :  { %v2125_v62 = vpop.permute.xlu0 %2124  ;;  %v2086_v26 = vmul.f32 %v2081_v41, %v10185_v13  ;;  %8887 = vmatprep.subr.mxu0 %v10490_v56 }
 0x5d2   :  { %8873 = vmatprep.mubr.msk.f32.mxu0 %vm748_vm2, %v1550_v4  ;;  %v1545_v46 = vmul.f32 %v10442_v10, %v1539_v17  ;;  %v2088_v58 = vadd.f32 %v2084_v51, %v2064_v50  ;;  %v2133_v27 = vmul.f32 %v2125_v62, %v10202_v33  ;;  %v2111_v3 = vadd.f32 %v2107_v47, %v2087_v29  ;;  %v2129_v17 = vpop.permute.xlu1 %2128  ;;  %v10509_v62 = vld [vmem:[%s11776_s4] sm:$0xff]  ;;  %v10514_v47 = vld [vmem:[%s11776_s4 + $0x28] sm:$0xff] }
 0x5d3   :  { %v2134_v43 = vmul.f32 %v2129_v17, %v10202_v33 }
 0x5d4   :  { %v1551_v6 = vadd.f32 %v10446_v63, %v1545_v46  ;;  %v2112_v31 = vadd.f32 %v2108_v0, %v2088_v58  ;;  %v2066_v46 = vmul.f32 %v2061_v8, %v10188_v14  ;;  %v2137_v7 = vadd.f32 %v2133_v27, %v2113_v25  ;;  %v10484_v58 = vld [vmem:[%s11776_s4 + $0x10] sm:$0xff] }
 0x5d5   :  { %8878 = vmatprep.subr.mxu1 %v10484_v58 }
 0x5d6   :  { %8874 = vmatmul.mubr.msk.f32.vlgmr.msra.gmra.mxu0 %vm748_vm2, %v1551_v6  ;;  %v2136_v4 = vadd.f32 %v2132_v1, %v2112_v31  ;;  %v2135_v6 = vadd.f32 %v2131_v5, %v2111_v3  ;;  %v2090_v9 = vadd.f32 %v2086_v26, %v2066_v46  ;;  %v2142_v50 = vsel %vm748_vm2, %v2137_v7, 0.0  ;;  %8879 = vmatpush3.msra.mxu1 %v10484_v58  ;;  %v10532_v1 = vld [vmem:[%s11776_s4 + $0x20] sm:$0xff] }
 0x5d7   :  { %8880 = vmatprep.subr.mxu1 %v10497_v52  ;;  %8888 = vmatpush3.msra.mxu0 %v10490_v56 }
 0x5d8   :  { %v2140_v40 = vsel %vm748_vm2, %v2136_v4, 0.0  ;;  %v2139_v42 = vsel %vm748_vm2, %v2135_v6, 0.0  ;;  %v2114_v49 = vadd.f32 %v2110_v19, %v2090_v9  ;;  %8881 = vmatpush3.msra.mxu1 %v10497_v52  ;;  %8889 = vmatprep.subr.mxu0 %v10504_v61 }
 0x5d9   :  { %v2141_v13 = vadd.f32 %v2140_v40, %v2139_v42  ;;  %8882 = vmatprep.subr.mxu1 %v10509_v62  ;;  %8890 = vmatpush3.msra.mxu0 %v10504_v61 }
 0x5da   :  { %v2138_v41 = vadd.f32 %v2134_v43, %v2114_v49  ;;  %8883 = vmatpush3.msra.mxu1 %v10509_v62  ;;  %8891 = vmatprep.subr.mxu0 %v10514_v47 }
 0x5db   :  { %v2143_v51 = vadd.f32 %v2142_v50, %v2141_v13  ;;  %8892 = vmatpush3.msra.mxu0 %v10514_v47  ;;  %8898 = vmatprep.subr.mxu1 %v10525_v57 }
 0x5dc   :  { %v2144_v54 = vsel %vm754_vm3, %v2138_v41, 0.0  ;;  %8893 = vmatprep.subr.mxu0 %v10532_v1 }
 0x5dd   :  { %v2145_v14 = vadd.f32 %v2144_v54, %v2143_v51  ;;  %8894 = vmatpush3.msra.mxu0 %v10532_v1 }
 0x5de   :  { %8909 = vmatprep.subr.mxu0 %v10539_v30 }
 0x5df   :  { %v2146_v8 = vrot.slane %v2145_v14, 4 }
 0x5e1   :  { %v2147_v55 = vadd.f32 %v2146_v8, %v2145_v14 }
 0x5e3   :  { %v2148_v33 = vrot.slane %v2147_v55, 2 }
 0x5e5   :  { %v2149_v0 = vadd.f32 %v2148_v33, %v2147_v55 }
 0x5e7   :  { %v2150_v29 = vrot.slane %v2149_v0, 1 }
 0x5e9   :  { %v2151_v5 = vadd.f32 %v2150_v29, %v2149_v0 }
 0x5eb   :  { %v2152_v31 = vmul.f32 0.032258064, %v2151_v5 }
 0x5ed   :  { %v2153_v27 = vsub.f32 %v2135_v6, %v2152_v31  ;;  %v2154_v3 = vsub.f32 %v2136_v4, %v2152_v31  ;;  %v2155_v17 = vsub.f32 %v2137_v7, %v2152_v31  ;;  %v2156_v9 = vsub.f32 %v2138_v41, %v2152_v31 }
 0x5ef   :  { %v2157_v26 = vmul.f32 %v2153_v27, %v2153_v27  ;;  %v2158_v25 = vmul.f32 %v2154_v3, %v2154_v3  ;;  %v2159_v43 = vmul.f32 %v2155_v17, %v2155_v17  ;;  %v2160_v42 = vmul.f32 %v2156_v9, %v2156_v9 }
 0x5f1   :  { %v2161_v46 = vsel %vm748_vm2, %v2157_v26, 0.0  ;;  %v2162_v19 = vsel %vm748_vm2, %v2158_v25, 0.0  ;;  %v2164_v49 = vsel %vm748_vm2, %v2159_v43, 0.0  ;;  %v2166_v13 = vsel %vm754_vm3, %v2160_v42, 0.0 }
 0x5f2   :  { %v2163_v40 = vadd.f32 %v2162_v19, %v2161_v46 }
 0x5f4   :  { %v2165_v50 = vadd.f32 %v2164_v49, %v2163_v40 }
 0x5f6   :  { %v2167_v51 = vadd.f32 %v2166_v13, %v2165_v50 }
 0x5f8   :  { %v2168_v54 = vrot.slane %v2167_v51, 4 }
 0x5fa   :  { %v2169_v6 = vadd.f32 %v2168_v54, %v2167_v51 }
 0x5fc   :  { %v2170_v4 = vrot.slane %v2169_v6, 2 }
 0x5fe   :  { %v2171_v14 = vadd.f32 %v2170_v4, %v2169_v6 }
 0x600   :  { %v2172_v8 = vrot.slane %v2171_v14, 1 }
 0x602   :  { %v2173_v7 = vadd.f32 %v2172_v8, %v2171_v14 }
 0x604   :  { %v2174_v55 = vmul.f32 0.032258064, %v2173_v7 }
 0x606   :  { %v2175_v33 = vadd.f32 1e-05, %v2174_v55 }
 0x608   :  { %9473 = vrsqrt.f32 %v2175_v33  ;;  %v10578_v33 = vsub.s32 4, %v9927_v2 }
 0x615   :  { %v9474_v0 = vpop.eup %9473 }
 0x616   :  { %v2180_v41 = vmul.f32 %v9474_v0, %v2156_v9  ;;  %v2179_v29 = vmul.f32 %v9474_v0, %v2155_v17  ;;  %v2178_v5 = vmul.f32 %v9474_v0, %v2154_v3  ;;  %v2177_v26 = vmul.f32 %v9474_v0, %v2153_v27 }
 0x618   :  { %v2184_v31 = vmul.f32 %v2180_v41, %v10230_v37  ;;  %v2183_v25 = vmul.f32 %v2179_v29, %v10230_v37  ;;  %v2182_v46 = vmul.f32 %v2178_v5, %v10230_v37  ;;  %v2181_v43 = vmul.f32 %v2177_v26, %v10230_v37 }
 0x619   :  { %v10583_v5 = vrot.slane %v10226_v36, %v10578_v33 }
 0x61a   :  { %v10550_v19 = vadd.f32 %v2184_v31, %v10234_v39  ;;  %v10554_v40 = vadd.f32 %v2183_v25, %v10234_v39  ;;  %v10557_v42 = vadd.f32 %v2182_v46, %v10234_v39  ;;  %v10561_v17 = vadd.f32 %v2181_v43, %v10234_v39 }
 0x61c   :  { %v2196_v3 = vmul.f32 0.044715, %v10550_v19  ;;  %v2195_v27 = vmul.f32 0.044715, %v10554_v40  ;;  %v2194_v9 = vmul.f32 0.044715, %v10557_v42 }
 0x61d   :  { %v2193_v50 = vmul.f32 0.044715, %v10561_v17 }
 0x61e   :  { %v2200_v49 = vmul.f32 %v2196_v3, %v10550_v19  ;;  %v2199_v37 = vmul.f32 %v2195_v27, %v10554_v40  ;;  %v2198_v13 = vmul.f32 %v2194_v9, %v10557_v42 }
 0x61f   :  { %v2197_v54 = vmul.f32 %v2193_v50, %v10561_v17 }
 0x620   :  { %v2204_v51 = vmul.f32 %v2200_v49, %v10550_v19  ;;  %v2203_v6 = vmul.f32 %v2199_v37, %v10554_v40  ;;  %v2202_v39 = vmul.f32 %v2198_v13, %v10557_v42  ;;  %v10599_v37 = vld [vmem:[%s11776_s4 + $0x50] sm:$0xff] }
 0x621   :  { %v2201_v14 = vmul.f32 %v2197_v54, %v10561_v17 }
 0x622   :  { %v2208_v4 = vadd.f32 %v2204_v51, %v10550_v19  ;;  %v2207_v8 = vadd.f32 %v2203_v6, %v10554_v40  ;;  %v2206_v7 = vadd.f32 %v2202_v39, %v10557_v42 }
 0x623   :  { %v2205_v0 = vadd.f32 %v2201_v14, %v10561_v17 }
 0x624   :  { %v2212_v55 = vmul.f32 0.7978846, %v2208_v4  ;;  %v2211_v41 = vmul.f32 0.7978846, %v2207_v8  ;;  %v2210_v29 = vmul.f32 0.7978846, %v2206_v7 }
 0x625   :  { %v2209_v31 = vmul.f32 0.7978846, %v2205_v0  ;;  %v10607_v4 = vld [vmem:[%s11776_s4 + $0x48] sm:$0xff]  ;;  %v10624_v0 = vld [vmem:[%s11776_s4 + $0x40] sm:$0xff] }
 0x626   :  { %9475 = vtanh.f32 %v2212_v55  ;;  %v10617_v55 = vld [vmem:[%s11776_s4 + $0x70] sm:$0xff] }
 0x627   :  { %9477 = vtanh.f32 %v2211_v41 }
 0x628   :  { %9479 = vtanh.f32 %v2210_v29 }
 0x629   :  { %9481 = vtanh.f32 %v2209_v31 }
 0x633   :  { %v9476_v54 = vpop.eup %9475 }
 0x634   :  { %v9478_v7 = vpop.eup %9477  ;;  %v2220_v41 = vadd.f32 1.0, %v9476_v54 }
 0x635   :  { %v9480_v29 = vpop.eup %9479 }
 0x696   :  { %v8875_v26 = vpop.f32.mrf.mxu0 }
 0x697   :  { %v10586_v25 = vadd.f32 %v8875_v26, %v10583_v5  ;;  %v10632_v26 = vld [vmem:[%s11776_s4 + $0x68] sm:$0xff] }
 0x698   :  { %v1628_v46 = vpop.f32.mrf.mxu0 }
 0x699   :  { %v10589_v43 = vadd.f32 %v1628_v46, %v10583_v5  ;;  %v1641_v3 = vrot.slane %v10586_v25, 6  ;;  %v2219_v46 = vadd.f32 1.0, %v9478_v7 }
 0x69b   :  { %v1640_v27 = vrot.slane %v10589_v43, 6 }
 0x69d   :  { %v1644_v36 = vsel %vm1639_vm7, 0.0, %v1640_v27  ;;  %v1642_v9 = vsel %vm1639_vm7, %v1640_v27, %v1641_v3  ;;  %v2192_v3 = vmul.f32 0.5, %v10550_v19  ;;  %v9482_v27 = vpop.eup %9481 }
 0x69e   :  { %8884 = vmatprep.mubr.msk.f32.mxu1 %vm748_vm2, %v1644_v36  ;;  %v1732_v49 = vrot.slane %v1644_v36, 1  ;;  %v1817_v50 = vrot.slane %v1644_v36, 2  ;;  %v1733_v13 = vrot.slane %v1642_v9, 1  ;;  %v1818_v51 = vrot.slane %v1642_v9, 2 }
 0x69f   :  { %8885 = vmatmul.mubr.msk.f32.vlgmr.msra.gmra.mxu1 %vm748_vm2, %v1642_v9  ;;  %v1903_v6 = vrot.slane %v1644_v36, 3  ;;  %v1904_v14 = vrot.slane %v1642_v9, 3  ;;  %v10642_v36 = vld [vmem:[%s11776_s4 + $0x60] sm:$0xff]  ;;  %v11817_v9 = vmov 0.0   ;;  %v10650_v19 = vmul.f32 %v2220_v41, %v2192_v3 }
 0x6a0   :  { %8899 = vmatpush3.msra.mxu1 %v10525_v57  ;;  %v1734_v39 = vsel %vm850_vm5, %v1732_v49, %v1733_v13  ;;  %v1819_v8 = vsel %vm1816_vm8, %v1817_v50, %v1818_v51  ;;  %v10645_v49 = vrot.slane %v11817_v9, 3  ;;  %v2191_v50 = vmul.f32 0.5, %v10554_v40 }
 0x6a1   :  { %8900 = vmatprep.subr.mxu1 %v10599_v37  ;;  %8895 = vmatprep.mubr.msk.f32.mxu0 %vm748_vm2, %v1734_v39  ;;  %v1905_v31 = vsel %vm1902_vm9, %v1903_v6, %v1904_v14  ;;  %v2190_v40 = vmul.f32 0.5, %v10557_v42  ;;  %v2217_v6 = vadd.f32 1.0, %v9482_v27 }
 0x6a2   :  { %8901 = vmatpush3.msra.mxu1 %v10599_v37  ;;  %8906 = vmatprep.mubr.msk.f32.mxu1 %vm748_vm2, %v1819_v8  ;;  %v10654_v54 = vmul.f32 %v2219_v46, %v2191_v50  ;;  %v2189_v8 = vmul.f32 0.5, %v10561_v17 }
 0x6a3   :  { %8896 = vmatmul.mubr.msk.f32.vlgmr.msra.gmra.mxu0 %vm748_vm2, %v1733_v13  ;;  %8902 = vmatprep.subr.mxu1 %v10607_v4  ;;  %v2218_v13 = vadd.f32 1.0, %v9480_v29 }
 0x6a4   :  { %8910 = vmatpush3.msra.mxu0 %v10539_v30  ;;  %8903 = vmatpush3.msra.mxu1 %v10607_v4  ;;  %v10676_v42 = vmul.f32 %v2217_v6, %v2189_v8  ;;  %v11822_v6 = vld [vmem:[#allocation18_spill] sm:$0xff]  ;;  %v11824_v8 = vld [vmem:[#allocation19_spill] sm:$0xff] }
 0x6a5   :  { %8911 = vmatprep.subr.mxu0 %v10617_v55  ;;  %8917 = vmatprep.mubr.msk.f32.mxu0 %vm748_vm2, %v1905_v31  ;;  %v10667_v39 = vmul.f32 %v2218_v13, %v2190_v40  ;;  %v11818_v13 = vld [vmem:[#allocation16_spill] sm:$0xff]  ;;  %v11819_v40 = vld [vmem:[#allocation22_spill] sm:$0xff] }
 0x6a6   :  { %8904 = vmatprep.subr.mxu1 %v10624_v0  ;;  %8912 = vmatpush3.msra.mxu0 %v10617_v55 }
 0x6a7   :  { %8905 = vmatpush3.msra.mxu1 %v10624_v0  ;;  %8913 = vmatprep.subr.mxu0 %v10632_v26 }
 0x6a8   :  { %8907 = vmatmul.mubr.msk.f32.vlgmr.msra.gmra.mxu1 %vm748_vm2, %v1818_v51  ;;  %8914 = vmatpush3.msra.mxu0 %v10632_v26  ;;  %v1907_v51 = vsel %vm1902_vm9, %v1904_v14, %v10645_v49 }
 0x6a9   :  { %8920 = vmatprep.subr.msk.mxu1 %vm850_vm5, %v10650_v19  ;;  %8915 = vmatprep.subr.mxu0 %v10642_v36 }
 0x6aa   :  { %8921 = vmatpush3.msk.msra.mxu1 %vm850_vm5, %v10650_v19  ;;  %8916 = vmatpush3.msra.mxu0 %v10642_v36 }
 0x6ab   :  { %8922 = vmatprep.subr.mxu1 %v10654_v54  ;;  %8918 = vmatmul.mubr.msk.f32.vlgmr.msra.gmra.mxu0 %vm748_vm2, %v1907_v51  ;;  %v11823_v51 = vld [vmem:[#allocation17_spill] sm:$0xff] }
 0x6ac   :  { %8923 = vmatpush3.msra.mxu1 %v10654_v54  ;;  %8931 = vmatprep.subr.msk.mxu0 %vm850_vm5, %v10650_v19 }
 0x6ad   :  { %8924 = vmatprep.subr.mxu1 %v10667_v39  ;;  %8932 = vmatpush3.msk.msra.mxu0 %vm850_vm5, %v10650_v19 }
 0x6ae   :  { %8925 = vmatpush3.msra.mxu1 %v10667_v39  ;;  %8933 = vmatprep.subr.mxu0 %v10654_v54 }
 0x6af   :  { %8926 = vmatprep.subr.mxu1 %v10676_v42  ;;  %8934 = vmatpush3.msra.mxu0 %v10654_v54 }
 0x6b0   :  { %8927 = vmatpush3.msra.mxu1 %v10676_v42  ;;  %8935 = vmatprep.subr.mxu0 %v10667_v39 }
 0x6b1   :  { %8928 = vmatprep.mubr.msk.f32.mxu1 %vm845_vm1, %v10014_v20  ;;  %8936 = vmatpush3.msra.mxu0 %v10667_v39  ;;  %v10715_v20 = vsub.s32 5, %v9927_v2 }
 0x6b2   :  { %8942 = vmatprep.subr.mxu1 %v10263_v28  ;;  %8929 = vmatmul.mubr.msk.f32.vlgmr.msra.gmra.mxu1 %vm845_vm1, %v10024_v23 }
 0x6b3   :  { %8937 = vmatprep.subr.mxu0 %v10676_v42  ;;  %8943 = vmatpush3.msra.mxu1 %v10263_v28 }
 0x6b4   :  { %8938 = vmatpush3.msra.mxu0 %v10676_v42  ;;  %8939 = vmatprep.mubr.msk.f32.mxu0 %vm845_vm1, %v10019_v22  ;;  %v10720_v22 = vld [vmem:[%s11777_s5] sm:$0xff]  ;;  %s9825_s5 = smov 64  }
 0x6b5   :  { %8944 = vmatprep.subr.mxu1 %v10277_v32  ;;  %8940 = vmatmul.mubr.msk.f32.vlgmr.msra.gmra.mxu0 %vm845_vm1, %v10027_v24  ;;  %v10724_v23 = vrot.slane %v10720_v22, %v10715_v20 }
 0x6b6   :  { %8945 = vmatpush3.msra.mxu1 %v10277_v32  ;;  %8953 = vmatprep.subr.mxu0 %v10268_v21 }
 0x6b7   :  { %8946 = vmatprep.subr.mxu1 %v10290_v35  ;;  %8954 = vmatpush3.msra.mxu0 %v10268_v21 }
 0x6b8   :  { %8947 = vmatpush3.msra.mxu1 %v10290_v35  ;;  %8955 = vmatprep.subr.mxu0 %v10282_v34 }
 0x6b9   :  { %8948 = vmatprep.subr.mxu1 %v10299_v38  ;;  %8956 = vmatpush3.msra.mxu0 %v10282_v34 }
 0x6ba   :  { %8949 = vmatpush3.msra.mxu1 %v10299_v38  ;;  %8957 = vmatprep.subr.mxu0 %v10311_v44 }
 0x6bb   :  { %8964 = vmatprep.subr.msk.mxu1 %vm850_vm5, %v10650_v19  ;;  %8958 = vmatpush3.msra.mxu0 %v10311_v44 }
 0x6bc   :  { %8959 = vmatprep.subr.mxu0 %v10318_v45 }
 0x6bd   :  { %8960 = vmatpush3.msra.mxu0 %v10318_v45 }
 0x6be   :  { %8975 = vmatprep.subr.mxu0 %v10347_v11 }
 0x75f   :  { %v8886_v24 = vpop.f32.mrf.mxu1 }
 0x760   :  { %v1731_v28 = vadd.f32 %v8886_v24, %v10724_v23  ;;  %v11827_v24 = vld [vmem:[#allocation27_spill] sm:$0xff] }
 0x761   :  { %v1721_v21 = vpop.f32.mrf.mxu1 }
 0x762   :  { %v1730_v32 = vadd.f32 %v1721_v21, %v10724_v23 }
 0x763   :  { %v8897_v34 = vpop.f32.mrf.mxu0 }
 0x764   :  { %v1815_v35 = vadd.f32 %v8897_v34, %v1731_v28 }
 0x765   :  { %v1805_v38 = vpop.f32.mrf.mxu0 }
 0x766   :  { %v1814_v44 = vadd.f32 %v1805_v38, %v1730_v32 }
 0x768   :  { %v8908_v45 = vpop.f32.mrf.mxu1 }
 0x769   :  { %v1900_v17 = vadd.f32 %v8908_v45, %v1815_v35 }
 0x76a   :  { %v1890_v14 = vpop.f32.mrf.mxu1 }
 0x76b   :  { %v1899_v7 = vadd.f32 %v1890_v14, %v1814_v44  ;;  %v8919_v41 = vpop.f32.mrf.mxu0 }
 0x76c   :  { %v10728_v29 = vadd.f32 %v8919_v41, %v1900_v17 }
 0x76d   :  { %v1978_v31 = vpop.f32.mrf.mxu0 }
 0x76e   :  { %v10730_v46 = vadd.f32 %v1978_v31, %v1899_v7 }
 0x772   :  { %v8930_v3 = vpop.f32.mrf.mxu1 }
 0x774   :  { %v2294_v27 = vpop.f32.mrf.mxu1 }
 0x775   :  { %v8941_v9 = vpop.f32.mrf.mxu0  ;;  %8961 = vmatprep.mubr.msk.f32.mxu0 %vm748_vm2, %v2294_v27 }
 0x776   :  { %8962 = vmatmul.mubr.msk.f32.vlgmr.msra.gmra.mxu0 %vm748_vm2, %v8930_v3 }
 0x777   :  { %v2369_v50 = vpop.f32.mrf.mxu0  ;;  %8976 = vmatpush3.msra.mxu0 %v10347_v11  ;;  %v11820_v11 = vld [vmem:[#allocation23_spill] sm:$0xff] }
 0x778   :  { %8950 = vmatprep.mubr.msk.f32.mxu1 %vm748_vm2, %v2369_v50  ;;  %8977 = vmatprep.subr.mxu0 %v10352_v18 }
 0x779   :  { %8951 = vmatmul.mubr.msk.f32.vlgmr.msra.gmra.mxu1 %vm748_vm2, %v8941_v9  ;;  %8978 = vmatpush3.msra.mxu0 %v10352_v18  ;;  %v11821_v18 = vld [vmem:[#allocation24_spill] sm:$0xff] }
 0x77a   :  { %8965 = vmatpush3.msk.msra.mxu1 %vm850_vm5, %v10650_v19  ;;  %8972 = vmatprep.mubr.msk.f32.mxu1 %vm845_vm1, %v11818_v13 }
 0x77b   :  { %8966 = vmatprep.subr.mxu1 %v10654_v54  ;;  %8979 = vmatprep.subr.mxu0 %v11819_v40 }
 0x77c   :  { %8967 = vmatpush3.msra.mxu1 %v10654_v54  ;;  %8980 = vmatpush3.msra.mxu0 %v11819_v40 }
 0x77d   :  { %8968 = vmatprep.subr.mxu1 %v10667_v39  ;;  %8981 = vmatprep.subr.mxu0 %v11820_v11 }
 0x77e   :  { %8969 = vmatpush3.msra.mxu1 %v10667_v39  ;;  %8982 = vmatpush3.msra.mxu0 %v11820_v11 }
 0x77f   :  { %8970 = vmatprep.subr.mxu1 %v10676_v42  ;;  %8997 = vmatprep.subr.mxu0 %v11821_v18 }
 0x780   :  { %8971 = vmatpush3.msra.mxu1 %v10676_v42 }
 0x781   :  { %8973 = vmatmul.mubr.msk.f32.vlgmr.msra.gmra.mxu1 %vm845_vm1, %v11822_v6  ;;  %8986 = vmatprep.subr.msk.mxu1 %vm850_vm5, %v10650_v19 }
 0x782   :  { %8987 = vmatpush3.msk.msra.mxu1 %vm850_vm5, %v10650_v19  ;;  %8994 = vmatprep.mubr.msk.f32.mxu1 %vm845_vm1, %v11823_v51 }
 0x783   :  { %8988 = vmatprep.subr.mxu1 %v10654_v54 }
 0x784   :  { %8989 = vmatpush3.msra.mxu1 %v10654_v54 }
 0x785   :  { %8990 = vmatprep.subr.mxu1 %v10667_v39 }
 0x786   :  { %8991 = vmatpush3.msra.mxu1 %v10667_v39 }
 0x787   :  { %8992 = vmatprep.subr.mxu1 %v10676_v42 }
 0x788   :  { %8993 = vmatpush3.msra.mxu1 %v10676_v42 }
 0x789   :  { %8995 = vmatmul.mubr.msk.f32.vlgmr.msra.gmra.mxu1 %vm845_vm1, %v11824_v8  ;;  %9008 = vmatprep.subr.mxu1 %v10421_v53 }
 0x78a   :  { %9009 = vmatpush3.msra.mxu1 %v10421_v53  ;;  %v11825_v53 = vld [vmem:[#allocation25_spill] sm:$0xff] }
 0x78b   :  { %9010 = vmatprep.subr.mxu1 %v10426_v59 }
 0x78c   :  { %9011 = vmatpush3.msra.mxu1 %v10426_v59 }
 0x78d   :  { %9012 = vmatprep.subr.mxu1 %v10431_v60 }
 0x78e   :  { %9013 = vmatpush3.msra.mxu1 %v10431_v60  ;;  %v11826_v60 = vld [vmem:[#allocation26_spill] sm:$0xff] }
 0x78f   :  { %9014 = vmatprep.subr.mxu1 %v10435_v48 }
 0x790   :  { %9015 = vmatpush3.msra.mxu1 %v10435_v48 }
 0x791   :  { %9030 = vmatprep.subr.mxu1 %v10490_v56 }
 0x836   :  { %v8963_v28 = vpop.f32.mrf.mxu0 }
 0x838   :  { %v2531_v21 = vpop.f32.mrf.mxu0 }
 0x839   :  { %v8952_v19 = vpop.f32.mrf.mxu1 }
 0x83a   :  { %v2537_v34 = vadd.f32 %v8963_v28, %v8952_v19 }
 0x83b   :  { %v2450_v54 = vpop.f32.mrf.mxu1 }
 0x841   :  { %v8974_v39 = vpop.f32.mrf.mxu1 }
 0x843   :  { %v2606_v42 = vpop.f32.mrf.mxu1 }
 0x844   :  { %8983 = vmatprep.mubr.msk.f32.mxu0 %vm748_vm2, %v2606_v42 }
 0x845   :  { %8984 = vmatmul.mubr.msk.f32.vlgmr.msra.gmra.mxu0 %vm748_vm2, %v8974_v39 }
 0x846   :  { %8998 = vmatpush3.msra.mxu0 %v11821_v18 }
 0x847   :  { %8999 = vmatprep.subr.mxu0 %v11825_v53 }
 0x848   :  { %9000 = vmatpush3.msra.mxu0 %v11825_v53  ;;  %v1991_v53 = vmul.f32 0.044715, %v10730_v46 }
 0x849   :  { %v8996_v59 = vpop.f32.mrf.mxu1  ;;  %9001 = vmatprep.subr.mxu0 %v11826_v60 }
 0x84a   :  { %9002 = vmatpush3.msra.mxu0 %v11826_v60 }
 0x84b   :  { %v2764_v48 = vpop.f32.mrf.mxu1  ;;  %9003 = vmatprep.subr.mxu0 %v11827_v24 }
 0x84c   :  { %9004 = vmatpush3.msra.mxu0 %v11827_v24  ;;  %9005 = vmatprep.mubr.msk.f32.mxu0 %vm748_vm2, %v2764_v48 }
 0x84d   :  { %9006 = vmatmul.mubr.msk.f32.vlgmr.msra.gmra.mxu0 %vm748_vm2, %v8996_v59  ;;  %9019 = vmatprep.subr.mxu0 %v10477_v15  ;;  %v1993_v59 = vmul.f32 %v1991_v53, %v10730_v46 }
 0x84e   :  { %9020 = vmatpush3.msra.mxu0 %v10477_v15  ;;  %v2532_v15 = vadd.f32 %v2531_v21, %v2450_v54 }
 0x84f   :  { %9021 = vmatprep.subr.mxu0 %v10484_v58  ;;  %v1995_v60 = vmul.f32 %v1993_v59, %v10730_v46 }
 0x850   :  { %9022 = vmatpush3.msra.mxu0 %v10484_v58 }
 0x851   :  { %9023 = vmatprep.subr.mxu0 %v10497_v52  ;;  %v1997_v48 = vadd.f32 %v1995_v60, %v10730_v46 }
 0x852   :  { %9024 = vmatpush3.msra.mxu0 %v10497_v52 }
 0x853   :  { %9025 = vmatprep.subr.mxu0 %v10509_v62  ;;  %v1999_v24 = vmul.f32 0.7978846, %v1997_v48 }
 0x854   :  { %9026 = vmatpush3.msra.mxu0 %v10509_v62 }
 0x855   :  { %9041 = vmatprep.subr.mxu0 %v10525_v57 }
 0x905   :  { %v8985_v32 = vpop.f32.mrf.mxu0 }
 0x906   :  { %v2697_v38 = vadd.f32 %v8985_v32, %v2537_v34 }
 0x907   :  { %v2687_v35 = vpop.f32.mrf.mxu0 }
 0x908   :  { %v2696_v45 = vadd.f32 %v2687_v35, %v2532_v15 }
 0x90d   :  { %v9007_v44 = vpop.f32.mrf.mxu0 }
 0x90e   :  { %v2855_v58 = vadd.f32 %v9007_v44, %v2697_v38 }
 0x90f   :  { %v2845_v17 = vpop.f32.mrf.mxu0 }
 0x910   :  { %v2859_v14 = vmul.f32 0.044715, %v2855_v58  ;;  %v2854_v7 = vadd.f32 %v2845_v17, %v2696_v45  ;;  %v2857_v11 = vmul.f32 0.5, %v2855_v58 }
 0x912   :  { %v2858_v52 = vmul.f32 0.044715, %v2854_v7  ;;  %v2861_v41 = vmul.f32 %v2859_v14, %v2855_v58  ;;  %v2856_v8 = vmul.f32 0.5, %v2854_v7 }
 0x914   :  { %v2863_v31 = vmul.f32 %v2861_v41, %v2855_v58  ;;  %v2860_v3 = vmul.f32 %v2858_v52, %v2854_v7 }
 0x916   :  { %v2865_v62 = vadd.f32 %v2863_v31, %v2855_v58  ;;  %v2862_v27 = vmul.f32 %v2860_v3, %v2854_v7  ;;  %v1989_v58 = vmul.f32 0.5, %v10730_v46 }
 0x918   :  { %v2867_v9 = vmul.f32 0.7978846, %v2865_v62  ;;  %v2864_v50 = vadd.f32 %v2862_v27, %v2854_v7 }
 0x91a   :  { %9483 = vtanh.f32 %v2867_v9  ;;  %v2866_v13 = vmul.f32 0.7978846, %v2864_v50 }
 0x91c   :  { %9485 = vtanh.f32 %v2866_v13 }
 0x91d   :  { %9487 = vtanh.f32 %v1999_v24 }
 0x927   :  { %v9484_v40 = vpop.eup %9483 }
 0x928   :  { %v2871_v18 = vadd.f32 1.0, %v9484_v40 }
 0x929   :  { %v9486_v6 = vpop.eup %9485 }
 0x92a   :  { %v2873_v51 = vmul.f32 %v2871_v18, %v2857_v11  ;;  %v2870_v19 = vadd.f32 1.0, %v9486_v6  ;;  %v9488_v32 = vpop.eup %9487 }
 0x92b   :  { %v2003_v44 = vadd.f32 1.0, %v9488_v32 }
 0x92c   :  { %v2877_v54 = vsel %vm1515_vm6, %v2873_v51, 0.0  ;;  %v2872_v39 = vmul.f32 %v2870_v19, %v2856_v8 }
 0x92d   :  { %2878 = vadd.xlane.f32.xlu1 %v2877_v54  ;;  %v2005_v7 = vmul.f32 %v2003_v44, %v1989_v58 }
 0x92e   :  { %v2874_v42 = vsel %vm748_vm2, %v2872_v39, 0.0 }
 0x92f   :  { %2875 = vadd.xlane.f32.xlu0 %v2874_v42  ;;  %v10809_v41 = vadd.f32 %v2005_v7, %v10589_v43 }
 0x931   :  { %v2009_v31 = vsel %vm748_vm2, %v10809_v41, 0.0 }
 0x9b6   :  { %v2879_v28 = vpop.xlane.xlu1 %2878 }
 0x9b7   :  { %v2881_v21 = vmul.f32 0.03125, %v2879_v28 }
 0x9b8   :  { %v2876_v34 = vpop.xlane.xlu0 %2875 }
 0x9b9   :  { %v2880_v35 = vmul.f32 0.03125, %v2876_v34  ;;  %v2883_v15 = vsub.f32 %v2873_v51, %v2881_v21 }
 0x9bb   :  { %v2882_v38 = vsub.f32 %v2872_v39, %v2880_v35  ;;  %v2885_v14 = vmul.f32 %v2883_v15, %v2883_v15 }
 0x9bd   :  { %v2884_v45 = vmul.f32 %v2882_v38, %v2882_v38  ;;  %v2889_v52 = vsel %vm1515_vm6, %v2885_v14, 0.0 }
 0x9bf   :  { %v2886_v17 = vsel %vm748_vm2, %v2884_v45, 0.0 }
 0x9c0   :  { %2887 = vadd.xlane.f32.xlu0 %v2886_v17 }
 0x9c4   :  { %2890 = vadd.xlane.f32.xlu0 %v2889_v52 }
 0x9c8   :  { %2010 = vadd.xlane.f32.xlu0 %v2009_v31 }
 0xa49   :  { %v2888_v3 = vpop.xlane.xlu0 %2887 }
 0xa4a   :  { %v2892_v62 = vmul.f32 0.03125, %v2888_v3 }
 0xa4c   :  { %v2894_v27 = vadd.f32 1e-05, %v2892_v62 }
 0xa4d   :  { %v2891_v9 = vpop.xlane.xlu0 %2890 }
 0xa4e   :  { %9489 = vrsqrt.f32 %v2894_v27  ;;  %v2893_v46 = vmul.f32 0.03125, %v2891_v9 }
 0xa50   :  { %v2895_v50 = vadd.f32 1e-05, %v2893_v46 }
 0xa52   :  { %9491 = vrsqrt.f32 %v2895_v50 }
 0xa5b   :  { %v9490_v13 = vpop.eup %9489 }
 0xa5c   :  { %v2898_v40 = vmul.f32 %v9490_v13, %v2882_v38 }
 0xa5e   :  { %v2900_v11 = vmul.f32 %v2898_v40, %v10442_v10 }
 0xa5f   :  { %v9492_v18 = vpop.eup %9491 }
 0xa60   :  { %v2902_v43 = vadd.f32 %v2900_v11, %v10446_v63  ;;  %v2899_v6 = vmul.f32 %v9492_v18, %v2883_v15 }
 0xa62   :  { %9016 = vmatprep.mubr.msk.f32.mxu1 %vm748_vm2, %v2902_v43  ;;  %v2901_v51 = vmul.f32 %v2899_v6, %v10442_v10  ;;  %v2011_v6 = vpop.xlane.xlu0 %2010 }
 0xa64   :  { %v2903_v8 = vadd.f32 %v2901_v51, %v10446_v63 }
 0xa66   :  { %9017 = vmatmul.mubr.msk.f32.vlgmr.msra.gmra.mxu1 %vm748_vm2, %v2903_v8 }
 0xa67   :  { %9031 = vmatpush3.msra.mxu1 %v10490_v56 }
 0xa68   :  { %9032 = vmatprep.subr.mxu1 %v10504_v61 }
 0xa69   :  { %9033 = vmatpush3.msra.mxu1 %v10504_v61 }
 0xa6a   :  { %9034 = vmatprep.subr.mxu1 %v10514_v47 }
 0xa6b   :  { %9035 = vmatpush3.msra.mxu1 %v10514_v47 }
 0xa6c   :  { %9036 = vmatprep.subr.mxu1 %v10532_v1 }
 0xa6d   :  { %9037 = vmatpush3.msra.mxu1 %v10532_v1 }
 0xa6e   :  { %9052 = vmatprep.subr.mxu1 %v10539_v30 }
 0xb26   :  { %v9018_v10 = vpop.f32.mrf.mxu1 }
 0xb27   :  { %v10828_v63 = vadd.f32 %v9018_v10, %v10583_v5  ;;  %v1990_v10 = vmul.f32 0.5, %v10728_v29 }
 0xb28   :  { %v2976_v19 = vpop.f32.mrf.mxu1 }
 0xb29   :  { %v10831_v56 = vadd.f32 %v2976_v19, %v10583_v5  ;;  %v2988_v61 = vrot.slane %v10828_v63, 6  ;;  %v2015_v19 = vmul.f32 0.03125, %v2011_v6 }
 0xb2b   :  { %v2987_v54 = vrot.slane %v10831_v56, 6 }
 0xb2d   :  { %v2991_v47 = vsel %vm1639_vm7, 0.0, %v2987_v54  ;;  %v2989_v39 = vsel %vm1639_vm7, %v2987_v54, %v2988_v61 }
 0xb2e   :  { %9027 = vmatprep.mubr.msk.f32.mxu0 %vm748_vm2, %v2991_v47  ;;  %v3074_v1 = vrot.slane %v2991_v47, 1  ;;  %v3158_v42 = vrot.slane %v2991_v47, 2  ;;  %v3075_v53 = vrot.slane %v2989_v39, 1  ;;  %v3159_v59 = vrot.slane %v2989_v39, 2 }
 0xb2f   :  { %9028 = vmatmul.mubr.msk.f32.vlgmr.msra.gmra.mxu0 %vm748_vm2, %v2989_v39  ;;  %v3242_v60 = vrot.slane %v2991_v47, 3  ;;  %v3243_v48 = vrot.slane %v2989_v39, 3 }
 0xb30   :  { %9042 = vmatpush3.msra.mxu0 %v10525_v57  ;;  %v3076_v5 = vsel %vm850_vm5, %v3074_v1, %v3075_v53  ;;  %v3160_v24 = vsel %vm1816_vm8, %v3158_v42, %v3159_v59  ;;  %v2017_v1 = vsub.f32 %v10809_v41, %v2015_v19 }
 0xb31   :  { %9043 = vmatprep.subr.mxu0 %v10599_v37  ;;  %9038 = vmatprep.mubr.msk.f32.mxu1 %vm748_vm2, %v3076_v5  ;;  %v3244_v57 = vsel %vm1902_vm9, %v3242_v60, %v3243_v48 }
 0xb32   :  { %9044 = vmatpush3.msra.mxu0 %v10599_v37  ;;  %9049 = vmatprep.mubr.msk.f32.mxu0 %vm748_vm2, %v3160_v24 }
 0xb33   :  { %9039 = vmatmul.mubr.msk.f32.vlgmr.msra.gmra.mxu1 %vm748_vm2, %v3075_v53  ;;  %9045 = vmatprep.subr.mxu0 %v10607_v4 }
 0xb34   :  { %9053 = vmatpush3.msra.mxu1 %v10539_v30  ;;  %9046 = vmatpush3.msra.mxu0 %v10607_v4  ;;  %v3245_v30 = vsel %vm1902_vm9, %v3243_v48, %v10645_v49  ;;  %v1992_v4 = vmul.f32 0.044715, %v10728_v29  ;;  %v2019_v48 = vmul.f32 %v2017_v1, %v2017_v1 }
 0xb35   :  { %9054 = vmatprep.subr.mxu1 %v10617_v55  ;;  %9060 = vmatprep.mubr.msk.f32.mxu1 %vm748_vm2, %v3244_v57 }
 0xb36   :  { %9047 = vmatprep.subr.mxu0 %v10624_v0  ;;  %9055 = vmatpush3.msra.mxu1 %v10617_v55 }
 0xb37   :  { %9048 = vmatpush3.msra.mxu0 %v10624_v0  ;;  %9056 = vmatprep.subr.mxu1 %v10632_v26 }
 0xb38   :  { %9050 = vmatmul.mubr.msk.f32.vlgmr.msra.gmra.mxu0 %vm748_vm2, %v3159_v59  ;;  %9057 = vmatpush3.msra.mxu1 %v10632_v26  ;;  %v1994_v26 = vmul.f32 %v1992_v4, %v10728_v29 }
 0xb39   :  { %9058 = vmatprep.subr.mxu1 %v10642_v36 }
 0xb3a   :  { %9059 = vmatpush3.msra.mxu1 %v10642_v36  ;;  %v1996_v49 = vmul.f32 %v1994_v26, %v10728_v29 }
 0xb3b   :  { %9061 = vmatmul.mubr.msk.f32.vlgmr.msra.gmra.mxu1 %vm748_vm2, %v3245_v30 }
 0xb3c   :  { %v1998_v52 = vadd.f32 %v1996_v49, %v10728_v29  ;;  %v2021_v29 = vsel %vm748_vm2, %v2019_v48, 0.0  ;;  %v10911_v48 = vld [vmem:[#allocation7 + $0x18] sm:$0xff] }
 0xb3d   :  { %9077 = vmatprep.subr.mxu1 %v10911_v48 }
 0xb3e   :  { %v2000_v62 = vmul.f32 0.7978846, %v1998_v52  ;;  %9078 = vmatpush3.msra.mxu1 %v10911_v48 }
 0xb40   :  { %9493 = vtanh.f32 %v2000_v62  ;;  %v3387_v62 = vld [vmem:[#allocation6] sm:$0xff] }
 0xb4d   :  { %v9494_v11 = vpop.eup %9493 }
 0xb4e   :  { %v2004_v18 = vadd.f32 1.0, %v9494_v11 }
 0xb50   :  { %v2006_v54 = vmul.f32 %v2004_v18, %v1990_v10 }
 0xb52   :  { %v2008_v53 = vadd.f32 %v2006_v54, %v10586_v25 }
 0xb54   :  { %v2012_v5 = vsel %vm1515_vm6, %v2008_v53, 0.0 }
 0xbef   :  { %v9029_v37 = vpop.f32.mrf.mxu0 }
 0xbf0   :  { %v3073_v0 = vadd.f32 %v9029_v37, %v10724_v23 }
 0xbf1   :  { %v3063_v55 = vpop.f32.mrf.mxu0 }
 0xbf2   :  { %v3072_v21 = vadd.f32 %v3063_v55, %v10724_v23 }
 0xbf3   :  { %v9040_v28 = vpop.f32.mrf.mxu1 }
 0xbf4   :  { %v3157_v34 = vadd.f32 %v9040_v28, %v3073_v0 }
 0xbf5   :  { %v3147_v32 = vpop.f32.mrf.mxu1 }
 0xbf6   :  { %v3156_v36 = vadd.f32 %v3147_v32, %v3072_v21 }
 0xbf8   :  { %v9051_v35 = vpop.f32.mrf.mxu0 }
 0xbf9   :  { %v3241_v15 = vadd.f32 %v9051_v35, %v3157_v34 }
 0xbfa   :  { %v3231_v38 = vpop.f32.mrf.mxu0 }
 0xbfb   :  { %v3240_v44 = vadd.f32 %v3231_v38, %v3156_v36  ;;  %v9062_v45 = vpop.f32.mrf.mxu1 }
 0xbfc   :  { %v3326_v58 = vadd.f32 %v9062_v45, %v3241_v15  ;;  %v10886_v45 = vsub.s32 7, %v9927_v2 }
 0xbfd   :  { %v3316_v17 = vpop.f32.mrf.mxu1 }
 0xbfe   :  { %v3330_v14 = vmul.f32 0.044715, %v3326_v58  ;;  %v3325_v7 = vadd.f32 %v3316_v17, %v3240_v44  ;;  %v3328_v60 = vmul.f32 0.5, %v3326_v58  ;;  %v10883_v44 = vsub.s32 6, %v9927_v2  ;;  %v3388_v2 = vld [vmem:[#allocation6 + $0x8] sm:$0xff] }
 0xc00   :  { %v3332_v31 = vmul.f32 %v3330_v14, %v3326_v58  ;;  %v3329_v23 = vmul.f32 0.044715, %v3325_v7  ;;  %v3327_v51 = vmul.f32 0.5, %v3325_v7 }
 0xc02   :  { %v3331_v3 = vmul.f32 %v3329_v23, %v3325_v7  ;;  %v3334_v27 = vmul.f32 %v3332_v31, %v3326_v58  ;;  %v3390_v23 = vld [vmem:[#allocation6 + $0x18] sm:$0xff] }
 0xc03   :  { %9063 = vmatprep.subr.mxu0 %v3390_v23 }
 0xc04   :  { %v3333_v9 = vmul.f32 %v3331_v3, %v3325_v7  ;;  %v3336_v50 = vadd.f32 %v3334_v27, %v3326_v58  ;;  %v2038_v58 = vrot.slane %v10720_v22, %v10883_v44  ;;  %v3389_v3 = vld [vmem:[#allocation6 + $0x10] sm:$0xff]  ;;  %9064 = vmatpush3.msra.mxu0 %v3390_v23 }
 0xc05   :  { %9065 = vmatprep.subr.mxu0 %v3389_v3 }
 0xc06   :  { %v3335_v46 = vadd.f32 %v3333_v9, %v3325_v7  ;;  %v3338_v40 = vmul.f32 0.7978846, %v3336_v50  ;;  %v2044_v7 = vrot.slane %v10720_v22, %v10886_v45  ;;  %9066 = vmatpush3.msra.mxu0 %v3389_v3 }
 0xc07   :  { %9067 = vmatprep.subr.mxu0 %v3388_v2 }
 0xc08   :  { %v3337_v13 = vmul.f32 0.7978846, %v3335_v46  ;;  %9068 = vmatpush3.msra.mxu0 %v3388_v2 }
 0xc09   :  { %9069 = vmatprep.subr.mxu0 %v3387_v62 }
 0xc0a   :  { %9495 = vtanh.f32 %v3337_v13  ;;  %9070 = vmatpush3.msra.mxu0 %v3387_v62 }
 0xc0b   :  { %9497 = vtanh.f32 %v3338_v40 }
 0xc17   :  { %v9496_v43 = vpop.eup %9495 }
 0xc18   :  { %v3341_v8 = vadd.f32 1.0, %v9496_v43  ;;  %v9498_v47 = vpop.eup %9497 }
 0xc19   :  { %v3342_v59 = vadd.f32 1.0, %v9498_v47 }
 0xc1a   :  { %v3343_v61 = vmul.f32 %v3341_v8, %v3327_v51 }
 0xc1b   :  { %v3344_v24 = vmul.f32 %v3342_v59, %v3328_v60 }
 0xc1c   :  { %v3345_v39 = vadd.f32 %v3343_v61, %v10831_v56 }
 0xc1d   :  { %v3346_v57 = vadd.f32 %v3344_v24, %v10828_v63  ;;  %v10913_v24 = vld [vmem:[#allocation7 + $0x10] sm:$0xff] }
 0xc1e   :  { %v3347_v42 = vsel %vm748_vm2, %v3345_v39, 0.0  ;;  %9079 = vmatprep.subr.mxu1 %v10913_v24 }
 0xc1f   :  { %3348 = vadd.xlane.f32.xlu1 %v3347_v42  ;;  %v3350_v56 = vsel %vm1515_vm6, %v3346_v57, 0.0  ;;  %9080 = vmatpush3.msra.mxu1 %v10913_v24 }
 0xc23   :  { %2013 = vadd.xlane.f32.xlu1 %v2012_v5 }
 0xc27   :  { %2022 = vadd.xlane.f32.xlu1 %v2021_v29  ;;  %v10917_v29 = vld [vmem:[#allocation7 + $0x8] sm:$0xff] }
 0xc28   :  { %9081 = vmatprep.subr.mxu1 %v10917_v29 }
 0xc29   :  { %9082 = vmatpush3.msra.mxu1 %v10917_v29 }
 0xc2b   :  { %3351 = vadd.xlane.f32.xlu1 %v3350_v56  ;;  %v10927_v56 = vld [vmem:[#allocation10] sm:$0xff] }
 0xca8   :  { %v3349_v41 = vpop.xlane.xlu1 %3348 }
 0xca9   :  { %v3353_v30 = vmul.f32 0.03125, %v3349_v41  ;;  %v11828_v41 = vld [vmem:[#allocation21_spill] sm:$0xff] }
 0xcab   :  { %v3355_v37 = vsub.f32 %v3345_v39, %v3353_v30  ;;  %v3394_v30 = vrot.slane %v10927_v56, %v11828_v41 }
 0xcac   :  { %v2014_v25 = vpop.xlane.xlu1 %2013 }
 0xcad   :  { %v2016_v4 = vmul.f32 0.03125, %v2014_v25  ;;  %v3357_v55 = vmul.f32 %v3355_v37, %v3355_v37 }
 0xcaf   :  { %v2018_v0 = vsub.f32 %v2008_v53, %v2016_v4  ;;  %v3359_v28 = vsel %vm748_vm2, %v3357_v55, 0.0 }
 0xcb0   :  { %3360 = vadd.xlane.f32.xlu0 %v3359_v28  ;;  %v2023_v21 = vpop.xlane.xlu1 %2022 }
 0xcb1   :  { %v2027_v26 = vmul.f32 0.03125, %v2023_v21  ;;  %v2020_v32 = vmul.f32 %v2018_v0, %v2018_v0 }
 0xcb3   :  { %v2029_v34 = vadd.f32 1e-05, %v2027_v26  ;;  %v2024_v63 = vsel %vm1515_vm6, %v2020_v32, 0.0 }
 0xcb4   :  { %2025 = vadd.xlane.f32.xlu0 %v2024_v63  ;;  %v3352_v35 = vpop.xlane.xlu1 %3351 }
 0xcb5   :  { %9499 = vrsqrt.f32 %v2029_v34  ;;  %v3354_v36 = vmul.f32 0.03125, %v3352_v35 }
 0xcb7   :  { %v3356_v15 = vsub.f32 %v3346_v57, %v3354_v36  ;;  %v10921_v57 = vld [vmem:[#allocation7] sm:$0xff] }
 0xcb8   :  { %9083 = vmatprep.subr.mxu1 %v10921_v57 }
 0xcb9   :  { %v3358_v38 = vmul.f32 %v3356_v15, %v3356_v15  ;;  %9084 = vmatpush3.msra.mxu1 %v10921_v57 }
 0xcbb   :  { %v3362_v49 = vsel %vm1515_vm6, %v3358_v38, 0.0 }
 0xcbc   :  { %3363 = vadd.xlane.f32.xlu0 %v3362_v49 }
 0xcc2   :  { %v9500_v17 = vpop.eup %9499 }
 0xcc3   :  { %v2033_v14 = vmul.f32 %v9500_v17, %v2017_v1 }
 0xcc5   :  { %v2039_v52 = vmul.f32 %v2038_v58, %v2033_v14 }
 0xcc7   :  { %v10892_v31 = vadd.f32 %v2044_v7, %v2039_v52 }
 0xcc9   :  { %9071 = vmatprep.mubr.msk.f32.mxu0 %vm748_vm2, %v10892_v31 }
 0xd39   :  { %v3361_v27 = vpop.xlane.xlu0 %3360 }
 0xd3a   :  { %v3365_v22 = vmul.f32 0.03125, %v3361_v27 }
 0xd3c   :  { %v3367_v9 = vadd.f32 1e-05, %v3365_v22 }
 0xd3d   :  { %v2026_v46 = vpop.xlane.xlu0 %2025 }
 0xd3e   :  { %9501 = vrsqrt.f32 %v3367_v9  ;;  %v2028_v50 = vmul.f32 0.03125, %v2026_v46 }
 0xd40   :  { %v2030_v13 = vadd.f32 1e-05, %v2028_v50 }
 0xd42   :  { %9503 = vrsqrt.f32 %v2030_v13 }
 0xd45   :  { %v3364_v40 = vpop.xlane.xlu0 %3363 }
 0xd46   :  { %v3366_v11 = vmul.f32 0.03125, %v3364_v40 }
 0xd48   :  { %v3368_v18 = vadd.f32 1e-05, %v3366_v11 }
 0xd4a   :  { %9505 = vrsqrt.f32 %v3368_v18 }
 0xd4b   :  { %v9502_v43 = vpop.eup %9501 }
 0xd4c   :  { %v3371_v6 = vmul.f32 %v9502_v43, %v3355_v37 }
 0xd4e   :  { %v3373_v51 = vmul.f32 %v3371_v6, %v2038_v58 }
 0xd4f   :  { %v9504_v8 = vpop.eup %9503 }
 0xd50   :  { %v2034_v10 = vmul.f32 %v9504_v8, %v2018_v0  ;;  %v3375_v19 = vadd.f32 %v3373_v51, %v2044_v7 }
 0xd52   :  { %v2040_v61 = vmul.f32 %v2038_v58, %v2034_v10  ;;  %v3379_v47 = vrot.slane %v3375_v19, 2 }
 0xd54   :  { %v2046_v54 = vadd.f32 %v2044_v7, %v2040_v61 }
 0xd56   :  { %v10897_v39 = vsel %vm1816_vm8, %v2046_v54, %v3379_v47 }
 0xd57   :  { %v9506_v1 = vpop.eup %9505  ;;  %9072 = vmatmul.mubr.msk.f32.vlgmr.msra.gmra.mxu0 %vm748_vm2, %v10897_v39 }
 0xd58   :  { %v3372_v42 = vmul.f32 %v9506_v1, %v3356_v15 }
 0xd5a   :  { %v3374_v53 = vmul.f32 %v3372_v42, %v2038_v58 }
 0xd5c   :  { %v3376_v59 = vadd.f32 %v3374_v53, %v2044_v7 }
 0xd5e   :  { %v10901_v60 = vrot.slane %v3376_v59, 2 }
 0xd60   :  { %v10905_v5 = vsel %vm1816_vm8, %v3379_v47, %v10901_v60 }
 0xd61   :  { %9074 = vmatprep.mubr.msk.f32.mxu0 %vm748_vm2, %v10905_v5 }
 0xd62   :  { %9075 = vmatmul.mubr.msk.f32.gmra.mxu0 %vm748_vm2, %v10901_v60 }
 0xe17   :  { %v9073_v37 = vpop.f32.mrf.mxu0 }
 0xe18   :  { %v10931_v25 = vadd.f32 %v9073_v37, %v3394_v30 }
 0xe19   :  { %v3471_v4 = vpop.f32.mrf.mxu0 }
 0xe1a   :  { %v10933_v55 = vadd.f32 %v3471_v4, %v3394_v30  ;;  %3500 = vrot.lane.b32.xlu1 %v10931_v25, %s9825_s5  ;;  %3701 = vrot.lane.b32.xlu0 %v10931_v25, %s9826_s20  ;;  %v10961_v15 = vmul.f32 0.35355338, %v10931_v25 }
 0xe1c   :  { %v10940_v0 = vmul.f32 0.35355338, %v10933_v55 }
 0xe1e   :  { %3583 = vrot.lane.b32.xlu1 %v10931_v25, %s9827_s21  ;;  %3699 = vrot.lane.b32.xlu0 %v10933_v55, %s9826_s20 }
 0xe1f   :  { %9092 = vmatprep.mubr.msk.f32.mxu0 %vm3585_vm10, %v10940_v0 }
 0xe22   :  { %3581 = vrot.lane.b32.xlu0 %v10933_v55, %s9827_s21  ;;  %3498 = vrot.lane.b32.xlu1 %v10933_v55, %s9825_s5  ;;  %v9076_v28 = vpop.f32.mrf.mxu0 }
 0xe23   :  { %v3487_v21 = vadd.f32 %v9076_v28, %v3394_v30 }
 0xe24   :  { %v3481_v26 = vpop.f32.mrf.mxu0 }
 0xe25   :  { %v4388_v32 = vmul.f32 0.35355338, %v3487_v21  ;;  %v10952_v34 = vadd.f32 %v3481_v26, %v3394_v30  ;;  %v4394_v63 = vrot.slane %v3487_v21, 6 }
 0xe26   :  { %3695 = vrot.lane.b32.xlu1 %v10940_v0, %s9828_s29 }
 0xe27   :  { %v10957_v35 = vmul.f32 0.35355338, %v10952_v34  ;;  %v4392_v36 = vrot.slane %v10952_v34, 6  ;;  %v4484_v38 = vrot.slane %v4388_v32, 6 }
 0xe29   :  { %v4482_v49 = vrot.slane %v10957_v35, 6  ;;  %v10967_v58 = vsel %vm1639_vm7, %v4392_v36, %v4394_v63  ;;  %v4391_v35 = vrot.slane %v10931_v25, 6 }
 0xe2a   :  { %3697 = vrot.lane.b32.xlu1 %v10961_v15, %s9828_s29 }
 0xe2b   :  { %v10974_v17 = vsel %vm1639_vm7, %v4482_v49, %v4484_v38 }
 0xe8c   :  { %v3501_v14 = vpop.permute.xlu1 %3500  ;;  %v3702_v7 = vpop.permute.xlu0 %3701 }
 0xe8d   :  { %9095 = vmatprep.subr.msk.mxu1 %vm3585_vm10, %v3702_v7 }
 0xe90   :  { %v3584_v52 = vpop.permute.xlu1 %3583  ;;  %v3700_v23 = vpop.permute.xlu0 %3699 }
 0xe91   :  { %9088 = vmatprep.subr.msk.mxu0 %vm3585_vm10, %v3584_v52 }
 0xe92   :  { %9089 = vmatpush3.xpose.msk.msra.mxu0 %vm3585_vm10, %v3584_v52 }
 0xe94   :  { %v3499_v3 = vpop.permute.xlu1 %3498  ;;  %v3582_v2 = vpop.permute.xlu0 %3581 }
 0xe95   :  { %9085 = vmatprep.mubr.msk.f32.mxu1 %vm748_vm2, %v3499_v3  ;;  %9090 = vmatprep.subr.msk.mxu0 %vm3585_vm10, %v3582_v2 }
 0xe96   :  { %9086 = vmatmul.mubr.msk.f32.vlgmr.msra.gmra.mxu1 %vm748_vm2, %v3501_v14  ;;  %9091 = vmatpush3.xpose.msk.msra.mxu0 %vm3585_vm10, %v3582_v2 }
 0xe97   :  { %9096 = vmatpush3.xpose.msk.msra.mxu1 %vm3585_vm10, %v3702_v7 }
 0xe98   :  { %9097 = vmatprep.subr.msk.mxu1 %vm3585_vm10, %v3700_v23  ;;  %v3696_v62 = vpop.permute.xlu1 %3695 }
 0xe99   :  { %9093 = vmatmul.mubr.msk.f32.vlgmr.msra.gmra.mxu0 %vm3585_vm10, %v10961_v15  ;;  %9099 = vmatprep.mubr.msk.f32.mxu1 %vm3585_vm10, %v3696_v62 }
 0xe9b   :  { %9098 = vmatpush3.xpose.msk.msra.mxu1 %vm3585_vm10, %v3700_v23 }
 0xe9c   :  { %v3698_v27 = vpop.permute.xlu1 %3697 }
 0xe9e   :  { %9100 = vmatmul.mubr.msk.f32.vlgmr.msra.gmra.mxu1 %vm3585_vm10, %v3698_v27 }
 0xf56   :  { %v10990_v22 = vpop.f32.mrf.mxu1 }
 0xf58   :  { %v10992_v9 = vpop.f32.mrf.mxu1 }
 0xf59   :  { %v9094_v46 = vpop.f32.mrf.mxu0 }
 0xf5a   :  { %v3676_v6 = vsel %vm3675_vm11, %v9094_v46, -inf }
 0xf5b   :  { %v3662_v18 = vpop.f32.mrf.mxu0 }
 0xf5c   :  { %v3672_v43 = vsel %vm3671_vm12, %v3662_v18, -inf }
 0xf5e   :  { %v9101_v50 = vpop.f32.mrf.mxu1 }
 0xf5f   :  { %v3789_v13 = vsel %vm3675_vm11, %v9101_v50, -inf }
 0xf60   :  { %3790 = vmax.xlane.f32.xlu1 %v3789_v13  ;;  %v3777_v40 = vpop.f32.mrf.mxu1 }
 0xf61   :  { %v3786_v11 = vsel %vm3671_vm12, %v3777_v40, -inf }
 0xf62   :  { %3787 = vmax.xlane.f32.xlu0 %v3786_v11 }
 0xf66   :  { %3673 = vmax.xlane.f32.xlu0 %v3672_v43 }
 0xf6a   :  { %3677 = vmax.xlane.f32.xlu0 %v3676_v6 }
 0xf71   :  { %3812 = vrot.lane.b32.xlu1 %v10990_v22, %s9827_s21 }
 0xf75   :  { %3987 = vrot.lane.b32.xlu1 %v10931_v25, %s9829_s30 }
 0xfe9   :  { %v3791_v51 = vpop.xlane.xlu1 %3790 }
 0xfea   :  { %v3793_v47 = vsub.f32 %v9101_v50, %v3791_v51 }
 0xfeb   :  { %v3788_v8 = vpop.xlane.xlu0 %3787 }
 0xfec   :  { %v3792_v19 = vsub.f32 %v3777_v40, %v3788_v8  ;;  %v3796_v30 = vmul.f32 1.442695, %v3793_v47 }
 0xfed   :  { %v3813_v10 = vpop.permute.xlu1 %3812 }
 0xfee   :  { %9102 = vmatprep.subr.msk.mxu0 %vm1816_vm8, %v3813_v10  ;;  %v3794_v1 = vmul.f32 1.442695, %v3792_v19 }
 0xfef   :  { %9103 = vmatpush3.msk.msra.mxu0 %vm1816_vm8, %v3813_v10  ;;  %v3674_v61 = vpop.xlane.xlu0 %3673 }
 0xff0   :  { %v3679_v54 = vsub.f32 %v3662_v18, %v3674_v61 }
 0xff1   :  { %v3988_v7 = vpop.permute.xlu1 %3987 }
 0xff2   :  { %v3681_v42 = vmul.f32 1.442695, %v3679_v54 }
 0xff3   :  { %v3678_v53 = vpop.xlane.xlu0 %3677 }
 0xff4   :  { %9507 = vpow2.f32 %v3681_v42  ;;  %v3680_v59 = vsub.f32 %v9094_v46, %v3678_v53 }
 0xff5   :  { %9509 = vpow2.f32 %v3794_v1 }
 0xff6   :  { %v3683_v37 = vmul.f32 1.442695, %v3680_v59 }
 0xff8   :  { %9511 = vpow2.f32 %v3683_v37 }
 0xff9   :  { %9513 = vpow2.f32 %v3796_v30 }
0x1001   :  { %v9508_v4 = vpop.eup %9507 }
0x1002   :  { %v3685_v28 = vsel %vm3671_vm12, %v9508_v4, 0.0  ;;  %v9510_v21 = vpop.eup %9509 }
0x1003   :  { %3686 = vadd.xlane.f32.xlu1 %v3685_v28  ;;  %v3798_v32 = vsel %vm3671_vm12, %v9510_v21, 0.0 }
0x1005   :  { %v9512_v26 = vpop.eup %9511 }
0x1006   :  { %v3688_v63 = vsel %vm3675_vm11, %v9512_v26, 0.0  ;;  %v9514_v38 = vpop.eup %9513 }
0x1007   :  { %3799 = vadd.xlane.f32.xlu1 %v3798_v32  ;;  %3689 = vadd.xlane.f32.xlu0 %v3688_v63  ;;  %v3801_v14 = vsel %vm3675_vm11, %v9514_v38, 0.0 }
0x100b   :  { %3802 = vadd.xlane.f32.xlu0 %v3801_v14 }
0x1018   :  { %3985 = vrot.lane.b32.xlu1 %v10933_v55, %s9829_s30 }
0x101c   :  { %3983 = vrot.lane.b32.xlu1 %v10961_v15, %s9830_s3 }
0x1021   :  { %3810 = vrot.lane.b32.xlu0 %v10992_v9, %s9827_s21 }
0x1025   :  { %3981 = vrot.lane.b32.xlu0 %v10940_v0, %s9830_s3 }
0x108c   :  { %v3687_v52 = vpop.xlane.xlu1 %3686 }
0x1090   :  { %v3800_v23 = vpop.xlane.xlu1 %3799  ;;  %v3690_v3 = vpop.xlane.xlu0 %3689 }
0x1091   :  { %9515 = vrcp.f32 %v3800_v23 }
0x1092   :  { %9517 = vrcp.f32 %v3687_v52 }
0x1094   :  { %v3803_v2 = vpop.xlane.xlu0 %3802  ;;  %v3986_v51 = vpop.permute.xlu1 %3985 }
0x1095   :  { %9519 = vrcp.f32 %v3803_v2 }
0x1096   :  { %9521 = vrcp.f32 %v3690_v3 }
0x1098   :  { %v3811_v62 = vpop.permute.xlu0 %3810  ;;  %v3984_v8 = vpop.permute.xlu1 %3983 }
0x1099   :  { %9104 = vmatprep.subr.mxu0 %v3811_v62 }
0x109a   :  { %9105 = vmatpush3.msra.mxu0 %v3811_v62 }
0x109b   :  { %9109 = vmatprep.subr.msk.mxu0 %vm1816_vm8, %v10990_v22 }
0x109c   :  { %v3982_v6 = vpop.permute.xlu0 %3981 }
0x109e   :  { %v9516_v27 = vpop.eup %9515 }
0x109f   :  { %v3805_v46 = vmul.f32 %v9516_v27, %v9510_v21  ;;  %v9518_v50 = vpop.eup %9517 }
0x10a0   :  { %v3692_v18 = vmul.f32 %v9518_v50, %v9508_v4 }
0x10a1   :  { %9106 = vmatprep.mubr.msk.f32.mxu0 %vm3671_vm12, %v3805_v46 }
0x10a2   :  { %v9520_v13 = vpop.eup %9519 }
0x10a3   :  { %v3807_v40 = vmul.f32 %v9520_v13, %v9514_v38  ;;  %v9522_v11 = vpop.eup %9521 }
0x10a4   :  { %v3694_v43 = vmul.f32 %v9522_v11, %v9512_v26 }
0x10a5   :  { %9107 = vmatmul.mubr.msk.f32.vlgmr.msra.gmra.mxu0 %vm3671_vm12, %v3807_v40  ;;  %v4481_v40 = vrot.slane %v10961_v15, 6 }
0x10a6   :  { %9110 = vmatpush3.msk.msra.mxu0 %vm1816_vm8, %v10990_v22  ;;  %9113 = vmatprep.mubr.msk.f32.mxu0 %vm3671_vm12, %v3692_v18 }
0x10a7   :  { %9111 = vmatprep.subr.mxu0 %v10992_v9  ;;  %v11062_v18 = vsel %vm1639_vm7, %v4481_v40, %v4482_v49  ;;  %v11078_v49 = vsel %vm1639_vm7, %v4391_v35, %v4392_v36 }
0x10a8   :  { %9112 = vmatpush3.msra.mxu0 %v10992_v9 }
0x10a9   :  { %9116 = vmatprep.subr.msk.mxu0 %vm3585_vm10, %v3988_v7  ;;  %9114 = vmatmul.mubr.msk.f32.vlgmr.msra.gmra.mxu0 %vm3671_vm12, %v3694_v43 }
0x10aa   :  { %9117 = vmatpush3.xpose.msk.msra.mxu0 %vm3585_vm10, %v3988_v7  ;;  %9120 = vmatprep.mubr.msk.f32.mxu0 %vm3585_vm10, %v3982_v6 }
0x10ab   :  { %9118 = vmatprep.subr.msk.mxu0 %vm3585_vm10, %v3986_v51 }
0x10ae   :  { %9119 = vmatpush3.xpose.msk.msra.mxu0 %vm3585_vm10, %v3986_v51 }
0x10b1   :  { %9121 = vmatmul.mubr.msk.f32.vlgmr.msra.gmra.mxu0 %vm3585_vm10, %v3984_v8 }
0x1165   :  { %v9108_v10 = vpop.f32.mrf.mxu0 }
0x1167   :  { %v3889_v19 = vpop.f32.mrf.mxu0 }
0x1169   :  { %v9115_v61 = vpop.f32.mrf.mxu0 }
0x116a   :  { %v3978_v54 = vadd.f32 %v9115_v61, %v9108_v10 }
0x116b   :  { %v3972_v47 = vpop.f32.mrf.mxu0 }
0x116c   :  { %v3973_v1 = vadd.f32 %v3972_v47, %v3889_v19 }
0x1171   :  { %v9122_v42 = vpop.f32.mrf.mxu0 }
0x1172   :  { %v4075_v53 = vsel %vm3675_vm11, %v9122_v42, -inf }
0x1173   :  { %4076 = vmax.xlane.f32.xlu1 %v4075_v53  ;;  %v4063_v59 = vpop.f32.mrf.mxu0 }
0x1174   :  { %v4072_v30 = vsel %vm3671_vm12, %v4063_v59, -inf }
0x1175   :  { %4073 = vmax.xlane.f32.xlu0 %v4072_v30 }
0x1184   :  { %4096 = vrot.lane.b32.xlu1 %v10990_v22, %s9825_s5 }
0x1188   :  { %4190 = vrot.lane.b32.xlu1 %v10931_v25, %s9831_s12 }
0x118c   :  { %4188 = vrot.lane.b32.xlu1 %v10933_v55, %s9831_s12 }
0x1190   :  { %4186 = vrot.lane.b32.xlu1 %v10961_v15, %s9832_s13 }
0x11fc   :  { %v4077_v37 = vpop.xlane.xlu1 %4076 }
0x11fd   :  { %v4079_v4 = vsub.f32 %v9122_v42, %v4077_v37 }
0x11fe   :  { %v4074_v28 = vpop.xlane.xlu0 %4073 }
0x11ff   :  { %v4082_v21 = vmul.f32 1.442695, %v4079_v4  ;;  %v4078_v26 = vsub.f32 %v4063_v59, %v4074_v28 }
0x1200   :  { %v4097_v32 = vpop.permute.xlu1 %4096 }
0x1201   :  { %9523 = vpow2.f32 %v4082_v21  ;;  %v4080_v63 = vmul.f32 1.442695, %v4078_v26  ;;  %9123 = vmatprep.subr.msk.mxu1 %vm1816_vm8, %v4097_v32 }
0x1202   :  { %9124 = vmatpush3.msk.msra.mxu1 %vm1816_vm8, %v4097_v32 }
0x1203   :  { %9525 = vpow2.f32 %v4080_v63 }
0x1204   :  { %v4191_v2 = vpop.permute.xlu1 %4190 }
0x120e   :  { %v9524_v38 = vpop.eup %9523 }
0x120f   :  { %v4087_v55 = vsel %vm3675_vm11, %v9524_v38, 0.0 }
0x1210   :  { %v9526_v14 = vpop.eup %9525  ;;  %4088 = vadd.xlane.f32.xlu0 %v4087_v55 }
0x1211   :  { %v4084_v7 = vsel %vm3671_vm12, %v9526_v14, 0.0 }
0x1214   :  { %4085 = vadd.xlane.f32.xlu0 %v4084_v7 }
0x122a   :  { %4094 = vrot.lane.b32.xlu0 %v10992_v9, %s9825_s5 }
0x122e   :  { %4184 = vrot.lane.b32.xlu0 %v10940_v0, %s9832_s13  ;;  %v4189_v0 = vpop.permute.xlu1 %4188 }
0x1232   :  { %v4187_v11 = vpop.permute.xlu1 %4186 }
0x1299   :  { %v4089_v52 = vpop.xlane.xlu0 %4088 }
0x129a   :  { %9527 = vrcp.f32 %v4089_v52 }
0x129d   :  { %v4086_v23 = vpop.xlane.xlu0 %4085 }
0x129e   :  { %9529 = vrcp.f32 %v4086_v23 }
0x12a1   :  { %v4095_v3 = vpop.permute.xlu0 %4094 }
0x12a2   :  { %9125 = vmatprep.subr.mxu1 %v4095_v3 }
0x12a3   :  { %9126 = vmatpush3.msra.mxu1 %v4095_v3 }
0x12a4   :  { %9130 = vmatprep.subr.msk.mxu1 %vm3585_vm10, %v4191_v2 }
0x12a5   :  { %v4185_v13 = vpop.permute.xlu0 %4184 }
0x12a7   :  { %v9528_v62 = vpop.eup %9527 }
0x12a8   :  { %v4093_v50 = vmul.f32 %v9528_v62, %v9524_v38 }
0x12ab   :  { %v9530_v27 = vpop.eup %9529 }
0x12ac   :  { %v4091_v46 = vmul.f32 %v9530_v27, %v9526_v14 }
0x12ae   :  { %9127 = vmatprep.mubr.msk.f32.mxu1 %vm3671_vm12, %v4091_v46 }
0x12af   :  { %9128 = vmatmul.mubr.msk.f32.vlgmr.msra.gmra.mxu1 %vm3671_vm12, %v4093_v50 }
0x12b0   :  { %9131 = vmatpush3.xpose.msk.msra.mxu1 %vm3585_vm10, %v4191_v2  ;;  %9134 = vmatprep.mubr.msk.f32.mxu1 %vm3585_vm10, %v4185_v13 }
0x12b1   :  { %9132 = vmatprep.subr.msk.mxu1 %vm3585_vm10, %v4189_v0 }
0x12b4   :  { %9133 = vmatpush3.xpose.msk.msra.mxu1 %vm3585_vm10, %v4189_v0 }
0x12b7   :  { %9135 = vmatmul.mubr.msk.f32.vlgmr.msra.gmra.mxu1 %vm3585_vm10, %v4187_v11 }
0x12b8   :  { %9159 = vmatprep.mubr.msk.f32.mxu1 %vm3585_vm10, %v11062_v18 }
0x136f   :  { %v9129_v43 = vpop.f32.mrf.mxu1 }
0x1370   :  { %v11066_v6 = vadd.f32 %v9129_v43, %v3978_v54 }
0x1371   :  { %v4173_v51 = vpop.f32.mrf.mxu1 }
0x1372   :  { %v11068_v8 = vadd.f32 %v4173_v51, %v3973_v1 }
0x1377   :  { %v9136_v10 = vpop.f32.mrf.mxu1 }
0x1378   :  { %v4278_v15 = vsel %vm3675_vm11, %v9136_v10, -inf }
0x1379   :  { %4279 = vmax.xlane.f32.xlu1 %v4278_v15  ;;  %v4266_v19 = vpop.f32.mrf.mxu1 }
0x137a   :  { %v4275_v61 = vsel %vm3671_vm12, %v4266_v19, -inf }
0x137b   :  { %4276 = vmax.xlane.f32.xlu0 %v4275_v61 }
0x138a   :  { %4299 = vrot.lane.b32.xlu1 %v10990_v22, %s9833_s14 }
0x138e   :  { %4396 = vrot.lane.b32.xlu1 %v11078_v49, %s9825_s5 }
0x1392   :  { %4601 = vrot.lane.b32.xlu1 %v10967_v58, %s9826_s20 }
0x1396   :  { %4488 = vrot.lane.b32.xlu1 %v10967_v58, %s9827_s21 }
0x139a   :  { %4595 = vrot.lane.b32.xlu1 %v11062_v18, %s9828_s29 }
0x139e   :  { %4597 = vrot.lane.b32.xlu1 %v10974_v17, %s9828_s29 }
0x13a2   :  { %4885 = vrot.lane.b32.xlu1 %v11078_v49, %s9829_s30 }
0x13a6   :  { %4883 = vrot.lane.b32.xlu1 %v10974_v17, %s9830_s3 }
0x1402   :  { %v4280_v25 = vpop.xlane.xlu1 %4279 }
0x1403   :  { %v4282_v34 = vsub.f32 %v9136_v10, %v4280_v25 }
0x1404   :  { %v4277_v36 = vpop.xlane.xlu0 %4276 }
0x1405   :  { %v4285_v22 = vmul.f32 1.442695, %v4282_v34  ;;  %v4281_v54 = vsub.f32 %v4266_v19, %v4277_v36 }
0x1406   :  { %v4300_v47 = vpop.permute.xlu1 %4299 }
0x1407   :  { %9531 = vpow2.f32 %v4285_v22  ;;  %v4283_v1 = vmul.f32 1.442695, %v4281_v54  ;;  %9137 = vmatprep.subr.msk.mxu0 %vm1816_vm8, %v4300_v47 }
0x1408   :  { %9138 = vmatpush3.msk.msra.mxu0 %vm1816_vm8, %v4300_v47 }
0x1409   :  { %9533 = vpow2.f32 %v4283_v1 }
0x140a   :  { %v4397_v42 = vpop.permute.xlu1 %4396 }
0x140e   :  { %v4602_v53 = vpop.permute.xlu1 %4601 }
0x1412   :  { %v4489_v59 = vpop.permute.xlu1 %4488 }
0x1413   :  { %9155 = vmatprep.subr.msk.mxu1 %vm3585_vm10, %v4489_v59 }
0x1414   :  { %v9532_v30 = vpop.eup %9531  ;;  %9156 = vmatpush3.xpose.msk.msra.mxu1 %vm3585_vm10, %v4489_v59 }
0x1415   :  { %v4290_v37 = vsel %vm3675_vm11, %v9532_v30, 0.0 }
0x1416   :  { %v9534_v4 = vpop.eup %9533  ;;  %4291 = vadd.xlane.f32.xlu0 %v4290_v37  ;;  %v4596_v23 = vpop.permute.xlu1 %4595 }
0x1417   :  { %v4287_v28 = vsel %vm3671_vm12, %v9534_v4, 0.0 }
0x141a   :  { %4288 = vadd.xlane.f32.xlu0 %v4287_v28 }
0x1430   :  { %4297 = vrot.lane.b32.xlu0 %v10992_v9, %s9833_s14 }
0x1434   :  { %4398 = vrot.lane.b32.xlu0 %v10967_v58, %s9825_s5 }
0x1438   :  { %4599 = vrot.lane.b32.xlu0 %v11078_v49, %s9826_s20 }
0x143c   :  { %4486 = vrot.lane.b32.xlu0 %v11078_v49, %s9827_s21 }
0x1440   :  { %4887 = vrot.lane.b32.xlu0 %v10967_v58, %s9829_s30 }
0x1444   :  { %4881 = vrot.lane.b32.xlu0 %v11062_v18, %s9830_s3 }
0x149f   :  { %v4292_v21 = vpop.xlane.xlu0 %4291 }
0x14a0   :  { %9535 = vrcp.f32 %v4292_v21 }
0x14a3   :  { %v4289_v26 = vpop.xlane.xlu0 %4288 }
0x14a4   :  { %9537 = vrcp.f32 %v4289_v26 }
0x14a7   :  { %v4298_v9 = vpop.permute.xlu0 %4297 }
0x14a8   :  { %9139 = vmatprep.subr.mxu0 %v4298_v9 }
0x14a9   :  { %9140 = vmatpush3.msra.mxu0 %v4298_v9 }
0x14aa   :  { %9144 = vmatprep.subr.mxu0 %v10911_v48 }
0x14ab   :  { %v4399_v32 = vpop.permute.xlu0 %4398 }
0x14ad   :  { %v9536_v38 = vpop.eup %9535 }
0x14ae   :  { %v4296_v52 = vmul.f32 %v9536_v38, %v9532_v30 }
0x14af   :  { %v4600_v63 = vpop.permute.xlu0 %4599 }
0x14b1   :  { %v9538_v55 = vpop.eup %9537 }
0x14b2   :  { %v4294_v14 = vmul.f32 %v9538_v55, %v9534_v4 }
0x14b3   :  { %v4487_v7 = vpop.permute.xlu0 %4486 }
0x14b4   :  { %9141 = vmatprep.mubr.msk.f32.mxu0 %vm3671_vm12, %v4294_v14  ;;  %9157 = vmatprep.subr.msk.mxu1 %vm3585_vm10, %v4487_v7 }
0x14b5   :  { %9142 = vmatmul.mubr.msk.f32.vlgmr.msra.gmra.mxu0 %vm3671_vm12, %v4296_v52  ;;  %9158 = vmatpush3.xpose.msk.msra.mxu1 %vm3585_vm10, %v4487_v7 }
0x14b6   :  { %9145 = vmatpush3.msra.mxu0 %v10911_v48  ;;  %9152 = vmatprep.mubr.msk.f32.mxu0 %vm748_vm2, %v4397_v42 }
0x14b7   :  { %9146 = vmatprep.subr.mxu0 %v10913_v24  ;;  %v4888_v48 = vpop.permute.xlu0 %4887 }
0x14b8   :  { %9147 = vmatpush3.msra.mxu0 %v10913_v24  ;;  %9160 = vmatmul.mubr.msk.f32.vlgmr.msra.gmra.mxu1 %vm3585_vm10, %v10974_v17  ;;  %v4598_v24 = vpop.permute.xlu1 %4597 }
0x14b9   :  { %9148 = vmatprep.subr.mxu0 %v10917_v29 }
0x14ba   :  { %9149 = vmatpush3.msra.mxu0 %v10917_v29 }
0x14bb   :  { %9150 = vmatprep.subr.mxu0 %v10921_v57  ;;  %v4882_v29 = vpop.permute.xlu0 %4881 }
0x14bc   :  { %9151 = vmatpush3.msra.mxu0 %v10921_v57  ;;  %v4886_v57 = vpop.permute.xlu1 %4885 }
0x14bd   :  { %9153 = vmatmul.mubr.msk.f32.vlgmr.msra.gmra.mxu0 %vm748_vm2, %v4399_v32  ;;  %9162 = vmatprep.subr.msk.mxu0 %vm3585_vm10, %v4602_v53 }
0x14be   :  { %9163 = vmatpush3.xpose.msk.msra.mxu0 %vm3585_vm10, %v4602_v53  ;;  %9166 = vmatprep.mubr.msk.f32.mxu0 %vm3585_vm10, %v4596_v23 }
0x14bf   :  { %9164 = vmatprep.subr.msk.mxu0 %vm3585_vm10, %v4600_v63 }
0x14c0   :  { %v4884_v3 = vpop.permute.xlu1 %4883 }
0x14c2   :  { %9165 = vmatpush3.xpose.msk.msra.mxu0 %vm3585_vm10, %v4600_v63 }
0x14c3   :  { %9183 = vmatprep.subr.msk.mxu0 %vm3585_vm10, %v4888_v48 }
0x14c5   :  { %9167 = vmatmul.mubr.msk.f32.vlgmr.msra.gmra.mxu0 %vm3585_vm10, %v4598_v24 }
0x14c6   :  { %9184 = vmatpush3.xpose.msk.msra.mxu0 %vm3585_vm10, %v4888_v48  ;;  %9187 = vmatprep.mubr.msk.f32.mxu0 %vm3585_vm10, %v4882_v29 }
0x14c7   :  { %9185 = vmatprep.subr.msk.mxu0 %vm3585_vm10, %v4886_v57 }
0x14ca   :  { %9186 = vmatpush3.xpose.msk.msra.mxu0 %vm3585_vm10, %v4886_v57 }
0x14cd   :  { %9188 = vmatmul.mubr.msk.f32.vlgmr.msra.gmra.mxu0 %vm3585_vm10, %v4884_v3 }
0x1575   :  { %v9143_v2 = vpop.f32.mrf.mxu0 }
0x1576   :  { %v11141_v62 = vadd.f32 %v9143_v2, %v11066_v6 }
0x1577   :  { %v4376_v27 = vpop.f32.mrf.mxu0 }
0x1578   :  { %v11144_v46 = vadd.f32 %v4376_v27, %v11068_v8  ;;  %v9161_v0 = vpop.f32.mrf.mxu1 }
0x1579   :  { %v4576_v8 = vsel %vm3675_vm11, %v9161_v0, -inf }
0x157a   :  { %v4564_v10 = vpop.f32.mrf.mxu1 }
0x157b   :  { %v4573_v6 = vsel %vm3671_vm12, %v4564_v10, -inf }
0x157d   :  { %v11146_v50 = vpop.f32.mrf.mxu0 }
0x157f   :  { %v11148_v13 = vpop.f32.mrf.mxu0 }
0x1585   :  { %v9168_v40 = vpop.f32.mrf.mxu0 }
0x1586   :  { %v4689_v11 = vsel %vm3675_vm11, %v9168_v40, -inf }
0x1587   :  { %4690 = vmax.xlane.f32.xlu1 %v4689_v11  ;;  %v4677_v43 = vpop.f32.mrf.mxu0 }
0x1588   :  { %v4686_v51 = vsel %vm3671_vm12, %v4677_v43, -inf }
0x1589   :  { %4687 = vmax.xlane.f32.xlu0 %v4686_v51 }
0x158d   :  { %4574 = vmax.xlane.f32.xlu0 %v4573_v6  ;;  %v9189_v15 = vpop.f32.mrf.mxu0 }
0x158e   :  { %v4975_v19 = vsel %vm3675_vm11, %v9189_v15, -inf }
0x158f   :  { %v4963_v9 = vpop.f32.mrf.mxu0 }
0x1590   :  { %v4972_v32 = vsel %vm3671_vm12, %v4963_v9, -inf }
0x1591   :  { %4577 = vmax.xlane.f32.xlu0 %v4576_v8 }
0x1595   :  { %4976 = vmax.xlane.f32.xlu0 %v4975_v19 }
0x1610   :  { %v4691_v59 = vpop.xlane.xlu1 %4690 }
0x1611   :  { %v4693_v30 = vsub.f32 %v9168_v40, %v4691_v59 }
0x1612   :  { %v4688_v61 = vpop.xlane.xlu0 %4687 }
0x1613   :  { %v4696_v4 = vmul.f32 1.442695, %v4693_v30  ;;  %v4692_v14 = vsub.f32 %v4677_v43, %v4688_v61 }
0x1615   :  { %v4694_v7 = vmul.f32 1.442695, %v4692_v14 }
0x1616   :  { %v4575_v35 = vpop.xlane.xlu0 %4574 }
0x1617   :  { %v4579_v25 = vsub.f32 %v4564_v10, %v4575_v35 }
0x1619   :  { %v4581_v34 = vmul.f32 1.442695, %v4579_v25 }
0x161a   :  { %v4578_v36 = vpop.xlane.xlu0 %4577 }
0x161b   :  { %9539 = vpow2.f32 %v4581_v34  ;;  %v4580_v22 = vsub.f32 %v9161_v0, %v4578_v36 }
0x161d   :  { %v4583_v54 = vmul.f32 1.442695, %v4580_v22 }
0x161e   :  { %v4977_v37 = vpop.xlane.xlu0 %4976 }
0x161f   :  { %9541 = vpow2.f32 %v4583_v54  ;;  %v4979_v28 = vsub.f32 %v9189_v15, %v4977_v37 }
0x1620   :  { %9543 = vpow2.f32 %v4696_v4 }
0x1621   :  { %v4982_v21 = vmul.f32 1.442695, %v4979_v28 }
0x1623   :  { %9545 = vpow2.f32 %v4982_v21 }
0x1624   :  { %9547 = vpow2.f32 %v4694_v7  ;;  %v11222_v7 = vrot.slane %v10927_v56, %v10182_v12 }
0x1628   :  { %v11155_v47 = vpop.eup %9539 }
0x1629   :  { %v4585_v1 = vsel %vm3671_vm12, %v11155_v47, 0.0 }
0x162a   :  { %4586 = vadd.xlane.f32.xlu1 %v4585_v1 }
0x162c   :  { %v11159_v42 = vpop.eup %9541 }
0x162d   :  { %v4588_v53 = vsel %vm3675_vm11, %v11159_v42, 0.0  ;;  %v9544_v26 = vpop.eup %9543 }
0x162e   :  { %4589 = vadd.xlane.f32.xlu0 %v4588_v53  ;;  %v4701_v63 = vsel %vm3675_vm11, %v9544_v26, 0.0 }
0x1630   :  { %v11171_v38 = vpop.eup %9545 }
0x1631   :  { %v4987_v55 = vsel %vm3675_vm11, %v11171_v38, 0.0  ;;  %v9548_v52 = vpop.eup %9547 }
0x1632   :  { %v4698_v23 = vsel %vm3671_vm12, %v9548_v52, 0.0 }
0x163b   :  { %4712 = vrot.lane.b32.xlu1 %v11146_v50, %s9827_s21 }
0x163f   :  { %4996 = vrot.lane.b32.xlu1 %v11146_v50, %s9825_s5 }
0x1644   :  { %4710 = vrot.lane.b32.xlu0 %v11148_v13, %s9827_s21 }
0x1663   :  { %4973 = vmax.xlane.f32.xlu1 %v4972_v32  ;;  %4702 = vadd.xlane.f32.xlu0 %v4701_v63 }
0x1667   :  { %4988 = vadd.xlane.f32.xlu0 %v4987_v55 }
0x1674   :  { %4994 = vrot.lane.b32.xlu1 %v11148_v13, %s9825_s5 }
0x167d   :  { %5090 = vrot.lane.b32.xlu0 %v10967_v58, %s9831_s12 }
0x1681   :  { %5084 = vrot.lane.b32.xlu0 %v11062_v18, %s9832_s13 }
0x1698   :  { %4699 = vadd.xlane.f32.xlu1 %v4698_v23 }
0x16a9   :  { %5088 = vrot.lane.b32.xlu1 %v11078_v49, %s9831_s12 }
0x16b3   :  { %v4587_v48 = vpop.xlane.xlu1 %4586 }
0x16b7   :  { %v4713_v24 = vpop.permute.xlu1 %4712  ;;  %v4590_v29 = vpop.xlane.xlu0 %4589 }
0x16b8   :  { %9169 = vmatprep.subr.msk.mxu1 %vm1816_vm8, %v4713_v24 }
0x16b9   :  { %9170 = vmatpush3.msk.msra.mxu1 %vm1816_vm8, %v4713_v24 }
0x16bb   :  { %v4711_v58 = vpop.permute.xlu0 %4710  ;;  %v4997_v18 = vpop.permute.xlu1 %4996 }
0x16bc   :  { %9171 = vmatprep.subr.mxu1 %v4711_v58 }
0x16bd   :  { %9172 = vmatpush3.msra.mxu1 %v4711_v58 }
0x16be   :  { %9176 = vmatprep.subr.msk.mxu1 %vm1816_vm8, %v11146_v50 }
0x16ec   :  { %v4974_v57 = vpop.xlane.xlu1 %4973  ;;  %v4703_v40 = vpop.xlane.xlu0 %4702 }
0x16ed   :  { %v4978_v3 = vsub.f32 %v4963_v9, %v4974_v57 }
0x16ef   :  { %v4980_v2 = vmul.f32 1.442695, %v4978_v3 }
0x16f0   :  { %v4995_v0 = vpop.permute.xlu1 %4994 }
0x16f1   :  { %9549 = vpow2.f32 %v4980_v2 }
0x16f2   :  { %9551 = vrcp.f32 %v4587_v48 }
0x16f3   :  { %9553 = vrcp.f32 %v4703_v40 }
0x16fe   :  { %v9550_v27 = vpop.eup %9549 }
0x16ff   :  { %v4984_v49 = vsel %vm3671_vm12, %v9550_v27, 0.0  ;;  %v9552_v43 = vpop.eup %9551 }
0x1700   :  { %4985 = vadd.xlane.f32.xlu1 %v4984_v49  ;;  %v9554_v51 = vpop.eup %9553  ;;  %v4592_v19 = vmul.f32 %v9552_v43, %v11155_v47 }
0x1701   :  { %v4707_v8 = vmul.f32 %v9554_v51, %v9544_v26 }
0x1711   :  { %5086 = vrot.lane.b32.xlu1 %v10974_v17, %s9832_s13  ;;  %v4989_v17 = vpop.xlane.xlu0 %4988 }
0x1715   :  { %v5091_v35 = vpop.permute.xlu0 %5090 }
0x1719   :  { %v5085_v1 = vpop.permute.xlu0 %5084 }
0x1721   :  { %v4700_v11 = vpop.xlane.xlu1 %4699 }
0x1722   :  { %9555 = vrcp.f32 %v4700_v11 }
0x1723   :  { %9557 = vrcp.f32 %v4590_v29 }
0x1724   :  { %9559 = vrcp.f32 %v4989_v17 }
0x1725   :  { %v5089_v25 = vpop.permute.xlu1 %5088 }
0x172f   :  { %v9556_v10 = vpop.eup %9555 }
0x1730   :  { %v4705_v6 = vmul.f32 %v9556_v10, %v9548_v52  ;;  %v9558_v15 = vpop.eup %9557  ;;  %v5300_v52 = vadd.f32 %v11222_v7, %v11144_v46 }
0x1731   :  { %v4594_v61 = vmul.f32 %v9558_v15, %v11159_v42  ;;  %v9560_v36 = vpop.eup %9559 }
0x1732   :  { %9173 = vmatprep.mubr.msk.f32.mxu1 %vm3671_vm12, %v4705_v6  ;;  %v4993_v47 = vmul.f32 %v9560_v36, %v11171_v38  ;;  %v5304_v23 = vadd.f32 %v5300_v52, %v10892_v31 }
0x1733   :  { %9174 = vmatmul.mubr.msk.f32.vlgmr.msra.gmra.mxu1 %vm3671_vm12, %v4707_v8 }
0x1734   :  { %9177 = vmatpush3.msk.msra.mxu1 %vm1816_vm8, %v11146_v50  ;;  %9180 = vmatprep.mubr.msk.f32.mxu1 %vm3671_vm12, %v4592_v19  ;;  %v5308_v48 = vsel %vm748_vm2, %v5304_v23, 0.0 }
0x1735   :  { %9178 = vmatprep.subr.mxu1 %v11148_v13 }
0x1736   :  { %9179 = vmatpush3.msra.mxu1 %v11148_v13 }
0x1737   :  { %9190 = vmatprep.subr.msk.mxu1 %vm1816_vm8, %v4997_v18  ;;  %9181 = vmatmul.mubr.msk.f32.vlgmr.msra.gmra.mxu1 %vm3671_vm12, %v4594_v61 }
0x1738   :  { %9191 = vmatpush3.msk.msra.mxu1 %vm1816_vm8, %v4997_v18 }
0x1739   :  { %9192 = vmatprep.subr.mxu1 %v4995_v0 }
0x173a   :  { %9193 = vmatpush3.msra.mxu1 %v4995_v0 }
0x173b   :  { %9197 = vmatprep.subr.msk.mxu1 %vm3585_vm10, %v5091_v35 }
0x1789   :  { %v4986_v34 = vpop.xlane.xlu1 %4985 }
0x178a   :  { %9561 = vrcp.f32 %v4986_v34 }
0x178d   :  { %v5087_v42 = vpop.permute.xlu1 %5086 }
0x1797   :  { %v9562_v22 = vpop.eup %9561 }
0x1798   :  { %v4991_v54 = vmul.f32 %v9562_v22, %v9550_v27  ;;  %v11243_v22 = vrot.slane %v10927_v56, %v10578_v33 }
0x179a   :  { %9194 = vmatprep.mubr.msk.f32.mxu1 %vm3671_vm12, %v4991_v54 }
0x179b   :  { %9195 = vmatmul.mubr.msk.f32.vlgmr.msra.gmra.mxu1 %vm3671_vm12, %v4993_v47 }
0x179c   :  { %9198 = vmatpush3.xpose.msk.msra.mxu1 %vm3585_vm10, %v5091_v35  ;;  %9201 = vmatprep.mubr.msk.f32.mxu1 %vm3585_vm10, %v5085_v1 }
0x179d   :  { %9199 = vmatprep.subr.msk.mxu1 %vm3585_vm10, %v5089_v25 }
0x17a0   :  { %9200 = vmatpush3.xpose.msk.msra.mxu1 %vm3585_vm10, %v5089_v25  ;;  %v11239_v25 = vrot.slane %v10927_v56, %v10194_v16 }
0x17a3   :  { %9202 = vmatmul.mubr.msk.f32.vlgmr.msra.gmra.mxu1 %vm3585_vm10, %v5087_v42 }
0x17f3   :  { %v9175_v53 = vpop.f32.mrf.mxu1 }
0x17f5   :  { %v4789_v59 = vpop.f32.mrf.mxu1 }
0x17f7   :  { %v9182_v30 = vpop.f32.mrf.mxu1 }
0x17f8   :  { %v4878_v37 = vadd.f32 %v9182_v30, %v9175_v53 }
0x17f9   :  { %v4872_v4 = vpop.f32.mrf.mxu1 }
0x17fa   :  { %v4873_v21 = vadd.f32 %v4872_v4, %v4789_v59 }
0x185b   :  { %v9196_v28 = vpop.f32.mrf.mxu1 }
0x185c   :  { %v11212_v26 = vadd.f32 %v9196_v28, %v4878_v37 }
0x185d   :  { %v5073_v9 = vpop.f32.mrf.mxu1 }
0x185e   :  { %v11214_v32 = vadd.f32 %v5073_v9, %v4873_v21 }
0x1863   :  { %v9203_v63 = vpop.f32.mrf.mxu1 }
0x1864   :  { %v5178_v38 = vsel %vm3675_vm11, %v9203_v63, -inf }
0x1865   :  { %5179 = vmax.xlane.f32.xlu1 %v5178_v38  ;;  %v5166_v55 = vpop.f32.mrf.mxu1 }
0x1866   :  { %v5175_v14 = vsel %vm3671_vm12, %v5166_v55, -inf }
0x1867   :  { %5176 = vmax.xlane.f32.xlu0 %v5175_v14 }
0x1876   :  { %5199 = vrot.lane.b32.xlu1 %v11146_v50, %s9833_s14 }
0x189a   :  { %5309 = vadd.xlane.f32.xlu1 %v5308_v48 }
0x18ee   :  { %v5180_v24 = vpop.xlane.xlu1 %5179 }
0x18ef   :  { %v5182_v29 = vsub.f32 %v9203_v63, %v5180_v24 }
0x18f0   :  { %v5177_v58 = vpop.xlane.xlu0 %5176 }
0x18f1   :  { %v5185_v18 = vmul.f32 1.442695, %v5182_v29  ;;  %v5181_v57 = vsub.f32 %v5166_v55, %v5177_v58 }
0x18f2   :  { %v5200_v3 = vpop.permute.xlu1 %5199 }
0x18f3   :  { %9563 = vpow2.f32 %v5185_v18  ;;  %v5183_v50 = vmul.f32 1.442695, %v5181_v57  ;;  %9204 = vmatprep.subr.msk.mxu0 %vm1816_vm8, %v5200_v3  ;;  %v5380_v57 = vld [vmem:[#allocation9 + $0x18] sm:$0xff] }
0x18f4   :  { %9205 = vmatpush3.msk.msra.mxu0 %vm1816_vm8, %v5200_v3  ;;  %v5379_v3 = vld [vmem:[#allocation9 + $0x10] sm:$0xff] }
0x18f5   :  { %9565 = vpow2.f32 %v5183_v50  ;;  %v5377_v50 = vld [vmem:[#allocation9] sm:$0xff] }
0x1900   :  { %v9564_v2 = vpop.eup %9563 }
0x1901   :  { %v5190_v46 = vsel %vm3675_vm11, %v9564_v2, 0.0 }
0x1902   :  { %v9566_v31 = vpop.eup %9565  ;;  %5191 = vadd.xlane.f32.xlu0 %v5190_v46 }
0x1903   :  { %v5187_v27 = vsel %vm3671_vm12, %v9566_v31, 0.0 }
0x1906   :  { %5188 = vadd.xlane.f32.xlu0 %v5187_v27 }
0x191c   :  { %5197 = vrot.lane.b32.xlu0 %v11148_v13, %s9833_s14 }
0x1923   :  { %v5310_v49 = vpop.xlane.xlu1 %5309 }
0x1924   :  { %v5321_v0 = vmul.f32 0.03125, %v5310_v49 }
0x1926   :  { %v5325_v40 = vsub.f32 %v5304_v23, %v5321_v0 }
0x1928   :  { %v5329_v11 = vmul.f32 %v5325_v40, %v5325_v40 }
0x192a   :  { %v5333_v43 = vsel %vm748_vm2, %v5329_v11, 0.0 }
0x192b   :  { %5334 = vadd.xlane.f32.xlu1 %v5333_v43 }
0x198b   :  { %v5192_v51 = vpop.xlane.xlu0 %5191 }
0x198c   :  { %9567 = vrcp.f32 %v5192_v51 }
0x198f   :  { %v5189_v10 = vpop.xlane.xlu0 %5188 }
0x1990   :  { %9569 = vrcp.f32 %v5189_v10 }
0x1993   :  { %v5198_v6 = vpop.permute.xlu0 %5197 }
0x1994   :  { %9206 = vmatprep.subr.mxu0 %v5198_v6 }
0x1995   :  { %9207 = vmatpush3.msra.mxu0 %v5198_v6 }
0x1996   :  { %9211 = vmatprep.subr.mxu0 %v5380_v57 }
0x1999   :  { %v9568_v8 = vpop.eup %9567 }
0x199a   :  { %v5196_v17 = vmul.f32 %v9568_v8, %v9564_v2 }
0x199d   :  { %v9570_v15 = vpop.eup %9569 }
0x199e   :  { %v5194_v19 = vmul.f32 %v9570_v15, %v9566_v31 }
0x19a0   :  { %9208 = vmatprep.mubr.msk.f32.mxu0 %vm3671_vm12, %v5194_v19 }
0x19a1   :  { %9209 = vmatmul.mubr.msk.f32.vlgmr.msra.gmra.mxu0 %vm3671_vm12, %v5196_v17 }
0x19a2   :  { %9212 = vmatpush3.msra.mxu0 %v5380_v57 }
0x19a3   :  { %9213 = vmatprep.subr.mxu0 %v5379_v3 }
0x19a4   :  { %9214 = vmatpush3.msra.mxu0 %v5379_v3 }
0x19b4   :  { %v5335_v13 = vpop.xlane.xlu1 %5334 }
0x19b5   :  { %v5345_v61 = vmul.f32 0.03125, %v5335_v13 }
0x19b7   :  { %v5349_v35 = vadd.f32 1e-05, %v5345_v61 }
0x19b9   :  { %9571 = vrsqrt.f32 %v5349_v35  ;;  %v5525_v35 = vld [vmem:[%s11781_s9 + $0x38] sm:$0xff] }
0x19ba   :  { %9225 = vmatprep.subr.mxu1 %v5525_v35 }
0x19bb   :  { %9226 = vmatpush3.msra.mxu1 %v5525_v35 }
0x19c6   :  { %v9572_v34 = vpop.eup %9571 }
0x19c7   :  { %v5357_v36 = vmul.f32 %v9572_v34, %v5325_v40  ;;  %v5524_v34 = vld [vmem:[%s11781_s9 + $0x30] sm:$0xff] }
0x19c8   :  { %9227 = vmatprep.subr.mxu1 %v5524_v34 }
0x19c9   :  { %v5365_v54 = vmul.f32 %v11239_v25, %v5357_v36  ;;  %v5523_v36 = vld [vmem:[%s11781_s9 + $0x28] sm:$0xff]  ;;  %9228 = vmatpush3.msra.mxu1 %v5524_v34 }
0x19ca   :  { %9229 = vmatprep.subr.mxu1 %v5523_v36 }
0x19cb   :  { %v11247_v47 = vadd.f32 %v11243_v22, %v5365_v54  ;;  %v5522_v54 = vld [vmem:[%s11781_s9 + $0x20] sm:$0xff]  ;;  %9230 = vmatpush3.msra.mxu1 %v5523_v36 }
0x19cc   :  { %9231 = vmatprep.subr.mxu1 %v5522_v54 }
0x19cd   :  { %9219 = vmatprep.mubr.msk.f32.mxu0 %vm748_vm2, %v11247_v47  ;;  %9232 = vmatpush3.msra.mxu1 %v5522_v54 }
0x1a61   :  { %v9210_v1 = vpop.f32.mrf.mxu0 }
0x1a62   :  { %v5286_v42 = vadd.f32 %v9210_v1, %v11212_v26  ;;  %v5521_v1 = vld [vmem:[%s11781_s9 + $0x18] sm:$0xff] }
0x1a63   :  { %v5276_v53 = vpop.f32.mrf.mxu0  ;;  %9233 = vmatprep.subr.mxu1 %v5521_v1 }
0x1a64   :  { %v5285_v59 = vadd.f32 %v5276_v53, %v11214_v32  ;;  %v5290_v30 = vrot.slane %v5286_v42, 2  ;;  %v5520_v42 = vld [vmem:[%s11781_s9 + $0x10] sm:$0xff]  ;;  %9234 = vmatpush3.msra.mxu1 %v5521_v1  ;;  %v5519_v53 = vld [vmem:[%s11781_s9 + $0x8] sm:$0xff] }
0x1a65   :  { %9235 = vmatprep.subr.mxu1 %v5520_v42 }
0x1a66   :  { %v5289_v37 = vrot.slane %v5285_v59, 2  ;;  %9236 = vmatpush3.msra.mxu1 %v5520_v42  ;;  %v5518_v59 = vld [vmem:[%s11781_s9] sm:$0xff] }
0x1a67   :  { %9237 = vmatprep.subr.mxu1 %v5519_v53 }
0x1a68   :  { %v5291_v4 = vsel %vm1816_vm8, %v5289_v37, %v5290_v30  ;;  %v5295_v56 = vsel %vm1816_vm8, %v11141_v62, %v5289_v37  ;;  %v5303_v62 = vadd.f32 %v11222_v7, %v5290_v30  ;;  %9238 = vmatpush3.msra.mxu1 %v5519_v53 }
0x1a69   :  { %v5301_v28 = vadd.f32 %v11222_v7, %v5295_v56  ;;  %v5302_v21 = vadd.f32 %v11222_v7, %v5291_v4  ;;  %v5378_v7 = vld [vmem:[#allocation9 + $0x8] sm:$0xff]  ;;  %9239 = vmatprep.subr.mxu1 %v5518_v59 }
0x1a6a   :  { %v5307_v58 = vadd.f32 %v5303_v62, %v10901_v60  ;;  %9215 = vmatprep.subr.mxu0 %v5378_v7  ;;  %9240 = vmatpush3.msra.mxu1 %v5518_v59 }
0x1a6b   :  { %v5305_v9 = vadd.f32 %v5301_v28, %v10897_v39  ;;  %v5306_v63 = vadd.f32 %v5302_v21, %v10905_v5  ;;  %9216 = vmatpush3.msra.mxu0 %v5378_v7 }
0x1a6c   :  { %v5318_v18 = vsel %vm5317_vm13, %v5307_v58, 0.0  ;;  %9217 = vmatprep.subr.mxu0 %v5377_v50 }
0x1a6d   :  { %v5311_v26 = vsel %vm748_vm2, %v5305_v9, 0.0  ;;  %v5314_v38 = vsel %vm748_vm2, %v5306_v63, 0.0  ;;  %9218 = vmatpush3.msra.mxu0 %v5377_v50 }
0x1a6e   :  { %5312 = vadd.xlane.f32.xlu0 %v5311_v26  ;;  %5315 = vadd.xlane.f32.xlu1 %v5314_v38  ;;  %v11829_v26 = vld [vmem:[#allocation20_spill] sm:$0xff] }
0x1af7   :  { %v5313_v32 = vpop.xlane.xlu0 %5312  ;;  %v5316_v55 = vpop.xlane.xlu1 %5315 }
0x1af8   :  { %v5322_v14 = vmul.f32 0.03125, %v5313_v32  ;;  %v5323_v52 = vmul.f32 0.03125, %v5316_v55 }
0x1afa   :  { %v5326_v23 = vsub.f32 %v5305_v9, %v5322_v14  ;;  %v5327_v48 = vsub.f32 %v5306_v63, %v5323_v52  ;;  %v11310_v63 = vld [vmem:[#allocation10] sm:$0xff] }
0x1afb   :  { %v5384_v38 = vrot.slane %v11310_v63, %v11829_v26 }
0x1afc   :  { %v5330_v24 = vmul.f32 %v5326_v23, %v5326_v23  ;;  %v5331_v29 = vmul.f32 %v5327_v48, %v5327_v48 }
0x1afe   :  { %v5336_v39 = vsel %vm748_vm2, %v5330_v24, 0.0  ;;  %v5339_v5 = vsel %vm748_vm2, %v5331_v29, 0.0 }
0x1aff   :  { %5337 = vadd.xlane.f32.xlu0 %v5336_v39  ;;  %5340 = vadd.xlane.f32.xlu1 %v5339_v5 }
0x1b03   :  { %5319 = vadd.xlane.f32.xlu0 %v5318_v18 }
0x1b88   :  { %v5338_v2 = vpop.xlane.xlu0 %5337  ;;  %v5341_v60 = vpop.xlane.xlu1 %5340 }
0x1b89   :  { %v5346_v46 = vmul.f32 0.03125, %v5338_v2  ;;  %v5347_v31 = vmul.f32 0.03125, %v5341_v60 }
0x1b8b   :  { %v5350_v27 = vadd.f32 1e-05, %v5346_v46  ;;  %v5351_v49 = vadd.f32 1e-05, %v5347_v31 }
0x1b8c   :  { %v5320_v0 = vpop.xlane.xlu0 %5319 }
0x1b8d   :  { %9573 = vrsqrt.f32 %v5350_v27  ;;  %v5324_v40 = vmul.f32 0.03125, %v5320_v0 }
0x1b8e   :  { %9575 = vrsqrt.f32 %v5351_v49 }
0x1b8f   :  { %v5328_v11 = vsub.f32 %v5307_v58, %v5324_v40 }
0x1b91   :  { %v5332_v43 = vmul.f32 %v5328_v11, %v5328_v11 }
0x1b93   :  { %v5342_v51 = vsel %vm5317_vm13, %v5332_v43, 0.0 }
0x1b94   :  { %5343 = vadd.xlane.f32.xlu0 %v5342_v51 }
0x1b9a   :  { %v9574_v10 = vpop.eup %9573 }
0x1b9b   :  { %v9576_v6 = vpop.eup %9575  ;;  %v5358_v8 = vmul.f32 %v9574_v10, %v5326_v23 }
0x1b9c   :  { %v5359_v15 = vmul.f32 %v9576_v6, %v5327_v48 }
0x1b9d   :  { %v5366_v19 = vmul.f32 %v11239_v25, %v5358_v8 }
0x1b9e   :  { %v5367_v17 = vmul.f32 %v11239_v25, %v5359_v15 }
0x1b9f   :  { %v11271_v13 = vadd.f32 %v11243_v22, %v5366_v19 }
0x1ba0   :  { %v11274_v61 = vadd.f32 %v11243_v22, %v5367_v17 }
0x1ba1   :  { %9220 = vmatmul.mubr.msk.f32.vlgmr.msra.gmra.mxu0 %vm748_vm2, %v11271_v13 }
0x1ba2   :  { %9222 = vmatprep.mubr.msk.f32.mxu0 %vm748_vm2, %v11274_v61 }
0x1c1d   :  { %v5344_v30 = vpop.xlane.xlu0 %5343 }
0x1c1e   :  { %v5348_v37 = vmul.f32 0.03125, %v5344_v30  ;;  %v5529_v30 = vrot.slane %v11310_v63, %v10715_v20 }
0x1c20   :  { %v5352_v4 = vadd.f32 1e-05, %v5348_v37 }
0x1c22   :  { %9577 = vrsqrt.f32 %v5352_v4 }
0x1c2f   :  { %v9578_v56 = vpop.eup %9577 }
0x1c30   :  { %v5360_v28 = vmul.f32 %v9578_v56, %v5328_v11 }
0x1c32   :  { %v5368_v21 = vmul.f32 %v11239_v25, %v5360_v28 }
0x1c34   :  { %v11306_v9 = vadd.f32 %v11243_v22, %v5368_v21 }
0x1c36   :  { %9223 = vmatmul.mubr.msk.f32.gmra.mxu0 %vm748_vm2, %v11306_v9 }
0x1c61   :  { %v9221_v32 = vpop.f32.mrf.mxu0 }
0x1c62   :  { %v5469_v55 = vadd.f32 %v9221_v32, %v5384_v38 }
0x1c63   :  { %v5463_v14 = vpop.f32.mrf.mxu0 }
0x1c64   :  { %v5487_v52 = vmul.f32 0.044715, %v5469_v55  ;;  %v5464_v62 = vadd.f32 %v5463_v14, %v5384_v38  ;;  %v5483_v2 = vmul.f32 0.5, %v5469_v55 }
0x1c66   :  { %v5491_v23 = vmul.f32 %v5487_v52, %v5469_v55  ;;  %v5486_v48 = vmul.f32 0.044715, %v5464_v62  ;;  %v5482_v7 = vmul.f32 0.5, %v5464_v62 }
0x1c68   :  { %v5495_v24 = vmul.f32 %v5491_v23, %v5469_v55  ;;  %v5490_v25 = vmul.f32 %v5486_v48, %v5464_v62 }
0x1c6a   :  { %v5499_v29 = vadd.f32 %v5495_v24, %v5469_v55  ;;  %v5494_v22 = vmul.f32 %v5490_v25, %v5464_v62 }
0x1c6c   :  { %v5503_v39 = vmul.f32 0.7978846, %v5499_v29  ;;  %v5498_v5 = vadd.f32 %v5494_v22, %v5464_v62 }
0x1c6e   :  { %9579 = vtanh.f32 %v5503_v39  ;;  %v5502_v58 = vmul.f32 0.7978846, %v5498_v5 }
0x1c70   :  { %9581 = vtanh.f32 %v5502_v58 }
0x1c7b   :  { %v9580_v18 = vpop.eup %9579 }
0x1c7c   :  { %v5511_v3 = vadd.f32 1.0, %v9580_v18 }
0x1c7d   :  { %v9582_v57 = vpop.eup %9581 }
0x1c7e   :  { %v5510_v50 = vadd.f32 1.0, %v9582_v57  ;;  %v5515_v46 = vmul.f32 %v5511_v3, %v5483_v2  ;;  %v5704_v2 = vld [vmem:[#allocation6 + $0x30] sm:$0xff] }
0x1c80   :  { %v5514_v60 = vmul.f32 %v5510_v50, %v5482_v7  ;;  %v5705_v50 = vld [vmem:[#allocation6 + $0x38] sm:$0xff] }
0x1c81   :  { %9247 = vmatprep.subr.mxu0 %v5705_v50 }
0x1c82   :  { %9241 = vmatprep.mubr.msk.f32.mxu1 %vm187_vm4, %v5514_v60  ;;  %9248 = vmatpush3.msra.mxu0 %v5705_v50  ;;  %v5703_v60 = vld [vmem:[#allocation6 + $0x28] sm:$0xff] }
0x1c83   :  { %9242 = vmatmul.mubr.msk.f32.vlgmr.msra.gmra.mxu1 %vm187_vm4, %v5515_v46  ;;  %9249 = vmatprep.subr.mxu0 %v5704_v2 }
0x1c84   :  { %9250 = vmatpush3.msra.mxu0 %v5704_v2 }
0x1c85   :  { %9251 = vmatprep.subr.mxu0 %v5703_v60 }
0x1c86   :  { %9252 = vmatpush3.msra.mxu0 %v5703_v60 }
0x1cf6   :  { %v9224_v31 = vpop.f32.mrf.mxu0 }
0x1cf7   :  { %v5479_v27 = vadd.f32 %v9224_v31, %v5384_v38 }
0x1cf8   :  { %v5473_v49 = vpop.f32.mrf.mxu0 }
0x1cf9   :  { %v5489_v0 = vmul.f32 0.044715, %v5479_v27  ;;  %v5474_v40 = vadd.f32 %v5473_v49, %v5384_v38  ;;  %v5485_v42 = vmul.f32 0.5, %v5479_v27 }
0x1cfb   :  { %v5493_v11 = vmul.f32 %v5489_v0, %v5479_v27  ;;  %v5488_v43 = vmul.f32 0.044715, %v5474_v40  ;;  %v5484_v54 = vmul.f32 0.5, %v5474_v40 }
0x1cfd   :  { %v5497_v51 = vmul.f32 %v5493_v11, %v5479_v27  ;;  %v5492_v10 = vmul.f32 %v5488_v43, %v5474_v40 }
0x1cff   :  { %v5501_v6 = vadd.f32 %v5497_v51, %v5479_v27  ;;  %v5496_v8 = vmul.f32 %v5492_v10, %v5474_v40 }
0x1d01   :  { %v5500_v15 = vadd.f32 %v5496_v8, %v5474_v40  ;;  %v5505_v19 = vmul.f32 0.7978846, %v5501_v6 }
0x1d03   :  { %v5504_v17 = vmul.f32 0.7978846, %v5500_v15  ;;  %9583 = vtanh.f32 %v5505_v19 }
0x1d05   :  { %9585 = vtanh.f32 %v5504_v17 }
0x1d10   :  { %v9584_v35 = vpop.eup %9583 }
0x1d11   :  { %v5513_v36 = vadd.f32 1.0, %v9584_v35 }
0x1d12   :  { %v9586_v34 = vpop.eup %9585 }
0x1d13   :  { %v5512_v1 = vadd.f32 1.0, %v9586_v34  ;;  %v5517_v59 = vmul.f32 %v5513_v36, %v5485_v42  ;;  %v5686_v34 = vrot.slane %v11310_v63, %v10883_v44 }
0x1d15   :  { %v5516_v53 = vmul.f32 %v5512_v1, %v5484_v54 }
0x1d17   :  { %9244 = vmatprep.mubr.msk.f32.mxu1 %vm187_vm4, %v5516_v53  ;;  %v5694_v53 = vrot.slane %v11310_v63, %v10886_v45  ;;  %v11350_v63 = vld [vmem:[#allocation7 + $0x28] sm:$0xff] }
0x1d18   :  { %9245 = vmatmul.mubr.msk.f32.gmra.mxu1 %vm187_vm4, %v5517_v59 }
0x1d43   :  { %v9243_v37 = vpop.f32.mrf.mxu1 }
0x1d44   :  { %v5614_v4 = vadd.f32 %v9243_v37, %v5529_v30 }
0x1d45   :  { %v5608_v56 = vpop.f32.mrf.mxu1 }
0x1d46   :  { %v5628_v28 = vadd.f32 %v5614_v4, %v11271_v13  ;;  %v5609_v21 = vadd.f32 %v5608_v56, %v5529_v30  ;;  %v11344_v4 = vld [vmem:[#allocation7 + $0x38] sm:$0xff]  ;;  %v11346_v56 = vld [vmem:[#allocation7 + $0x30] sm:$0xff] }
0x1d48   :  { %v5627_v38 = vadd.f32 %v5609_v21, %v11247_v47  ;;  %v5634_v32 = vsel %vm748_vm2, %v5628_v28, 0.0 }
0x1d49   :  { %5635 = vadd.xlane.f32.xlu0 %v5634_v32 }
0x1d4a   :  { %v5631_v55 = vsel %vm748_vm2, %v5627_v38, 0.0 }
0x1d4b   :  { %5632 = vadd.xlane.f32.xlu1 %v5631_v55 }
0x1dd2   :  { %v5636_v14 = vpop.xlane.xlu0 %5635 }
0x1dd3   :  { %v5644_v52 = vmul.f32 0.03125, %v5636_v14 }
0x1dd4   :  { %v5633_v62 = vpop.xlane.xlu1 %5632 }
0x1dd5   :  { %v5648_v23 = vsub.f32 %v5628_v28, %v5644_v52  ;;  %v5643_v48 = vmul.f32 0.03125, %v5633_v62  ;;  %v11354_v28 = vld [vmem:[#allocation7 + $0x20] sm:$0xff] }
0x1dd7   :  { %v5647_v24 = vsub.f32 %v5627_v38, %v5643_v48  ;;  %v5652_v25 = vmul.f32 %v5648_v23, %v5648_v23 }
0x1dd8   :  { %v9246_v29 = vpop.f32.mrf.mxu1 }
0x1dd9   :  { %v5624_v22 = vadd.f32 %v9246_v29, %v5529_v30  ;;  %v5658_v13 = vsel %vm748_vm2, %v5652_v25, 0.0  ;;  %v5651_v39 = vmul.f32 %v5647_v24, %v5647_v24 }
0x1dda   :  { %5659 = vadd.xlane.f32.xlu0 %v5658_v13  ;;  %v5618_v47 = vpop.f32.mrf.mxu1 }
0x1ddb   :  { %v5630_v5 = vadd.f32 %v5624_v22, %v11306_v9  ;;  %v5619_v58 = vadd.f32 %v5618_v47, %v5529_v30  ;;  %v5655_v18 = vsel %vm748_vm2, %v5651_v39, 0.0  ;;  %v5702_v9 = vld [vmem:[#allocation6 + $0x20] sm:$0xff]  ;;  %v11368_v39 = vld [vmem:[#allocation10 + $0x8] sm:$0xff] }
0x1ddc   :  { %5656 = vadd.xlane.f32.xlu1 %v5655_v18  ;;  %9253 = vmatprep.subr.mxu0 %v5702_v9  ;;  %v5709_v47 = vrot.slane %v11368_v39, %v11828_v41 }
0x1ddd   :  { %v5629_v57 = vadd.f32 %v5619_v58, %v11274_v61  ;;  %v5640_v3 = vsel %vm5317_vm13, %v5630_v5, 0.0  ;;  %9254 = vmatpush3.msra.mxu0 %v5702_v9 }
0x1dde   :  { %5641 = vadd.xlane.f32.xlu0 %v5640_v3  ;;  %9261 = vmatprep.subr.mxu0 %v11344_v4 }
0x1ddf   :  { %v5637_v7 = vsel %vm748_vm2, %v5629_v57, 0.0 }
0x1de0   :  { %5638 = vadd.xlane.f32.xlu1 %v5637_v7 }
0x1e63   :  { %v5660_v46 = vpop.xlane.xlu0 %5659 }
0x1e64   :  { %v5668_v61 = vmul.f32 0.03125, %v5660_v46 }
0x1e65   :  { %v5657_v31 = vpop.xlane.xlu1 %5656 }
0x1e66   :  { %v5672_v27 = vadd.f32 1e-05, %v5668_v61  ;;  %v5667_v49 = vmul.f32 0.03125, %v5657_v31 }
0x1e67   :  { %v5642_v0 = vpop.xlane.xlu0 %5641 }
0x1e68   :  { %9587 = vrsqrt.f32 %v5672_v27  ;;  %v5671_v40 = vadd.f32 1e-05, %v5667_v49  ;;  %v5646_v11 = vmul.f32 0.03125, %v5642_v0 }
0x1e69   :  { %v5639_v43 = vpop.xlane.xlu1 %5638 }
0x1e6a   :  { %9589 = vrsqrt.f32 %v5671_v40  ;;  %v5650_v51 = vsub.f32 %v5630_v5, %v5646_v11  ;;  %v5645_v10 = vmul.f32 0.03125, %v5639_v43 }
0x1e6c   :  { %v5649_v6 = vsub.f32 %v5629_v57, %v5645_v10  ;;  %v5654_v8 = vmul.f32 %v5650_v51, %v5650_v51 }
0x1e6e   :  { %v5664_v15 = vsel %vm5317_vm13, %v5654_v8, 0.0  ;;  %v5653_v19 = vmul.f32 %v5649_v6, %v5649_v6 }
0x1e6f   :  { %5665 = vadd.xlane.f32.xlu0 %v5664_v15 }
0x1e70   :  { %v5661_v17 = vsel %vm748_vm2, %v5653_v19, 0.0 }
0x1e71   :  { %5662 = vadd.xlane.f32.xlu1 %v5661_v17 }
0x1e75   :  { %v9588_v35 = vpop.eup %9587 }
0x1e76   :  { %v5680_v36 = vmul.f32 %v9588_v35, %v5648_v23 }
0x1e77   :  { %v9590_v54 = vpop.eup %9589 }
0x1e78   :  { %v5679_v1 = vmul.f32 %v9590_v54, %v5647_v24  ;;  %v5688_v42 = vmul.f32 %v5686_v34, %v5680_v36 }
0x1e7a   :  { %v5687_v59 = vmul.f32 %v5686_v34, %v5679_v1  ;;  %v11338_v37 = vadd.f32 %v5694_v53, %v5688_v42 }
0x1e7c   :  { %v11336_v30 = vadd.f32 %v5694_v53, %v5687_v59 }
0x1e7e   :  { %9255 = vmatprep.mubr.msk.f32.mxu0 %vm748_vm2, %v11336_v30 }
0x1e7f   :  { %9256 = vmatmul.mubr.msk.f32.vlgmr.msra.gmra.mxu0 %vm748_vm2, %v11338_v37 }
0x1e80   :  { %9262 = vmatpush3.msra.mxu0 %v11344_v4 }
0x1e81   :  { %9263 = vmatprep.subr.mxu0 %v11346_v56 }
0x1e82   :  { %9264 = vmatpush3.msra.mxu0 %v11346_v56 }
0x1e83   :  { %9265 = vmatprep.subr.mxu0 %v11350_v63 }
0x1e84   :  { %9266 = vmatpush3.msra.mxu0 %v11350_v63 }
0x1e85   :  { %9267 = vmatprep.subr.mxu0 %v11354_v28 }
0x1e86   :  { %9268 = vmatpush3.msra.mxu0 %v11354_v28 }
0x1ef8   :  { %v5666_v21 = vpop.xlane.xlu0 %5665 }
0x1ef9   :  { %v5670_v38 = vmul.f32 0.03125, %v5666_v21 }
0x1efa   :  { %v5663_v32 = vpop.xlane.xlu1 %5662 }
0x1efb   :  { %v5674_v55 = vadd.f32 1e-05, %v5670_v38  ;;  %v5669_v14 = vmul.f32 0.03125, %v5663_v32 }
0x1efd   :  { %9591 = vrsqrt.f32 %v5674_v55  ;;  %v5673_v52 = vadd.f32 1e-05, %v5669_v14 }
0x1eff   :  { %9593 = vrsqrt.f32 %v5673_v52 }
0x1f0a   :  { %v9592_v62 = vpop.eup %9591 }
0x1f0b   :  { %v5682_v23 = vmul.f32 %v9592_v62, %v5650_v51 }
0x1f0c   :  { %v9594_v48 = vpop.eup %9593 }
0x1f0d   :  { %v5681_v24 = vmul.f32 %v9594_v48, %v5649_v6  ;;  %v5690_v25 = vmul.f32 %v5686_v34, %v5682_v23 }
0x1f0f   :  { %v5689_v29 = vmul.f32 %v5686_v34, %v5681_v24  ;;  %v11362_v13 = vadd.f32 %v5694_v53, %v5690_v25 }
0x1f11   :  { %v11360_v22 = vadd.f32 %v5694_v53, %v5689_v29 }
0x1f13   :  { %9258 = vmatprep.mubr.msk.f32.mxu0 %vm748_vm2, %v11360_v22 }
0x1f14   :  { %9259 = vmatmul.mubr.msk.f32.gmra.mxu0 %vm748_vm2, %v11362_v13 }
0x1f3f   :  { %v9257_v5 = vpop.f32.mrf.mxu0 }
0x1f40   :  { %v11372_v58 = vadd.f32 %v9257_v5, %v5709_v47 }
0x1f41   :  { %v5788_v18 = vpop.f32.mrf.mxu0 }
0x1f42   :  { %v11374_v57 = vadd.f32 %v5788_v18, %v5709_v47  ;;  %6016 = vrot.lane.b32.xlu0 %v11372_v58, %s9826_s20  ;;  %5818 = vrot.lane.b32.xlu1 %v11372_v58, %s9825_s5  ;;  %v11398_v41 = vmul.f32 0.35355338, %v11372_v58 }
0x1f44   :  { %v11381_v3 = vmul.f32 0.35355338, %v11374_v57 }
0x1f46   :  { %6014 = vrot.lane.b32.xlu0 %v11374_v57, %s9826_s20  ;;  %9276 = vmatprep.mubr.msk.f32.mxu1 %vm3585_vm10, %v11381_v3 }
0x1f47   :  { %5901 = vrot.lane.b32.xlu1 %v11372_v58, %s9827_s21 }
0x1f4a   :  { %5899 = vrot.lane.b32.xlu0 %v11374_v57, %s9827_s21 }
0x1f4b   :  { %5816 = vrot.lane.b32.xlu1 %v11374_v57, %s9825_s5 }
0x1f4e   :  { %6302 = vrot.lane.b32.xlu0 %v11372_v58, %s9829_s30 }
0x1f4f   :  { %6010 = vrot.lane.b32.xlu1 %v11381_v3, %s9828_s29 }
0x1f52   :  { %6296 = vrot.lane.b32.xlu0 %v11381_v3, %s9830_s3 }
0x1f53   :  { %6012 = vrot.lane.b32.xlu1 %v11398_v41, %s9828_s29 }
0x1f57   :  { %6300 = vrot.lane.b32.xlu1 %v11374_v57, %s9829_s30 }
0x1f5b   :  { %6298 = vrot.lane.b32.xlu1 %v11398_v41, %s9830_s3 }
0x1fb4   :  { %v6017_v7 = vpop.permute.xlu0 %6016  ;;  %v5819_v50 = vpop.permute.xlu1 %5818 }
0x1fb5   :  { %9279 = vmatprep.subr.msk.mxu0 %vm3585_vm10, %v6017_v7 }
0x1fb8   :  { %v6015_v2 = vpop.permute.xlu0 %6014 }
0x1fb9   :  { %v5902_v60 = vpop.permute.xlu1 %5901 }
0x1fba   :  { %9272 = vmatprep.subr.msk.mxu1 %vm3585_vm10, %v5902_v60 }
0x1fbb   :  { %9273 = vmatpush3.xpose.msk.msra.mxu1 %vm3585_vm10, %v5902_v60 }
0x1fbc   :  { %v5900_v9 = vpop.permute.xlu0 %5899 }
0x1fbd   :  { %v5817_v46 = vpop.permute.xlu1 %5816  ;;  %9274 = vmatprep.subr.msk.mxu1 %vm3585_vm10, %v5900_v9 }
0x1fbe   :  { %9269 = vmatprep.mubr.msk.f32.mxu0 %vm748_vm2, %v5817_v46 }
0x1fbf   :  { %9270 = vmatmul.mubr.msk.f32.vlgmr.msra.gmra.mxu0 %vm748_vm2, %v5819_v50  ;;  %9275 = vmatpush3.xpose.msk.msra.mxu1 %vm3585_vm10, %v5900_v9 }
0x1fc0   :  { %9280 = vmatpush3.xpose.msk.msra.mxu0 %vm3585_vm10, %v6017_v7  ;;  %v6303_v61 = vpop.permute.xlu0 %6302 }
0x1fc1   :  { %9281 = vmatprep.subr.msk.mxu0 %vm3585_vm10, %v6015_v2  ;;  %v6011_v31 = vpop.permute.xlu1 %6010 }
0x1fc2   :  { %9277 = vmatmul.mubr.msk.f32.vlgmr.msra.gmra.mxu1 %vm3585_vm10, %v11398_v41  ;;  %9283 = vmatprep.mubr.msk.f32.mxu0 %vm3585_vm10, %v6011_v31 }
0x1fc4   :  { %9282 = vmatpush3.xpose.msk.msra.mxu0 %vm3585_vm10, %v6015_v2  ;;  %v6297_v27 = vpop.permute.xlu0 %6296 }
0x1fc5   :  { %9300 = vmatprep.subr.msk.mxu0 %vm3585_vm10, %v6303_v61  ;;  %v6013_v49 = vpop.permute.xlu1 %6012 }
0x1fc7   :  { %9284 = vmatmul.mubr.msk.f32.vlgmr.msra.gmra.mxu0 %vm3585_vm10, %v6013_v49 }
0x1fc8   :  { %9301 = vmatpush3.xpose.msk.msra.mxu0 %vm3585_vm10, %v6303_v61  ;;  %9304 = vmatprep.mubr.msk.f32.mxu0 %vm3585_vm10, %v6297_v27 }
0x1fc9   :  { %v6301_v0 = vpop.permute.xlu1 %6300 }
0x1fca   :  { %9302 = vmatprep.subr.msk.mxu0 %vm3585_vm10, %v6301_v0 }
0x1fcc   :  { %9303 = vmatpush3.xpose.msk.msra.mxu0 %vm3585_vm10, %v6301_v0 }
0x1fcd   :  { %v6299_v40 = vpop.permute.xlu1 %6298 }
0x1fcf   :  { %9305 = vmatmul.mubr.msk.f32.vlgmr.msra.gmra.mxu0 %vm3585_vm10, %v6299_v40 }
0x1fd4   :  { %v9260_v11 = vpop.f32.mrf.mxu0 }
0x1fd5   :  { %v5804_v43 = vadd.f32 %v9260_v11, %v5709_v47 }
0x1fd6   :  { %v5798_v51 = vpop.f32.mrf.mxu0 }
0x1fd7   :  { %v6703_v10 = vmul.f32 0.35355338, %v5804_v43  ;;  %v11428_v6 = vadd.f32 %v5798_v51, %v5709_v47  ;;  %v6709_v8 = vrot.slane %v5804_v43, 6 }
0x1fd9   :  { %v11431_v15 = vmul.f32 0.35355338, %v11428_v6  ;;  %v6707_v19 = vrot.slane %v11428_v6, 6  ;;  %v6799_v17 = vrot.slane %v6703_v10, 6 }
0x1fdb   :  { %v6797_v35 = vrot.slane %v11431_v15, 6  ;;  %v11438_v34 = vsel %vm1639_vm7, %v6707_v19, %v6709_v8 }
0x1fdd   :  { %v11443_v36 = vsel %vm1639_vm7, %v6797_v35, %v6799_v17 }
0x207f   :  { %v11445_v54 = vpop.f32.mrf.mxu0 }
0x2081   :  { %v11447_v1 = vpop.f32.mrf.mxu0 }
0x2082   :  { %v9278_v42 = vpop.f32.mrf.mxu1 }
0x2083   :  { %v5991_v14 = vsel %vm3675_vm11, %v9278_v42, -inf }
0x2084   :  { %v5979_v32 = vpop.f32.mrf.mxu1 }
0x2085   :  { %v5988_v55 = vsel %vm3671_vm12, %v5979_v32, -inf }
0x2087   :  { %v9285_v53 = vpop.f32.mrf.mxu0 }
0x2088   :  { %v6104_v59 = vsel %vm3675_vm11, %v9285_v53, -inf }
0x2089   :  { %6105 = vmax.xlane.f32.xlu1 %v6104_v59  ;;  %v6092_v21 = vpop.f32.mrf.mxu0 }
0x208a   :  { %v6101_v38 = vsel %vm3671_vm12, %v6092_v21, -inf }
0x208b   :  { %6102 = vmax.xlane.f32.xlu0 %v6101_v38 }
0x208f   :  { %5989 = vmax.xlane.f32.xlu0 %v5988_v55  ;;  %v9306_v52 = vpop.f32.mrf.mxu0 }
0x2090   :  { %v6390_v62 = vsel %vm3675_vm11, %v9306_v52, -inf }
0x2091   :  { %v6378_v23 = vpop.f32.mrf.mxu0 }
0x2092   :  { %v6387_v48 = vsel %vm3671_vm12, %v6378_v23, -inf }
0x2093   :  { %5992 = vmax.xlane.f32.xlu0 %v5991_v14 }
0x2097   :  { %6391 = vmax.xlane.f32.xlu0 %v6390_v62 }
0x209a   :  { %6127 = vrot.lane.b32.xlu1 %v11445_v54, %s9827_s21 }
0x209e   :  { %6411 = vrot.lane.b32.xlu1 %v11445_v54, %s9825_s5 }
0x20ad   :  { %6125 = vrot.lane.b32.xlu0 %v11447_v1, %s9827_s21 }
0x20c2   :  { %6388 = vmax.xlane.f32.xlu1 %v6387_v48 }
0x20d3   :  { %6409 = vrot.lane.b32.xlu1 %v11447_v1, %s9825_s5 }
0x2112   :  { %v6106_v24 = vpop.xlane.xlu1 %6105 }
0x2113   :  { %v6108_v7 = vsub.f32 %v9285_v53, %v6106_v24 }
0x2114   :  { %v6103_v25 = vpop.xlane.xlu0 %6102 }
0x2115   :  { %v6107_v47 = vsub.f32 %v6092_v21, %v6103_v25  ;;  %v6111_v46 = vmul.f32 1.442695, %v6108_v7 }
0x2116   :  { %v6128_v29 = vpop.permute.xlu1 %6127 }
0x2117   :  { %9286 = vmatprep.subr.msk.mxu1 %vm1816_vm8, %v6128_v29  ;;  %v6109_v50 = vmul.f32 1.442695, %v6107_v47 }
0x2118   :  { %v5990_v5 = vpop.xlane.xlu0 %5989  ;;  %9287 = vmatpush3.msk.msra.mxu1 %vm1816_vm8, %v6128_v29 }
0x2119   :  { %v5994_v18 = vsub.f32 %v5979_v32, %v5990_v5 }
0x211a   :  { %v6412_v21 = vpop.permute.xlu1 %6411 }
0x211b   :  { %v5996_v2 = vmul.f32 1.442695, %v5994_v18 }
0x211c   :  { %v5993_v60 = vpop.xlane.xlu0 %5992 }
0x211d   :  { %9595 = vpow2.f32 %v5996_v2  ;;  %v5995_v9 = vsub.f32 %v9278_v42, %v5993_v60 }
0x211e   :  { %9597 = vpow2.f32 %v6109_v50 }
0x211f   :  { %v5998_v61 = vmul.f32 1.442695, %v5995_v9 }
0x2120   :  { %v6392_v31 = vpop.xlane.xlu0 %6391 }
0x2121   :  { %9599 = vpow2.f32 %v5998_v61  ;;  %v6394_v27 = vsub.f32 %v9306_v52, %v6392_v31 }
0x2122   :  { %9601 = vpow2.f32 %v6111_v46 }
0x2123   :  { %v6397_v49 = vmul.f32 1.442695, %v6394_v27 }
0x2124   :  { %v6126_v0 = vpop.permute.xlu0 %6125 }
0x2125   :  { %9288 = vmatprep.subr.mxu1 %v6126_v0  ;;  %9603 = vpow2.f32 %v6397_v49 }
0x2126   :  { %9289 = vmatpush3.msra.mxu1 %v6126_v0 }
0x2127   :  { %9293 = vmatprep.subr.msk.mxu1 %vm1816_vm8, %v11445_v54 }
0x212a   :  { %v9596_v40 = vpop.eup %9595 }
0x212b   :  { %v6000_v11 = vsel %vm3671_vm12, %v9596_v40, 0.0  ;;  %v9598_v43 = vpop.eup %9597 }
0x212c   :  { %6001 = vadd.xlane.f32.xlu1 %v6000_v11  ;;  %v6113_v8 = vsel %vm3671_vm12, %v9598_v43, 0.0 }
0x212e   :  { %v9600_v51 = vpop.eup %9599 }
0x212f   :  { %v6003_v10 = vsel %vm3675_vm11, %v9600_v51, 0.0  ;;  %v9602_v17 = vpop.eup %9601 }
0x2130   :  { %6004 = vadd.xlane.f32.xlu0 %v6003_v10  ;;  %6114 = vadd.xlane.f32.xlu1 %v6113_v8  ;;  %v6116_v42 = vsel %vm3675_vm11, %v9602_v17, 0.0 }
0x2132   :  { %v9604_v53 = vpop.eup %9603 }
0x2133   :  { %v6402_v59 = vsel %vm3675_vm11, %v9604_v53, 0.0 }
0x2134   :  { %6117 = vadd.xlane.f32.xlu0 %v6116_v42 }
0x2138   :  { %6403 = vadd.xlane.f32.xlu0 %v6402_v59 }
0x2141   :  { %6503 = vrot.lane.b32.xlu1 %v11374_v57, %s9831_s12 }
0x214b   :  { %v6389_v38 = vpop.xlane.xlu1 %6388 }
0x214c   :  { %v6393_v32 = vsub.f32 %v6378_v23, %v6389_v38 }
0x214e   :  { %6505 = vrot.lane.b32.xlu0 %v11372_v58, %s9831_s12  ;;  %v6395_v55 = vmul.f32 1.442695, %v6393_v32 }
0x214f   :  { %v6410_v62 = vpop.permute.xlu1 %6409 }
0x2150   :  { %9605 = vpow2.f32 %v6395_v55 }
0x2152   :  { %6499 = vrot.lane.b32.xlu0 %v11381_v3, %s9832_s13 }
0x215d   :  { %v9606_v14 = vpop.eup %9605 }
0x215e   :  { %v6399_v52 = vsel %vm3671_vm12, %v9606_v14, 0.0 }
0x2165   :  { %6400 = vadd.xlane.f32.xlu1 %v6399_v52 }
0x2176   :  { %6501 = vrot.lane.b32.xlu1 %v11398_v41, %s9832_s13 }
0x21b5   :  { %v6002_v57 = vpop.xlane.xlu1 %6001 }
0x21b9   :  { %v6005_v48 = vpop.xlane.xlu0 %6004  ;;  %v6115_v24 = vpop.xlane.xlu1 %6114 }
0x21ba   :  { %9607 = vrcp.f32 %v6115_v24 }
0x21bb   :  { %9609 = vrcp.f32 %v6002_v57 }
0x21bd   :  { %v6118_v23 = vpop.xlane.xlu0 %6117  ;;  %v6504_v9 = vpop.permute.xlu1 %6503 }
0x21be   :  { %9611 = vrcp.f32 %v6118_v23 }
0x21bf   :  { %9613 = vrcp.f32 %v6005_v48 }
0x21c1   :  { %v6404_v50 = vpop.xlane.xlu0 %6403 }
0x21c2   :  { %9615 = vrcp.f32 %v6404_v50 }
0x21c5   :  { %v6506_v60 = vpop.permute.xlu0 %6505 }
0x21c7   :  { %v9608_v25 = vpop.eup %9607 }
0x21c8   :  { %v6120_v29 = vmul.f32 %v9608_v25, %v9598_v43  ;;  %v9610_v3 = vpop.eup %9609 }
0x21c9   :  { %v6007_v7 = vmul.f32 %v9610_v3, %v9596_v40  ;;  %v6500_v0 = vpop.permute.xlu0 %6499  ;;  %v6796_v40 = vrot.slane %v11398_v41, 6 }
0x21ca   :  { %9290 = vmatprep.mubr.msk.f32.mxu1 %vm3671_vm12, %v6120_v29 }
0x21cb   :  { %v9612_v47 = vpop.eup %9611  ;;  %v11503_v43 = vsel %vm1639_vm7, %v6796_v40, %v6797_v35 }
0x21cc   :  { %v6122_v5 = vmul.f32 %v9612_v47, %v9602_v17  ;;  %v9614_v18 = vpop.eup %9613 }
0x21cd   :  { %v6009_v2 = vmul.f32 %v9614_v18, %v9600_v51 }
0x21ce   :  { %9291 = vmatmul.mubr.msk.f32.vlgmr.msra.gmra.mxu1 %vm3671_vm12, %v6122_v5 }
0x21cf   :  { %9294 = vmatpush3.msk.msra.mxu1 %vm1816_vm8, %v11445_v54  ;;  %9297 = vmatprep.mubr.msk.f32.mxu1 %vm3671_vm12, %v6007_v7  ;;  %v9616_v61 = vpop.eup %9615 }
0x21d0   :  { %9295 = vmatprep.subr.mxu1 %v11447_v1  ;;  %v6408_v49 = vmul.f32 %v9616_v61, %v9604_v53 }
0x21d1   :  { %9296 = vmatpush3.msra.mxu1 %v11447_v1 }
0x21d2   :  { %9307 = vmatprep.subr.msk.mxu1 %vm1816_vm8, %v6412_v21  ;;  %9298 = vmatmul.mubr.msk.f32.vlgmr.msra.gmra.mxu1 %vm3671_vm12, %v6009_v2 }
0x21d3   :  { %9308 = vmatpush3.msk.msra.mxu1 %vm1816_vm8, %v6412_v21 }
0x21d4   :  { %9309 = vmatprep.subr.mxu1 %v6410_v62 }
0x21d5   :  { %9310 = vmatpush3.msra.mxu1 %v6410_v62 }
0x21d6   :  { %9314 = vmatprep.subr.msk.mxu1 %vm3585_vm10, %v6506_v60 }
0x21ee   :  { %v6401_v46 = vpop.xlane.xlu1 %6400 }
0x21ef   :  { %9617 = vrcp.f32 %v6401_v46 }
0x21f2   :  { %v6502_v11 = vpop.permute.xlu1 %6501 }
0x21fc   :  { %v9618_v31 = vpop.eup %9617 }
0x21fd   :  { %v6406_v27 = vmul.f32 %v9618_v31, %v9606_v14  ;;  %v6706_v14 = vrot.slane %v11372_v58, 6 }
0x21ff   :  { %9311 = vmatprep.mubr.msk.f32.mxu1 %vm3671_vm12, %v6406_v27  ;;  %v11519_v52 = vsel %vm1639_vm7, %v6706_v14, %v6707_v19 }
0x2200   :  { %9312 = vmatmul.mubr.msk.f32.vlgmr.msra.gmra.mxu1 %vm3671_vm12, %v6408_v49 }
0x2201   :  { %9315 = vmatpush3.xpose.msk.msra.mxu1 %vm3585_vm10, %v6506_v60  ;;  %9318 = vmatprep.mubr.msk.f32.mxu1 %vm3585_vm10, %v6500_v0 }
0x2202   :  { %9316 = vmatprep.subr.msk.mxu1 %vm3585_vm10, %v6504_v9 }
0x2205   :  { %9317 = vmatpush3.xpose.msk.msra.mxu1 %vm3585_vm10, %v6504_v9 }
0x2208   :  { %9319 = vmatmul.mubr.msk.f32.vlgmr.msra.gmra.mxu1 %vm3585_vm10, %v6502_v11 }
0x2209   :  { %9343 = vmatprep.mubr.msk.f32.mxu1 %vm3585_vm10, %v11503_v43 }
0x228e   :  { %v9292_v51 = vpop.f32.mrf.mxu1 }
0x2290   :  { %v6204_v10 = vpop.f32.mrf.mxu1 }
0x2292   :  { %v9299_v8 = vpop.f32.mrf.mxu1 }
0x2293   :  { %v6293_v17 = vadd.f32 %v9299_v8, %v9292_v51 }
0x2294   :  { %v6287_v42 = vpop.f32.mrf.mxu1 }
0x2295   :  { %v6288_v53 = vadd.f32 %v6287_v42, %v6204_v10 }
0x22c0   :  { %v9313_v59 = vpop.f32.mrf.mxu1 }
0x22c1   :  { %v11507_v21 = vadd.f32 %v9313_v59, %v6293_v17 }
0x22c2   :  { %v6488_v41 = vpop.f32.mrf.mxu1 }
0x22c3   :  { %v11509_v38 = vadd.f32 %v6488_v41, %v6288_v53 }
0x22c8   :  { %v9320_v32 = vpop.f32.mrf.mxu1 }
0x22c9   :  { %v6593_v15 = vsel %vm3675_vm11, %v9320_v32, -inf }
0x22ca   :  { %6594 = vmax.xlane.f32.xlu1 %v6593_v15  ;;  %v6581_v35 = vpop.f32.mrf.mxu1 }
0x22cb   :  { %v6590_v55 = vsel %vm3671_vm12, %v6581_v35, -inf }
0x22cc   :  { %6591 = vmax.xlane.f32.xlu0 %v6590_v55 }
0x22db   :  { %6614 = vrot.lane.b32.xlu1 %v11445_v54, %s9833_s14 }
0x22df   :  { %6711 = vrot.lane.b32.xlu1 %v11519_v52, %s9825_s5 }
0x22e3   :  { %6916 = vrot.lane.b32.xlu1 %v11438_v34, %s9826_s20 }
0x22e7   :  { %6803 = vrot.lane.b32.xlu1 %v11438_v34, %s9827_s21 }
0x22eb   :  { %6910 = vrot.lane.b32.xlu1 %v11503_v43, %s9828_s29 }
0x22ef   :  { %6912 = vrot.lane.b32.xlu1 %v11443_v36, %s9828_s29 }
0x22f3   :  { %7200 = vrot.lane.b32.xlu1 %v11519_v52, %s9829_s30 }
0x22f7   :  { %7198 = vrot.lane.b32.xlu1 %v11443_v36, %s9830_s3 }
0x2353   :  { %v6595_v58 = vpop.xlane.xlu1 %6594 }
0x2354   :  { %v6597_v6 = vsub.f32 %v9320_v32, %v6595_v58 }
0x2355   :  { %v6592_v19 = vpop.xlane.xlu0 %6591 }
0x2356   :  { %v6600_v54 = vmul.f32 1.442695, %v6597_v6  ;;  %v6596_v62 = vsub.f32 %v6581_v35, %v6592_v19 }
0x2357   :  { %v6615_v57 = vpop.permute.xlu1 %6614 }
0x2358   :  { %9619 = vpow2.f32 %v6600_v54  ;;  %v6598_v48 = vmul.f32 1.442695, %v6596_v62  ;;  %9321 = vmatprep.subr.msk.mxu0 %vm1816_vm8, %v6615_v57 }
0x2359   :  { %9322 = vmatpush3.msk.msra.mxu0 %vm1816_vm8, %v6615_v57 }
0x235a   :  { %9621 = vpow2.f32 %v6598_v48 }
0x235b   :  { %v6712_v24 = vpop.permute.xlu1 %6711 }
0x235f   :  { %v6917_v23 = vpop.permute.xlu1 %6916 }
0x2363   :  { %v6804_v25 = vpop.permute.xlu1 %6803 }
0x2364   :  { %9339 = vmatprep.subr.msk.mxu1 %vm3585_vm10, %v6804_v25 }
0x2365   :  { %v9620_v29 = vpop.eup %9619  ;;  %9340 = vmatpush3.xpose.msk.msra.mxu1 %vm3585_vm10, %v6804_v25 }
0x2366   :  { %v6605_v3 = vsel %vm3675_vm11, %v9620_v29, 0.0 }
0x2367   :  { %v9622_v47 = vpop.eup %9621  ;;  %6606 = vadd.xlane.f32.xlu0 %v6605_v3  ;;  %v6911_v27 = vpop.permute.xlu1 %6910 }
0x2368   :  { %v6602_v5 = vsel %vm3671_vm12, %v9622_v47, 0.0 }
0x236b   :  { %6603 = vadd.xlane.f32.xlu0 %v6602_v5 }
0x2381   :  { %6612 = vrot.lane.b32.xlu0 %v11447_v1, %s9833_s14 }
0x2385   :  { %6713 = vrot.lane.b32.xlu0 %v11438_v34, %s9825_s5 }
0x2389   :  { %6914 = vrot.lane.b32.xlu0 %v11519_v52, %s9826_s20 }
0x238d   :  { %6801 = vrot.lane.b32.xlu0 %v11519_v52, %s9827_s21 }
0x2391   :  { %7202 = vrot.lane.b32.xlu0 %v11438_v34, %s9829_s30 }
0x2395   :  { %7196 = vrot.lane.b32.xlu0 %v11503_v43, %s9830_s3 }
0x23f0   :  { %v6607_v18 = vpop.xlane.xlu0 %6606 }
0x23f1   :  { %9623 = vrcp.f32 %v6607_v18 }
0x23f4   :  { %v6604_v7 = vpop.xlane.xlu0 %6603 }
0x23f5   :  { %9625 = vrcp.f32 %v6604_v7 }
0x23f8   :  { %v6613_v1 = vpop.permute.xlu0 %6612 }
0x23f9   :  { %9323 = vmatprep.subr.mxu0 %v6613_v1 }
0x23fa   :  { %9324 = vmatpush3.msra.mxu0 %v6613_v1 }
0x23fb   :  { %9328 = vmatprep.subr.mxu0 %v11344_v4 }
0x23fc   :  { %v6714_v50 = vpop.permute.xlu0 %6713 }
0x23fe   :  { %v9624_v60 = vpop.eup %9623 }
0x23ff   :  { %v6611_v31 = vmul.f32 %v9624_v60, %v9620_v29 }
0x2400   :  { %v6915_v2 = vpop.permute.xlu0 %6914 }
0x2402   :  { %v9626_v9 = vpop.eup %9625 }
0x2403   :  { %v6609_v46 = vmul.f32 %v9626_v9, %v9622_v47 }
0x2404   :  { %v6802_v61 = vpop.permute.xlu0 %6801 }
0x2405   :  { %9325 = vmatprep.mubr.msk.f32.mxu0 %vm3671_vm12, %v6609_v46  ;;  %9341 = vmatprep.subr.msk.mxu1 %vm3585_vm10, %v6802_v61 }
0x2406   :  { %9326 = vmatmul.mubr.msk.f32.vlgmr.msra.gmra.mxu0 %vm3671_vm12, %v6611_v31  ;;  %9342 = vmatpush3.xpose.msk.msra.mxu1 %vm3585_vm10, %v6802_v61 }
0x2407   :  { %9329 = vmatpush3.msra.mxu0 %v11344_v4  ;;  %9336 = vmatprep.mubr.msk.f32.mxu0 %vm748_vm2, %v6712_v24 }
0x2408   :  { %9330 = vmatprep.subr.mxu0 %v11346_v56  ;;  %v7203_v4 = vpop.permute.xlu0 %7202 }
0x2409   :  { %9331 = vmatpush3.msra.mxu0 %v11346_v56  ;;  %9344 = vmatmul.mubr.msk.f32.vlgmr.msra.gmra.mxu1 %vm3585_vm10, %v11443_v36  ;;  %v6913_v56 = vpop.permute.xlu1 %6912 }
0x240a   :  { %9332 = vmatprep.subr.mxu0 %v11350_v63 }
0x240b   :  { %9333 = vmatpush3.msra.mxu0 %v11350_v63 }
0x240c   :  { %9334 = vmatprep.subr.mxu0 %v11354_v28  ;;  %v7197_v63 = vpop.permute.xlu0 %7196 }
0x240d   :  { %9335 = vmatpush3.msra.mxu0 %v11354_v28  ;;  %v7201_v28 = vpop.permute.xlu1 %7200 }
0x240e   :  { %9337 = vmatmul.mubr.msk.f32.vlgmr.msra.gmra.mxu0 %vm748_vm2, %v6714_v50  ;;  %9346 = vmatprep.subr.msk.mxu0 %vm3585_vm10, %v6917_v23 }
0x240f   :  { %9347 = vmatpush3.xpose.msk.msra.mxu0 %vm3585_vm10, %v6917_v23  ;;  %9350 = vmatprep.mubr.msk.f32.mxu0 %vm3585_vm10, %v6911_v27 }
0x2410   :  { %9348 = vmatprep.subr.msk.mxu0 %vm3585_vm10, %v6915_v2 }
0x2411   :  { %v7199_v49 = vpop.permute.xlu1 %7198 }
0x2413   :  { %9349 = vmatpush3.xpose.msk.msra.mxu0 %vm3585_vm10, %v6915_v2 }
0x2414   :  { %9367 = vmatprep.subr.msk.mxu0 %vm3585_vm10, %v7203_v4 }
0x2416   :  { %9351 = vmatmul.mubr.msk.f32.vlgmr.msra.gmra.mxu0 %vm3585_vm10, %v6913_v56 }
0x2417   :  { %9368 = vmatpush3.xpose.msk.msra.mxu0 %vm3585_vm10, %v7203_v4  ;;  %9371 = vmatprep.mubr.msk.f32.mxu0 %vm3585_vm10, %v7197_v63 }
0x2418   :  { %9369 = vmatprep.subr.msk.mxu0 %vm3585_vm10, %v7201_v28 }
0x241b   :  { %9370 = vmatpush3.xpose.msk.msra.mxu0 %vm3585_vm10, %v7201_v28 }
0x241e   :  { %9372 = vmatmul.mubr.msk.f32.vlgmr.msra.gmra.mxu0 %vm3585_vm10, %v7199_v49 }
0x24c6   :  { %v9327_v0 = vpop.f32.mrf.mxu0 }
0x24c7   :  { %v11582_v40 = vadd.f32 %v9327_v0, %v11507_v21 }
0x24c8   :  { %v6691_v11 = vpop.f32.mrf.mxu0 }
0x24c9   :  { %v11585_v51 = vadd.f32 %v6691_v11, %v11509_v38  ;;  %v9345_v17 = vpop.f32.mrf.mxu1 }
0x24ca   :  { %v6891_v38 = vsel %vm3675_vm11, %v9345_v17, -inf }
0x24cb   :  { %v6879_v32 = vpop.f32.mrf.mxu1 }
0x24cc   :  { %v6888_v21 = vsel %vm3671_vm12, %v6879_v32, -inf }
0x24ce   :  { %v11587_v10 = vpop.f32.mrf.mxu0 }
0x24d0   :  { %v11589_v8 = vpop.f32.mrf.mxu0 }
0x24d6   :  { %v9352_v42 = vpop.f32.mrf.mxu0 }
0x24d7   :  { %v7004_v53 = vsel %vm3675_vm11, %v9352_v42, -inf }
0x24d8   :  { %7005 = vmax.xlane.f32.xlu1 %v7004_v53  ;;  %v6992_v59 = vpop.f32.mrf.mxu0 }
0x24d9   :  { %v7001_v41 = vsel %vm3671_vm12, %v6992_v59, -inf }
0x24da   :  { %7002 = vmax.xlane.f32.xlu0 %v7001_v41 }
0x24de   :  { %6889 = vmax.xlane.f32.xlu0 %v6888_v21  ;;  %v9373_v15 = vpop.f32.mrf.mxu0 }
0x24df   :  { %v7290_v35 = vsel %vm3675_vm11, %v9373_v15, -inf }
0x24e0   :  { %v7278_v1 = vpop.f32.mrf.mxu0 }
0x24e1   :  { %v7287_v50 = vsel %vm3671_vm12, %v7278_v1, -inf }
0x24e2   :  { %6892 = vmax.xlane.f32.xlu0 %v6891_v38 }
0x24e6   :  { %7291 = vmax.xlane.f32.xlu0 %v7290_v35 }
0x2561   :  { %v7006_v25 = vpop.xlane.xlu1 %7005 }
0x2562   :  { %v7008_v29 = vsub.f32 %v9352_v42, %v7006_v25 }
0x2563   :  { %v7003_v55 = vpop.xlane.xlu0 %7002 }
0x2564   :  { %v7011_v47 = vmul.f32 1.442695, %v7008_v29  ;;  %v7007_v46 = vsub.f32 %v6992_v59, %v7003_v55 }
0x2566   :  { %v7009_v61 = vmul.f32 1.442695, %v7007_v46 }
0x2567   :  { %v6890_v14 = vpop.xlane.xlu0 %6889 }
0x2568   :  { %v6894_v58 = vsub.f32 %v6879_v32, %v6890_v14 }
0x256a   :  { %v6896_v6 = vmul.f32 1.442695, %v6894_v58 }
0x256b   :  { %v6893_v19 = vpop.xlane.xlu0 %6892 }
0x256c   :  { %9627 = vpow2.f32 %v6896_v6  ;;  %v6895_v54 = vsub.f32 %v9345_v17, %v6893_v19 }
0x256e   :  { %v6898_v62 = vmul.f32 1.442695, %v6895_v54 }
0x256f   :  { %v7292_v3 = vpop.xlane.xlu0 %7291 }
0x2570   :  { %9629 = vpow2.f32 %v6898_v62  ;;  %v7294_v5 = vsub.f32 %v9373_v15, %v7292_v3 }
0x2571   :  { %9631 = vpow2.f32 %v7011_v47 }
0x2572   :  { %v7297_v18 = vmul.f32 1.442695, %v7294_v5 }
0x2574   :  { %9633 = vpow2.f32 %v7297_v18 }
0x2575   :  { %9635 = vpow2.f32 %v7009_v61  ;;  %v7614_v61 = vrot.slane %v11368_v39, %v10182_v12 }
0x2579   :  { %v11596_v57 = vpop.eup %9627 }
0x257a   :  { %v6900_v48 = vsel %vm3671_vm12, %v11596_v57, 0.0 }
0x257b   :  { %6901 = vadd.xlane.f32.xlu1 %v6900_v48 }
0x257d   :  { %v11600_v24 = vpop.eup %9629 }
0x257e   :  { %v6903_v23 = vsel %vm3675_vm11, %v11600_v24, 0.0  ;;  %v9632_v7 = vpop.eup %9631 }
0x257f   :  { %6904 = vadd.xlane.f32.xlu0 %v6903_v23  ;;  %v7016_v2 = vsel %vm3675_vm11, %v9632_v7, 0.0 }
0x2581   :  { %v11612_v60 = vpop.eup %9633 }
0x2582   :  { %v7302_v9 = vsel %vm3675_vm11, %v11612_v60, 0.0  ;;  %v9636_v31 = vpop.eup %9635 }
0x2583   :  { %v7013_v27 = vsel %vm3671_vm12, %v9636_v31, 0.0 }
0x258c   :  { %7027 = vrot.lane.b32.xlu1 %v11587_v10, %s9827_s21 }
0x2590   :  { %7311 = vrot.lane.b32.xlu1 %v11587_v10, %s9825_s5 }
0x2595   :  { %7025 = vrot.lane.b32.xlu0 %v11589_v8, %s9827_s21 }
0x25b4   :  { %7288 = vmax.xlane.f32.xlu1 %v7287_v50  ;;  %7017 = vadd.xlane.f32.xlu0 %v7016_v2 }
0x25b8   :  { %7303 = vadd.xlane.f32.xlu0 %v7302_v9 }
0x25c5   :  { %7309 = vrot.lane.b32.xlu1 %v11589_v8, %s9825_s5 }
0x25ce   :  { %7405 = vrot.lane.b32.xlu0 %v11438_v34, %s9831_s12 }
0x25d2   :  { %7399 = vrot.lane.b32.xlu0 %v11503_v43, %s9832_s13 }
0x25e9   :  { %7014 = vadd.xlane.f32.xlu1 %v7013_v27 }
0x25fa   :  { %7403 = vrot.lane.b32.xlu1 %v11519_v52, %s9831_s12 }
0x2604   :  { %v6902_v4 = vpop.xlane.xlu1 %6901 }
0x2608   :  { %v7028_v56 = vpop.permute.xlu1 %7027  ;;  %v6905_v63 = vpop.xlane.xlu0 %6904 }
0x2609   :  { %9353 = vmatprep.subr.msk.mxu1 %vm1816_vm8, %v7028_v56 }
0x260a   :  { %9354 = vmatpush3.msk.msra.mxu1 %vm1816_vm8, %v7028_v56 }
0x260c   :  { %v7026_v34 = vpop.permute.xlu0 %7025  ;;  %v7312_v43 = vpop.permute.xlu1 %7311 }
0x260d   :  { %9355 = vmatprep.subr.mxu1 %v7026_v34 }
0x260e   :  { %9356 = vmatpush3.msra.mxu1 %v7026_v34 }
0x260f   :  { %9360 = vmatprep.subr.msk.mxu1 %vm1816_vm8, %v11587_v10 }
0x263d   :  { %v7289_v28 = vpop.xlane.xlu1 %7288  ;;  %v7018_v42 = vpop.xlane.xlu0 %7017 }
0x263e   :  { %v7293_v49 = vsub.f32 %v7278_v1, %v7289_v28 }
0x2640   :  { %v7295_v0 = vmul.f32 1.442695, %v7293_v49 }
0x2641   :  { %v7310_v17 = vpop.permute.xlu1 %7309 }
0x2642   :  { %9637 = vpow2.f32 %v7295_v0 }
0x2643   :  { %9639 = vrcp.f32 %v6902_v4 }
0x2644   :  { %9641 = vrcp.f32 %v7018_v42 }
0x264f   :  { %v9638_v11 = vpop.eup %9637 }
0x2650   :  { %v7299_v52 = vsel %vm3671_vm12, %v9638_v11, 0.0  ;;  %v9640_v59 = vpop.eup %9639 }
0x2651   :  { %7300 = vadd.xlane.f32.xlu1 %v7299_v52  ;;  %v9642_v41 = vpop.eup %9641  ;;  %v6907_v35 = vmul.f32 %v9640_v59, %v11596_v57 }
0x2652   :  { %v7022_v38 = vmul.f32 %v9642_v41, %v9632_v7 }
0x2662   :  { %7401 = vrot.lane.b32.xlu1 %v11443_v36, %s9832_s13  ;;  %v7304_v36 = vpop.xlane.xlu0 %7303 }
0x2666   :  { %v7406_v14 = vpop.permute.xlu0 %7405 }
0x266a   :  { %v7400_v48 = vpop.permute.xlu0 %7399 }
0x2672   :  { %v7015_v53 = vpop.xlane.xlu1 %7014 }
0x2673   :  { %9643 = vrcp.f32 %v7015_v53 }
0x2674   :  { %9645 = vrcp.f32 %v6905_v63 }
0x2675   :  { %9647 = vrcp.f32 %v7304_v36 }
0x2676   :  { %v7404_v58 = vpop.permute.xlu1 %7403 }
0x2680   :  { %v9644_v32 = vpop.eup %9643 }
0x2681   :  { %v7020_v21 = vmul.f32 %v9644_v32, %v9636_v31  ;;  %v9646_v15 = vpop.eup %9645  ;;  %v7615_v31 = vadd.f32 %v7614_v61, %v11585_v51 }
0x2682   :  { %v6909_v55 = vmul.f32 %v9646_v15, %v11600_v24  ;;  %v9648_v19 = vpop.eup %9647 }
0x2683   :  { %9357 = vmatprep.mubr.msk.f32.mxu1 %vm3671_vm12, %v7020_v21  ;;  %v7308_v57 = vmul.f32 %v9648_v19, %v11612_v60  ;;  %v7619_v27 = vadd.f32 %v7615_v31, %v11336_v30 }
0x2684   :  { %9358 = vmatmul.mubr.msk.f32.vlgmr.msra.gmra.mxu1 %vm3671_vm12, %v7022_v38 }
0x2685   :  { %9361 = vmatpush3.msk.msra.mxu1 %vm1816_vm8, %v11587_v10  ;;  %9364 = vmatprep.mubr.msk.f32.mxu1 %vm3671_vm12, %v6907_v35  ;;  %v7623_v4 = vsel %vm748_vm2, %v7619_v27, 0.0 }
0x2686   :  { %9362 = vmatprep.subr.mxu1 %v11589_v8 }
0x2687   :  { %9363 = vmatpush3.msra.mxu1 %v11589_v8 }
0x2688   :  { %9374 = vmatprep.subr.msk.mxu1 %vm1816_vm8, %v7312_v43  ;;  %9365 = vmatmul.mubr.msk.f32.vlgmr.msra.gmra.mxu1 %vm3671_vm12, %v6909_v55 }
0x2689   :  { %9375 = vmatpush3.msk.msra.mxu1 %vm1816_vm8, %v7312_v43 }
0x268a   :  { %9376 = vmatprep.subr.mxu1 %v7310_v17 }
0x268b   :  { %9377 = vmatpush3.msra.mxu1 %v7310_v17 }
0x268c   :  { %9381 = vmatprep.subr.msk.mxu1 %vm3585_vm10, %v7406_v14 }
0x26da   :  { %v7301_v6 = vpop.xlane.xlu1 %7300 }
0x26db   :  { %9649 = vrcp.f32 %v7301_v6 }
0x26de   :  { %v7402_v24 = vpop.permute.xlu1 %7401 }
0x26e8   :  { %v9650_v54 = vpop.eup %9649 }
0x26e9   :  { %v7306_v62 = vmul.f32 %v9650_v54, %v9638_v11 }
0x26eb   :  { %9378 = vmatprep.mubr.msk.f32.mxu1 %vm3671_vm12, %v7306_v62 }
0x26ec   :  { %9379 = vmatmul.mubr.msk.f32.vlgmr.msra.gmra.mxu1 %vm3671_vm12, %v7308_v57 }
0x26ed   :  { %9382 = vmatpush3.xpose.msk.msra.mxu1 %vm3585_vm10, %v7406_v14  ;;  %9385 = vmatprep.mubr.msk.f32.mxu1 %vm3585_vm10, %v7400_v48 }
0x26ee   :  { %9383 = vmatprep.subr.msk.mxu1 %vm3585_vm10, %v7404_v58 }
0x26f1   :  { %9384 = vmatpush3.xpose.msk.msra.mxu1 %vm3585_vm10, %v7404_v58 }
0x26f4   :  { %9386 = vmatmul.mubr.msk.f32.vlgmr.msra.gmra.mxu1 %vm3585_vm10, %v7402_v24 }
0x2744   :  { %v9359_v23 = vpop.f32.mrf.mxu1 }
0x2746   :  { %v7104_v25 = vpop.f32.mrf.mxu1 }
0x2748   :  { %v9366_v29 = vpop.f32.mrf.mxu1 }
0x2749   :  { %v7193_v3 = vadd.f32 %v9366_v29, %v9359_v23 }
0x274a   :  { %v7187_v47 = vpop.f32.mrf.mxu1 }
0x274b   :  { %v7188_v18 = vadd.f32 %v7187_v47, %v7104_v25 }
0x27ac   :  { %v9380_v5 = vpop.f32.mrf.mxu1 }
0x27ad   :  { %v7398_v7 = vadd.f32 %v9380_v5, %v7193_v3 }
0x27ae   :  { %v7388_v1 = vpop.f32.mrf.mxu1 }
0x27af   :  { %v7397_v50 = vadd.f32 %v7388_v1, %v7188_v18 }
0x27b4   :  { %v9387_v2 = vpop.f32.mrf.mxu1 }
0x27b5   :  { %v7493_v60 = vsel %vm3675_vm11, %v9387_v2, -inf }
0x27b6   :  { %7494 = vmax.xlane.f32.xlu1 %v7493_v60  ;;  %v7481_v9 = vpop.f32.mrf.mxu1 }
0x27b7   :  { %v7490_v46 = vsel %vm3671_vm12, %v7481_v9, -inf }
0x27b8   :  { %7491 = vmax.xlane.f32.xlu0 %v7490_v46 }
0x27c7   :  { %7514 = vrot.lane.b32.xlu1 %v11587_v10, %s9833_s14 }
0x27eb   :  { %7624 = vadd.xlane.f32.xlu1 %v7623_v4 }
0x283f   :  { %v7495_v56 = vpop.xlane.xlu1 %7494 }
0x2840   :  { %v7497_v63 = vsub.f32 %v9387_v2, %v7495_v56  ;;  %v11683_v56 = vld [vmem:[#allocation10 + $0x8] sm:$0xff] }
0x2841   :  { %v7492_v34 = vpop.xlane.xlu0 %7491 }
0x2842   :  { %v7500_v43 = vmul.f32 1.442695, %v7497_v63  ;;  %v7496_v28 = vsub.f32 %v7481_v9, %v7492_v34  ;;  %v7678_v63 = vrot.slane %v11683_v56, %v10194_v16 }
0x2843   :  { %v7515_v49 = vpop.permute.xlu1 %7514 }
0x2844   :  { %9651 = vpow2.f32 %v7500_v43  ;;  %v7498_v0 = vmul.f32 1.442695, %v7496_v28  ;;  %9388 = vmatprep.subr.msk.mxu0 %vm1816_vm8, %v7515_v49  ;;  %v7686_v28 = vrot.slane %v11683_v56, %v10578_v33 }
0x2845   :  { %9389 = vmatpush3.msk.msra.mxu0 %vm1816_vm8, %v7515_v49 }
0x2846   :  { %9653 = vpow2.f32 %v7498_v0 }
0x2851   :  { %v9652_v12 = vpop.eup %9651 }
0x2852   :  { %v7505_v39 = vsel %vm3675_vm11, %v9652_v12, 0.0 }
0x2853   :  { %v9654_v30 = vpop.eup %9653  ;;  %7506 = vadd.xlane.f32.xlu0 %v7505_v39  ;;  %v7694_v39 = vld [vmem:[#allocation9 + $0x30] sm:$0xff] }
0x2854   :  { %v7502_v51 = vsel %vm3671_vm12, %v9654_v30, 0.0 }
0x2857   :  { %7503 = vadd.xlane.f32.xlu0 %v7502_v51  ;;  %v7692_v51 = vld [vmem:[#allocation9 + $0x20] sm:$0xff] }
0x286d   :  { %7512 = vrot.lane.b32.xlu0 %v11589_v8, %s9833_s14 }
0x2874   :  { %v7625_v32 = vpop.xlane.xlu1 %7624 }
0x2875   :  { %v7635_v15 = vmul.f32 0.03125, %v7625_v32 }
0x2877   :  { %v7639_v58 = vsub.f32 %v7619_v27, %v7635_v15 }
0x2879   :  { %v7643_v25 = vmul.f32 %v7639_v58, %v7639_v58 }
0x28dc   :  { %v7507_v10 = vpop.xlane.xlu0 %7506 }
0x28dd   :  { %9655 = vrcp.f32 %v7507_v10 }
0x28e0   :  { %v7504_v11 = vpop.xlane.xlu0 %7503 }
0x28e1   :  { %9657 = vrcp.f32 %v7504_v11 }
0x28e4   :  { %v7513_v52 = vpop.permute.xlu0 %7512 }
0x28e5   :  { %9390 = vmatprep.subr.mxu0 %v7513_v52 }
0x28e6   :  { %9391 = vmatpush3.msra.mxu0 %v7513_v52 }
0x28ea   :  { %v9656_v17 = vpop.eup %9655 }
0x28eb   :  { %v7511_v59 = vmul.f32 %v9656_v17, %v9652_v12  ;;  %v7695_v12 = vld [vmem:[#allocation9 + $0x38] sm:$0xff] }
0x28ec   :  { %9395 = vmatprep.subr.mxu0 %v7695_v12 }
0x28ee   :  { %v9658_v42 = vpop.eup %9657 }
0x28ef   :  { %v7509_v53 = vmul.f32 %v9658_v42, %v9654_v30  ;;  %v7693_v30 = vld [vmem:[#allocation9 + $0x28] sm:$0xff] }
0x28f1   :  { %9392 = vmatprep.mubr.msk.f32.mxu0 %vm3671_vm12, %v7509_v53 }
0x28f2   :  { %9393 = vmatmul.mubr.msk.f32.vlgmr.msra.gmra.mxu0 %vm3671_vm12, %v7511_v59 }
0x28f3   :  { %9396 = vmatpush3.msra.mxu0 %v7695_v12 }
0x28f4   :  { %9397 = vmatprep.subr.mxu0 %v7694_v39 }
0x28f5   :  { %9398 = vmatpush3.msra.mxu0 %v7694_v39 }
0x28f6   :  { %9399 = vmatprep.subr.mxu0 %v7693_v30 }
0x28f7   :  { %9400 = vmatpush3.msra.mxu0 %v7693_v30 }
0x28f8   :  { %9401 = vmatprep.subr.mxu0 %v7692_v51 }
0x28f9   :  { %9402 = vmatpush3.msra.mxu0 %v7692_v51 }
0x29b2   :  { %v9394_v41 = vpop.f32.mrf.mxu0 }
0x29b3   :  { %v7601_v21 = vadd.f32 %v9394_v41, %v7398_v7 }
0x29b4   :  { %v7591_v38 = vpop.f32.mrf.mxu0 }
0x29b5   :  { %v7600_v8 = vadd.f32 %v7591_v38, %v7397_v50  ;;  %v7605_v35 = vrot.slane %v7601_v21, 2 }
0x29b7   :  { %v7604_v36 = vrot.slane %v7600_v8, 2  ;;  %v7618_v6 = vadd.f32 %v7614_v61, %v7605_v35 }
0x29b9   :  { %v7606_v55 = vsel %vm1816_vm8, %v7604_v36, %v7605_v35  ;;  %v7610_v14 = vsel %vm1816_vm8, %v11582_v40, %v7604_v36  ;;  %v7622_v23 = vadd.f32 %v7618_v6, %v11362_v13  ;;  %v7647_v40 = vsel %vm748_vm2, %v7643_v25, 0.0  ;;  %v8262_v25 = vld [vmem:[%s11781_s9 + $0x40] sm:$0xff] }
0x29ba   :  { %v7616_v19 = vadd.f32 %v7614_v61, %v7610_v14  ;;  %v7617_v54 = vadd.f32 %v7614_v61, %v7606_v55 }
0x29bb   :  { %v7632_v29 = vsel %vm5317_vm13, %v7622_v23, 0.0 }
0x29bc   :  { %v7620_v62 = vadd.f32 %v7616_v19, %v11338_v37  ;;  %v7621_v57 = vadd.f32 %v7617_v54, %v11360_v22  ;;  %v8269_v19 = vld [vmem:[%s11781_s9 + $0x78] sm:$0xff]  ;;  %v8268_v54 = vld [vmem:[%s11781_s9 + $0x70] sm:$0xff] }
0x29bd   :  { %9409 = vmatprep.subr.mxu1 %v8269_v19 }
0x29be   :  { %v7626_v48 = vsel %vm748_vm2, %v7620_v62, 0.0  ;;  %v7629_v24 = vsel %vm748_vm2, %v7621_v57, 0.0  ;;  %9410 = vmatpush3.msra.mxu1 %v8269_v19 }
0x29bf   :  { %7627 = vadd.xlane.f32.xlu0 %v7626_v48  ;;  %7630 = vadd.xlane.f32.xlu1 %v7629_v24  ;;  %v8265_v48 = vld [vmem:[%s11781_s9 + $0x58] sm:$0xff]  ;;  %v8264_v24 = vld [vmem:[%s11781_s9 + $0x50] sm:$0xff] }
0x29c0   :  { %9411 = vmatprep.subr.mxu1 %v8268_v54 }
0x29c1   :  { %9412 = vmatpush3.msra.mxu1 %v8268_v54 }
0x29c3   :  { %7633 = vadd.xlane.f32.xlu0 %v7632_v29  ;;  %7648 = vadd.xlane.f32.xlu1 %v7647_v40  ;;  %v7699_v29 = vrot.slane %v11683_v56, %v11829_v26 }
0x2a48   :  { %v7628_v3 = vpop.xlane.xlu0 %7627  ;;  %v7631_v47 = vpop.xlane.xlu1 %7630 }
0x2a49   :  { %v7636_v37 = vmul.f32 0.03125, %v7628_v3  ;;  %v7637_v5 = vmul.f32 0.03125, %v7631_v47 }
0x2a4b   :  { %v7640_v22 = vsub.f32 %v7620_v62, %v7636_v37  ;;  %v7641_v18 = vsub.f32 %v7621_v57, %v7637_v5  ;;  %v8267_v62 = vld [vmem:[%s11781_s9 + $0x68] sm:$0xff]  ;;  %v8266_v57 = vld [vmem:[%s11781_s9 + $0x60] sm:$0xff] }
0x2a4c   :  { %v7634_v7 = vpop.xlane.xlu0 %7633  ;;  %v7649_v1 = vpop.xlane.xlu1 %7648  ;;  %9413 = vmatprep.subr.mxu1 %v8267_v62 }
0x2a4d   :  { %v7638_v50 = vmul.f32 0.03125, %v7634_v7  ;;  %v7659_v2 = vmul.f32 0.03125, %v7649_v1  ;;  %v7644_v13 = vmul.f32 %v7640_v22, %v7640_v22  ;;  %v7645_v60 = vmul.f32 %v7641_v18, %v7641_v18  ;;  %9414 = vmatpush3.msra.mxu1 %v8267_v62 }
0x2a4e   :  { %9415 = vmatprep.subr.mxu1 %v8266_v57 }
0x2a4f   :  { %v7642_v9 = vsub.f32 %v7622_v23, %v7638_v50  ;;  %v7663_v46 = vadd.f32 1e-05, %v7659_v2  ;;  %v7650_v61 = vsel %vm748_vm2, %v7644_v13, 0.0  ;;  %v7653_v31 = vsel %vm748_vm2, %v7645_v60, 0.0  ;;  %9416 = vmatpush3.msra.mxu1 %v8266_v57  ;;  %v8263_v23 = vld [vmem:[%s11781_s9 + $0x48] sm:$0xff] }
0x2a50   :  { %7651 = vadd.xlane.f32.xlu0 %v7650_v61  ;;  %7654 = vadd.xlane.f32.xlu1 %v7653_v31 }
0x2a51   :  { %9659 = vrsqrt.f32 %v7663_v46  ;;  %v7646_v27 = vmul.f32 %v7642_v9, %v7642_v9  ;;  %9417 = vmatprep.subr.mxu1 %v8265_v48 }
0x2a52   :  { %9418 = vmatpush3.msra.mxu1 %v8265_v48 }
0x2a53   :  { %v7656_v4 = vsel %vm5317_vm13, %v7646_v27, 0.0  ;;  %9419 = vmatprep.subr.mxu1 %v8264_v24 }
0x2a54   :  { %7657 = vadd.xlane.f32.xlu0 %v7656_v4  ;;  %9420 = vmatpush3.msra.mxu1 %v8264_v24 }
0x2a55   :  { %9421 = vmatprep.subr.mxu1 %v8263_v23 }
0x2a56   :  { %9422 = vmatpush3.msra.mxu1 %v8263_v23 }
0x2a57   :  { %9423 = vmatprep.subr.mxu1 %v8262_v25 }
0x2a58   :  { %9424 = vmatpush3.msra.mxu1 %v8262_v25 }
0x2a5e   :  { %v9660_v34 = vpop.eup %9659 }
0x2a5f   :  { %v7671_v43 = vmul.f32 %v9660_v34, %v7639_v58 }
0x2a61   :  { %v7679_v49 = vmul.f32 %v7678_v63, %v7671_v43 }
0x2a63   :  { %v11689_v0 = vadd.f32 %v7686_v28, %v7679_v49 }
0x2a65   :  { %9403 = vmatprep.mubr.msk.f32.mxu0 %vm748_vm2, %v11689_v0 }
0x2ad9   :  { %v7652_v16 = vpop.xlane.xlu0 %7651  ;;  %v7655_v33 = vpop.xlane.xlu1 %7654 }
0x2ada   :  { %v7660_v10 = vmul.f32 0.03125, %v7652_v16  ;;  %v7661_v11 = vmul.f32 0.03125, %v7655_v33 }
0x2adc   :  { %v7664_v52 = vadd.f32 1e-05, %v7660_v10  ;;  %v7665_v17 = vadd.f32 1e-05, %v7661_v11 }
0x2add   :  { %v7658_v42 = vpop.xlane.xlu0 %7657 }
0x2ade   :  { %9661 = vrsqrt.f32 %v7664_v52  ;;  %v7662_v53 = vmul.f32 0.03125, %v7658_v42 }
0x2adf   :  { %9663 = vrsqrt.f32 %v7665_v17 }
0x2ae0   :  { %v7666_v59 = vadd.f32 1e-05, %v7662_v53 }
0x2ae2   :  { %9665 = vrsqrt.f32 %v7666_v59 }
0x2aeb   :  { %v9662_v41 = vpop.eup %9661 }
0x2aec   :  { %v9664_v32 = vpop.eup %9663  ;;  %v7672_v21 = vmul.f32 %v9662_v41, %v7640_v22 }
0x2aed   :  { %v7673_v38 = vmul.f32 %v9664_v32, %v7641_v18 }
0x2aee   :  { %v7680_v8 = vmul.f32 %v7678_v63, %v7672_v21 }
0x2aef   :  { %v9666_v15 = vpop.eup %9665  ;;  %v7681_v35 = vmul.f32 %v7678_v63, %v7673_v38 }
0x2af0   :  { %v11693_v36 = vadd.f32 %v7686_v28, %v7680_v8  ;;  %v7674_v55 = vmul.f32 %v9666_v15, %v7642_v9 }
0x2af1   :  { %v11695_v14 = vadd.f32 %v7686_v28, %v7681_v35  ;;  %v7845_v35 = vrot.slane %v11683_v56, %v10715_v20 }
0x2af2   :  { %9404 = vmatmul.mubr.msk.f32.vlgmr.msra.gmra.mxu0 %vm748_vm2, %v11693_v36  ;;  %v7682_v58 = vmul.f32 %v7678_v63, %v7674_v55 }
0x2af3   :  { %9406 = vmatprep.mubr.msk.f32.mxu0 %vm748_vm2, %v11695_v14 }
0x2af4   :  { %v11701_v6 = vadd.f32 %v7686_v28, %v7682_v58 }
0x2af6   :  { %9407 = vmatmul.mubr.msk.f32.gmra.mxu0 %vm748_vm2, %v11701_v6 }
0x2bb2   :  { %v9405_v40 = vpop.f32.mrf.mxu0 }
0x2bb3   :  { %v7784_v3 = vadd.f32 %v9405_v40, %v7699_v29 }
0x2bb4   :  { %v7778_v47 = vpop.f32.mrf.mxu0 }
0x2bb5   :  { %v7802_v37 = vmul.f32 0.044715, %v7784_v3  ;;  %v7779_v5 = vadd.f32 %v7778_v47, %v7699_v29  ;;  %v7798_v17 = vmul.f32 0.5, %v7784_v3 }
0x2bb6   :  { %v9408_v22 = vpop.f32.mrf.mxu0 }
0x2bb7   :  { %v7806_v18 = vmul.f32 %v7802_v37, %v7784_v3  ;;  %v7801_v7 = vmul.f32 0.044715, %v7779_v5  ;;  %v7794_v1 = vadd.f32 %v9408_v22, %v7699_v29  ;;  %v7797_v10 = vmul.f32 0.5, %v7779_v5 }
0x2bb8   :  { %v7788_v50 = vpop.f32.mrf.mxu0 }
0x2bb9   :  { %v7810_v2 = vmul.f32 %v7806_v18, %v7784_v3  ;;  %v7805_v13 = vmul.f32 %v7801_v7, %v7779_v5  ;;  %v7804_v60 = vmul.f32 0.044715, %v7794_v1  ;;  %v7789_v9 = vadd.f32 %v7788_v50, %v7699_v29 }
0x2bba   :  { %v7800_v38 = vmul.f32 0.5, %v7794_v1 }
0x2bbb   :  { %v7814_v46 = vadd.f32 %v7810_v2, %v7784_v3  ;;  %v7809_v61 = vmul.f32 %v7805_v13, %v7779_v5  ;;  %v7808_v31 = vmul.f32 %v7804_v60, %v7794_v1  ;;  %v7803_v27 = vmul.f32 0.044715, %v7789_v9 }
0x2bbc   :  { %v7799_v32 = vmul.f32 0.5, %v7789_v9 }
0x2bbd   :  { %v7818_v4 = vmul.f32 0.7978846, %v7814_v46  ;;  %v7813_v26 = vadd.f32 %v7809_v61, %v7779_v5  ;;  %v7812_v63 = vmul.f32 %v7808_v31, %v7794_v1  ;;  %v7807_v34 = vmul.f32 %v7803_v27, %v7789_v9 }
0x2bbf   :  { %9667 = vtanh.f32 %v7818_v4  ;;  %v7816_v43 = vadd.f32 %v7812_v63, %v7794_v1  ;;  %v7811_v28 = vmul.f32 %v7807_v34, %v7789_v9  ;;  %v7817_v49 = vmul.f32 0.7978846, %v7813_v26 }
0x2bc1   :  { %v7815_v12 = vadd.f32 %v7811_v28, %v7789_v9  ;;  %9669 = vtanh.f32 %v7817_v49  ;;  %v7820_v39 = vmul.f32 0.7978846, %v7816_v43 }
0x2bc3   :  { %v7819_v30 = vmul.f32 0.7978846, %v7815_v12  ;;  %9671 = vtanh.f32 %v7820_v39 }
0x2bc5   :  { %9673 = vtanh.f32 %v7819_v30 }
0x2bcc   :  { %v9668_v51 = vpop.eup %9667 }
0x2bcd   :  { %v7826_v33 = vadd.f32 1.0, %v9668_v51 }
0x2bce   :  { %v9670_v16 = vpop.eup %9669 }
0x2bcf   :  { %v7825_v11 = vadd.f32 1.0, %v9670_v16  ;;  %v7830_v59 = vmul.f32 %v7826_v33, %v7798_v17  ;;  %v8010_v17 = vrot.slane %v11683_v56, %v10886_v45 }
0x2bd0   :  { %v9672_v52 = vpop.eup %9671 }
0x2bd1   :  { %v7829_v42 = vmul.f32 %v7825_v11, %v7797_v10  ;;  %v7828_v41 = vadd.f32 1.0, %v9672_v52  ;;  %v8002_v11 = vrot.slane %v11683_v56, %v10883_v44 }
0x2bd2   :  { %v9674_v53 = vpop.eup %9673 }
0x2bd3   :  { %9425 = vmatprep.mubr.msk.f32.mxu1 %vm187_vm4, %v7829_v42  ;;  %v7827_v21 = vadd.f32 1.0, %v9674_v53  ;;  %v7832_v15 = vmul.f32 %v7828_v41, %v7800_v38 }
0x2bd4   :  { %9426 = vmatmul.mubr.msk.f32.vlgmr.msra.gmra.mxu1 %vm187_vm4, %v7830_v59 }
0x2bd5   :  { %v7831_v8 = vmul.f32 %v7827_v21, %v7799_v32 }
0x2bd7   :  { %9428 = vmatprep.mubr.msk.f32.mxu1 %vm187_vm4, %v7831_v8 }
0x2bd8   :  { %9429 = vmatmul.mubr.msk.f32.gmra.mxu1 %vm187_vm4, %v7832_v15  ;;  %vm8018_vm4 = vcmask 261126  }
0x2c94   :  { %v9427_v55 = vpop.f32.mrf.mxu1 }
0x2c95   :  { %v7930_v58 = vadd.f32 %v9427_v55, %v7845_v35 }
0x2c96   :  { %v7924_v19 = vpop.f32.mrf.mxu1 }
0x2c97   :  { %v7944_v54 = vadd.f32 %v7930_v58, %v11693_v36  ;;  %v7925_v62 = vadd.f32 %v7924_v19, %v7845_v35 }
0x2c98   :  { %v9430_v57 = vpop.f32.mrf.mxu1 }
0x2c99   :  { %v7943_v48 = vadd.f32 %v7925_v62, %v11689_v0  ;;  %v7940_v24 = vadd.f32 %v9430_v57, %v7845_v35  ;;  %v7950_v23 = vsel %vm748_vm2, %v7944_v54, 0.0 }
0x2c9a   :  { %7951 = vadd.xlane.f32.xlu0 %v7950_v23  ;;  %v7934_v25 = vpop.f32.mrf.mxu1 }
0x2c9b   :  { %v7946_v29 = vadd.f32 %v7940_v24, %v11701_v6  ;;  %v7935_v40 = vadd.f32 %v7934_v25, %v7845_v35  ;;  %v7947_v3 = vsel %vm748_vm2, %v7943_v48, 0.0 }
0x2c9c   :  { %7948 = vadd.xlane.f32.xlu1 %v7947_v3 }
0x2c9d   :  { %v7945_v20 = vadd.f32 %v7935_v40, %v11695_v14  ;;  %v7956_v47 = vsel %vm5317_vm13, %v7946_v29, 0.0 }
0x2c9e   :  { %7957 = vadd.xlane.f32.xlu0 %v7956_v47 }
0x2c9f   :  { %v7953_v36 = vsel %vm748_vm2, %v7945_v20, 0.0 }
0x2ca0   :  { %7954 = vadd.xlane.f32.xlu1 %v7953_v36 }
0x2d23   :  { %v7952_v0 = vpop.xlane.xlu0 %7951 }
0x2d24   :  { %v7960_v37 = vmul.f32 0.03125, %v7952_v0 }
0x2d25   :  { %v7949_v5 = vpop.xlane.xlu1 %7948 }
0x2d26   :  { %v7964_v22 = vsub.f32 %v7944_v54, %v7960_v37  ;;  %v7959_v18 = vmul.f32 0.03125, %v7949_v5 }
0x2d27   :  { %v7958_v7 = vpop.xlane.xlu0 %7957 }
0x2d28   :  { %v7963_v1 = vsub.f32 %v7943_v48, %v7959_v18  ;;  %v7962_v6 = vmul.f32 0.03125, %v7958_v7  ;;  %v7968_v50 = vmul.f32 %v7964_v22, %v7964_v22 }
0x2d29   :  { %v7955_v2 = vpop.xlane.xlu1 %7954 }
0x2d2a   :  { %v7966_v13 = vsub.f32 %v7946_v29, %v7962_v6  ;;  %v7961_v60 = vmul.f32 0.03125, %v7955_v2  ;;  %v7974_v14 = vsel %vm748_vm2, %v7968_v50, 0.0  ;;  %v7967_v9 = vmul.f32 %v7963_v1, %v7963_v1 }
0x2d2b   :  { %7975 = vadd.xlane.f32.xlu0 %v7974_v14 }
0x2d2c   :  { %v7965_v46 = vsub.f32 %v7945_v20, %v7961_v60  ;;  %v7971_v61 = vsel %vm748_vm2, %v7967_v9, 0.0  ;;  %v7970_v31 = vmul.f32 %v7966_v13, %v7966_v13 }
0x2d2d   :  { %7972 = vadd.xlane.f32.xlu1 %v7971_v61 }
0x2d2e   :  { %v7980_v27 = vsel %vm5317_vm13, %v7970_v31, 0.0  ;;  %v7969_v4 = vmul.f32 %v7965_v46, %v7965_v46 }
0x2d2f   :  { %7981 = vadd.xlane.f32.xlu0 %v7980_v27 }
0x2d30   :  { %v7977_v26 = vsel %vm748_vm2, %v7969_v4, 0.0 }
0x2d31   :  { %7978 = vadd.xlane.f32.xlu1 %v7977_v26 }
0x2db4   :  { %v7976_v63 = vpop.xlane.xlu0 %7975 }
0x2db5   :  { %v7984_v34 = vmul.f32 0.03125, %v7976_v63 }
0x2db6   :  { %v7973_v43 = vpop.xlane.xlu1 %7972 }
0x2db7   :  { %v7988_v28 = vadd.f32 1e-05, %v7984_v34  ;;  %v7983_v49 = vmul.f32 0.03125, %v7973_v43 }
0x2db8   :  { %v7982_v12 = vpop.xlane.xlu0 %7981 }
0x2db9   :  { %9675 = vrsqrt.f32 %v7988_v28  ;;  %v7987_v39 = vadd.f32 1e-05, %v7983_v49  ;;  %v7986_v30 = vmul.f32 0.03125, %v7982_v12 }
0x2dba   :  { %v7979_v51 = vpop.xlane.xlu1 %7978 }
0x2dbb   :  { %9677 = vrsqrt.f32 %v7987_v39  ;;  %v7990_v16 = vadd.f32 1e-05, %v7986_v30  ;;  %v7985_v33 = vmul.f32 0.03125, %v7979_v51 }
0x2dbd   :  { %9679 = vrsqrt.f32 %v7990_v16  ;;  %v7989_v10 = vadd.f32 1e-05, %v7985_v33 }
0x2dbf   :  { %9681 = vrsqrt.f32 %v7989_v10 }
0x2dc6   :  { %v9676_v52 = vpop.eup %9675 }
0x2dc7   :  { %v7996_v42 = vmul.f32 %v9676_v52, %v7964_v22 }
0x2dc8   :  { %v9678_v53 = vpop.eup %9677 }
0x2dc9   :  { %v8004_v59 = vmul.f32 %v8002_v11, %v7996_v42  ;;  %v7995_v41 = vmul.f32 %v9678_v53, %v7963_v1 }
0x2dca   :  { %v9680_v32 = vpop.eup %9679 }
0x2dcb   :  { %v8012_v21 = vadd.f32 %v8010_v17, %v8004_v59  ;;  %v8003_v38 = vmul.f32 %v8002_v11, %v7995_v41  ;;  %v7998_v8 = vmul.f32 %v9680_v32, %v7966_v13 }
0x2dcc   :  { %v9682_v15 = vpop.eup %9681 }
0x2dcd   :  { %8016 = vst.msk [vmem:[%s11783_s11 + $0x8] sm:$0x3f] %vm1515_vm6, %v8012_v21  ;;  %v8011_v44 = vadd.f32 %v8010_v17, %v8003_v38  ;;  %v8006_v45 = vmul.f32 %v8002_v11, %v7998_v8  ;;  %v7997_v56 = vmul.f32 %v9682_v15, %v7965_v46 }
0x2dce   :  { %8274 = vst.msk [vmem:[%s11783_s11 + $0xa] sm:$0xc0] %vm8018_vm4, %v8012_v21 }
0x2dcf   :  { %8015 = vst.msk [vmem:[%s11783_s11] sm:$0xff] %vm748_vm2, %v8011_v44  ;;  %v8014_v35 = vadd.f32 %v8010_v17, %v8006_v45  ;;  %v8005_v55 = vmul.f32 %v8002_v11, %v7997_v56 }
0x2dd1   :  { %8276 = vst.msk [vmem:[%s11783_s11 + $0x1a] sm:$0xf] %vm5317_vm13, %v8014_v35  ;;  %v8013_v58 = vadd.f32 %v8010_v17, %v8005_v55 }
0x2dd3   :  { %8275 = vst.msk [vmem:[%s11783_s11 + $0x12] sm:$0xff] %vm748_vm2, %v8013_v58 }
0x2dd4   :  { %8026 = vsyncpa [#allocation3], 1 }
0x2dd5   :  { %8027 = vsyncpa [#allocation5], 1 }
0x2dd6   :  { %8028 = vsyncpa [#allocation8], 1 }
0x2dd7   :  { %8029 = vsyncpa [#allocation11], 1 }

</bundles_post_ra>
